<compile_context>
chip_gen: v6e
topology: v6e:2x2x1
jax: 0.10.0
libtpu: 0.0.40
codegen_flags: <defaults>
</compile_context>

<pallas_src>
import functools
import math

import jax
import jax.numpy as jnp
from jax.experimental import pallas as pl
from jax.experimental.pallas import tpu as pltpu

# ----------------------------- config (scaled down) -----------------------------
VOCAB = 100
TYPE_VOCAB = 2
MAX_POS = 16
HIDDEN = 32
N_HEADS = 4
HEAD_DIM = HIDDEN // N_HEADS
N_LAYERS = 2
INTERMEDIATE = 64
N_TASKS = 4
LN_EPS = 1e-12


# ----------------------------- in-kernel helpers ---------------------------------
def _layernorm(h, gamma, beta):
    mu = jnp.mean(h, axis=-1, keepdims=True)
    d = h - mu
    var = jnp.mean(d * d, axis=-1, keepdims=True)
    return d * jax.lax.rsqrt(var + LN_EPS) * gamma + beta


def _gelu(x):
    # TODO(synk): HF bert-base uses exact erf GELU; tanh approximation kept for robust Mosaic lowering.
    return 0.5 * x * (1.0 + jnp.tanh(0.7978845608028654 * (x + 0.044715 * x * x * x)))


def _bdot(a_f32, w_bf16, bias_f32):
    """bf16 MXU matmul with f32 accumulation + f32 bias."""
    return jnp.dot(a_f32.astype(jnp.bfloat16), w_bf16,
                   preferred_element_type=jnp.float32) + bias_f32


def _full(shape):
    """Whole-array BlockSpec (block == array, single grid step)."""
    zeros = (0,) * len(shape)
    return pl.BlockSpec(shape, lambda i, _z=zeros: _z)


# ----------------------------- fully fused forward kernel ------------------------
def _mtb_kernel(emb_ref, mask_ref, emb_g_ref, emb_b_ref,
                wqkv_ref, bqkv_ref, wo_ref, bo_ref, ln1g_ref, ln1b_ref,
                wi_ref, bi_ref, wd_ref, bd_ref, ln2g_ref, ln2b_ref,
                wp_ref, bp_ref, wc_ref, bc_ref, o_ref,
                *, batch, seq, n_layers, n_heads, head_dim):
    """Embeddings LayerNorm -> n_layers encoder layers -> pooler -> classifiers.

    emb:  [B*S, H] summed (word+pos+type) embeddings, f32
    mask: [B, S]   additive key mask (-1e4 on padding), f32
    per-layer weights are stacked along a leading [n_layers] axis (bf16 matmul
    weights, f32 biases / LayerNorm params).  out: [B, N_TASKS] logits, f32.
    """
    hidden = n_heads * head_dim

    # --- embeddings LayerNorm (dropout(0.1) is identity at inference) ---
    x = _layernorm(emb_ref[...], emb_g_ref[...], emb_b_ref[...])       # [B*S, H] f32
    mask_all = mask_ref[...]                                            # [B, S]

    # --- encoder layers, unrolled (n_layers is a Python constant) ---
    for l in range(n_layers):
        # Fused QKV projection; 1/sqrt(head_dim) is pre-folded into the Q columns.
        qkv = _bdot(x, wqkv_ref[l], bqkv_ref[l])                        # [B*S, 3H] f32

        # Self-attention: per-(batch, head) contexts kept in registers.
        # TODO(synk): at bert-base scale replace this unrolled loop with batched
        # einsum attention over a (B*nH, S, Dh) layout to cut MXU issue groups.
        batch_ctx = []
        for b in range(batch):
            r0 = b * seq
            q_b = qkv[r0:r0 + seq, 0:hidden]                            # [S, H]
            k_b = qkv[r0:r0 + seq, hidden:2 * hidden]
            v_b = qkv[r0:r0 + seq, 2 * hidden:3 * hidden]
            mask_b = mask_all[b:b + 1, :]                               # [1, S]
            head_ctx = []
            for h in range(n_heads):
                c0 = h * head_dim
                qh = q_b[:, c0:c0 + head_dim]                           # [S, Dh]
                kh = k_b[:, c0:c0 + head_dim]
                vh = v_b[:, c0:c0 + head_dim]
                # scores = qh @ kh^T (contract last dims; no explicit transpose)
                s = jax.lax.dot_general(qh, kh, (((1,), (1,)), ((), ())),
                                        preferred_element_type=jnp.float32)
                s = s + mask_b
                s = s - jnp.max(s, axis=-1, keepdims=True)
                p = jnp.exp(s)
                p = p * pl.reciprocal(jnp.sum(p, axis=-1, keepdims=True),
                                      approx=True)
                head_ctx.append(jnp.dot(p, vh,
                                        preferred_element_type=jnp.float32))
            batch_ctx.append(jnp.concatenate(head_ctx, axis=-1))        # [S, H]
        ctx = jnp.concatenate(batch_ctx, axis=0)                        # [B*S, H]

        attn_out = _bdot(ctx, wo_ref[l], bo_ref[l])
        h1 = _layernorm(attn_out + x, ln1g_ref[l], ln1b_ref[l])

        inter = _gelu(_bdot(h1, wi_ref[l], bi_ref[l]))
        ffn = _bdot(inter, wd_ref[l], bd_ref[l])
        x = _layernorm(ffn + h1, ln2g_ref[l], ln2b_ref[l])

    # --- pooler (tanh on CLS token of each sequence) + 4 classifiers ---
    cls = jnp.concatenate([x[b * seq:b * seq + 1, :] for b in range(batch)],
                          axis=0)                                       # [B, H]
    pooled = jnp.tanh(_bdot(cls, wp_ref[...], bp_ref[...]))
    # dropout(0.1): identity at inference.
    # torch.cat([Linear(H,1)(pooled) for _ in range(4)], -1) == pooled @ [H,4] + [4]
    o_ref[...] = _bdot(pooled, wc_ref[...], bc_ref[...])


def multi_task_bert_forward(params, input_ids, attention_mask):
    B, S = input_ids.shape
    M = B * S

    # Additive key mask precomputed once (matches HF BERT's extended attention mask).
    mask_add = (1.0 - attention_mask.astype(jnp.float32)) * (-10000.0)   # [B, S]

    # Embedding gathers are glue (plain JAX); everything else is one Pallas kernel.
    we = params["word_emb"][input_ids]                                   # [B, S, H]
    pe = params["pos_emb"][jnp.arange(S)][None, :, :]                    # [1, S, H]
    te = params["type_emb"][jnp.zeros((B, S), jnp.int32)]                # [B, S, H]
    emb_sum = (we + pe + te).reshape(M, HIDDEN)

    kernel = functools.partial(_mtb_kernel, batch=B, seq=S, n_layers=N_LAYERS,
                               n_heads=N_HEADS, head_dim=HEAD_DIM)

    operands = (
        emb_sum, mask_add,
        params["emb_ln_g"], params["emb_ln_b"],
        params["wqkv"], params["bqkv"], params["wo"], params["bo"],
        params["ln1_g"], params["ln1_b"],
        params["wi"], params["bi"], params["wd"], params["bd"],
        params["ln2_g"], params["ln2_b"],
        params["pooler_w"], params["pooler_b"],
        params["cls_w"], params["cls_b"],
    )

    return pl.pallas_call(
        kernel,
        out_shape=jax.ShapeDtypeStruct((B, N_TASKS), jnp.float32),
        grid=(1,),
        in_specs=[_full(op.shape) for op in operands],
        out_specs=_full((B, N_TASKS)),
        compiler_params=pltpu.CompilerParams(dimension_semantics=("arbitrary",)),
    )(*operands)


# ----------------------------- parameter init ------------------------------------
def init_params(key):
    std = 0.02
    # Fold the 1/sqrt(head_dim) attention scale into the Q columns of wqkv/bqkv.
    qscale = jnp.concatenate(
        [jnp.full((1, HIDDEN), 1.0 / math.sqrt(HEAD_DIM), jnp.float32),
         jnp.ones((1, 2 * HIDDEN), jnp.float32)], axis=-1)               # [1, 3H]

    def nrm(k, shape):
        return jax.random.normal(k, shape, jnp.float32) * std

    keys = iter(jax.random.split(key, 64))

    layer_names = ["wqkv", "bqkv", "wo", "bo", "ln1_g", "ln1_b",
                   "wi", "bi", "wd", "bd", "ln2_g", "ln2_b"]
    layers = {n: [] for n in layer_names}
    for _ in range(N_LAYERS):
        layers["wqkv"].append(nrm(next(keys), (HIDDEN, 3 * HIDDEN)) * qscale)
        layers["bqkv"].append(jnp.zeros((1, 3 * HIDDEN), jnp.float32) * qscale)
        layers["wo"].append(nrm(next(keys), (HIDDEN, HIDDEN)))
        layers["bo"].append(jnp.zeros((1, HIDDEN), jnp.float32))
        layers["ln1_g"].append(jnp.ones((1, HIDDEN), jnp.float32))
        layers["ln1_b"].append(jnp.zeros((1, HIDDEN), jnp.float32))
        layers["wi"].append(nrm(next(keys), (HIDDEN, INTERMEDIATE)))
        layers["bi"].append(jnp.zeros((1, INTERMEDIATE), jnp.float32))
        layers["wd"].append(nrm(next(keys), (INTERMEDIATE, HIDDEN)))
        layers["bd"].append(jnp.zeros((1, HIDDEN), jnp.float32))
        layers["ln2_g"].append(jnp.ones((1, HIDDEN), jnp.float32))
        layers["ln2_b"].append(jnp.zeros((1, HIDDEN), jnp.float32))

    def stack(name, bf16=False):
        a = jnp.stack(layers[name], axis=0)
        return a.astype(jnp.bfloat16) if bf16 else a

    p = {
        "word_emb": nrm(next(keys), (VOCAB, HIDDEN)),
        "pos_emb": nrm(next(keys), (MAX_POS, HIDDEN)),
        "type_emb": nrm(next(keys), (TYPE_VOCAB, HIDDEN)),
        "emb_ln_g": jnp.ones((1, HIDDEN), jnp.float32),
        "emb_ln_b": jnp.zeros((1, HIDDEN), jnp.float32),
        # stacked [N_LAYERS, ...] encoder weights; matmul weights in bf16
        "wqkv": stack("wqkv", bf16=True), "bqkv": stack("bqkv"),
        "wo": stack("wo", bf16=True), "bo": stack("bo"),
        "ln1_g": stack("ln1_g"), "ln1_b": stack("ln1_b"),
        "wi": stack("wi", bf16=True), "bi": stack("bi"),
        "wd": stack("wd", bf16=True), "bd": stack("bd"),
        "ln2_g": stack("ln2_g"), "ln2_b": stack("ln2_b"),
        "pooler_w": nrm(next(keys), (HIDDEN, HIDDEN)).astype(jnp.bfloat16),
        "pooler_b": jnp.zeros((1, HIDDEN), jnp.float32),
        # 4 x nn.Linear(768, 1) stacked as a single [H, 4] matrix (== torch.cat of logits)
        "cls_w": nrm(next(keys), (HIDDEN, N_TASKS)).astype(jnp.bfloat16),
        "cls_b": jnp.zeros((1, N_TASKS), jnp.float32),
    }
    return p


# ----------------------------- main ------------------------------------------------
if __name__ == "__main__":
    key = jax.random.PRNGKey(0)
    pkey, ikey = jax.random.split(key)

    params = init_params(pkey)

    B, S = 2, 8
    input_ids = jax.random.randint(ikey, (B, S), 0, VOCAB, dtype=jnp.int32)
    attention_mask = jnp.array(
        [[1, 1, 1, 1, 1, 1, 1, 1],
         [1, 1, 1, 1, 1, 0, 0, 0]], dtype=jnp.int32)

    logits = multi_task_bert_forward(params, input_ids, attention_mask)
    logits = jax.block_until_ready(logits)

    assert logits.shape == (B, N_TASKS), logits.shape
    assert logits.dtype == jnp.float32
    assert bool(jnp.all(jnp.isfinite(logits)))
    print("KERNEL_OK")
</pallas_src>

<mosaic_0001>
module attributes {stable_mosaic.version = 11 : i64} {
  func.func @_mtb_kernel(%arg0: i32, %arg1: memref<16x32xf32, #tpu.memory_space<vmem>>, %arg2: memref<2x8xf32, #tpu.memory_space<vmem>>, %arg3: memref<1x32xf32, #tpu.memory_space<vmem>>, %arg4: memref<1x32xf32, #tpu.memory_space<vmem>>, %arg5: memref<2x32x96xbf16, #tpu.memory_space<vmem>>, %arg6: memref<2x1x96xf32, #tpu.memory_space<vmem>>, %arg7: memref<2x32x32xbf16, #tpu.memory_space<vmem>>, %arg8: memref<2x1x32xf32, #tpu.memory_space<vmem>>, %arg9: memref<2x1x32xf32, #tpu.memory_space<vmem>>, %arg10: memref<2x1x32xf32, #tpu.memory_space<vmem>>, %arg11: memref<2x32x64xbf16, #tpu.memory_space<vmem>>, %arg12: memref<2x1x64xf32, #tpu.memory_space<vmem>>, %arg13: memref<2x64x32xbf16, #tpu.memory_space<vmem>>, %arg14: memref<2x1x32xf32, #tpu.memory_space<vmem>>, %arg15: memref<2x1x32xf32, #tpu.memory_space<vmem>>, %arg16: memref<2x1x32xf32, #tpu.memory_space<vmem>>, %arg17: memref<32x32xbf16, #tpu.memory_space<vmem>>, %arg18: memref<1x32xf32, #tpu.memory_space<vmem>>, %arg19: memref<32x4xbf16, #tpu.memory_space<vmem>>, %arg20: memref<1x4xf32, #tpu.memory_space<vmem>>, %arg21: memref<2x4xf32, #tpu.memory_space<vmem>>) attributes {dimension_semantics = [#tpu.dimension_semantics<arbitrary>], iteration_bounds = array<i64: 1>, scalar_prefetch = 0 : i64, scratch_operands = 0 : i64, tpu.core_type = #tpu.core_type<tc>, window_params = [{pipeline_mode = #tpu.pipeline_mode<synchronous>, transform_indices = @transform_0, window_bounds = array<i64: 16, 32>}, {pipeline_mode = #tpu.pipeline_mode<synchronous>, transform_indices = @transform_1, window_bounds = array<i64: 2, 8>}, {pipeline_mode = #tpu.pipeline_mode<synchronous>, transform_indices = @transform_2, window_bounds = array<i64: 1, 32>}, {pipeline_mode = #tpu.pipeline_mode<synchronous>, transform_indices = @transform_3, window_bounds = array<i64: 1, 32>}, {pipeline_mode = #tpu.pipeline_mode<synchronous>, transform_indices = @transform_4, window_bounds = array<i64: 2, 32, 96>}, {pipeline_mode = #tpu.pipeline_mode<synchronous>, transform_indices = @transform_5, window_bounds = array<i64: 2, 1, 96>}, {pipeline_mode = #tpu.pipeline_mode<synchronous>, transform_indices = @transform_6, window_bounds = array<i64: 2, 32, 32>}, {pipeline_mode = #tpu.pipeline_mode<synchronous>, transform_indices = @transform_7, window_bounds = array<i64: 2, 1, 32>}, {pipeline_mode = #tpu.pipeline_mode<synchronous>, transform_indices = @transform_8, window_bounds = array<i64: 2, 1, 32>}, {pipeline_mode = #tpu.pipeline_mode<synchronous>, transform_indices = @transform_9, window_bounds = array<i64: 2, 1, 32>}, {pipeline_mode = #tpu.pipeline_mode<synchronous>, transform_indices = @transform_10, window_bounds = array<i64: 2, 32, 64>}, {pipeline_mode = #tpu.pipeline_mode<synchronous>, transform_indices = @transform_11, window_bounds = array<i64: 2, 1, 64>}, {pipeline_mode = #tpu.pipeline_mode<synchronous>, transform_indices = @transform_12, window_bounds = array<i64: 2, 64, 32>}, {pipeline_mode = #tpu.pipeline_mode<synchronous>, transform_indices = @transform_13, window_bounds = array<i64: 2, 1, 32>}, {pipeline_mode = #tpu.pipeline_mode<synchronous>, transform_indices = @transform_14, window_bounds = array<i64: 2, 1, 32>}, {pipeline_mode = #tpu.pipeline_mode<synchronous>, transform_indices = @transform_15, window_bounds = array<i64: 2, 1, 32>}, {pipeline_mode = #tpu.pipeline_mode<synchronous>, transform_indices = @transform_16, window_bounds = array<i64: 32, 32>}, {pipeline_mode = #tpu.pipeline_mode<synchronous>, transform_indices = @transform_17, window_bounds = array<i64: 1, 32>}, {pipeline_mode = #tpu.pipeline_mode<synchronous>, transform_indices = @transform_18, window_bounds = array<i64: 32, 4>}, {pipeline_mode = #tpu.pipeline_mode<synchronous>, transform_indices = @transform_19, window_bounds = array<i64: 1, 4>}, {pipeline_mode = #tpu.pipeline_mode<synchronous>, transform_indices = @transform_20, window_bounds = array<i64: 2, 4>}]} {
    %c0 = arith.constant 0 : index
    %c0_0 = arith.constant 0 : index
    %0 = vector.load %arg1[%c0, %c0_0] : memref<16x32xf32, #tpu.memory_space<vmem>>, vector<16x32xf32>
    %c0_1 = arith.constant 0 : index
    %c0_2 = arith.constant 0 : index
    %1 = vector.load %arg3[%c0_1, %c0_2] : memref<1x32xf32, #tpu.memory_space<vmem>>, vector<1x32xf32>
    %c0_3 = arith.constant 0 : index
    %c0_4 = arith.constant 0 : index
    %2 = vector.load %arg4[%c0_3, %c0_4] : memref<1x32xf32, #tpu.memory_space<vmem>>, vector<1x32xf32>
    %cst = arith.constant dense<0.000000e+00> : vector<16xf32>
    %3 = vector.multi_reduction <add>, %0, %cst [1] : vector<16x32xf32> to vector<16xf32>
    %4 = vector.shape_cast %3 : vector<16xf32> to vector<16x1xf32>
    %cst_5 = arith.constant 3.200000e+01 : f32
    %5 = vector.broadcast %cst_5 : f32 to vector<16x1xf32>
    %6 = arith.divf %4, %5 : vector<16x1xf32>
    %7 = vector.broadcast %6 : vector<16x1xf32> to vector<16x32xf32>
    %8 = arith.subf %0, %7 : vector<16x32xf32>
    %9 = arith.mulf %8, %8 : vector<16x32xf32>
    %cst_6 = arith.constant dense<0.000000e+00> : vector<16xf32>
    %10 = vector.multi_reduction <add>, %9, %cst_6 [1] : vector<16x32xf32> to vector<16xf32>
    %11 = vector.shape_cast %10 : vector<16xf32> to vector<16x1xf32>
    %cst_7 = arith.constant 3.200000e+01 : f32
    %12 = vector.broadcast %cst_7 : f32 to vector<16x1xf32>
    %13 = arith.divf %11, %12 : vector<16x1xf32>
    %cst_8 = arith.constant 9.99999996E-13 : f32
    %14 = vector.broadcast %cst_8 : f32 to vector<16x1xf32>
    %15 = arith.addf %13, %14 : vector<16x1xf32>
    %16 = math.rsqrt %15 : vector<16x1xf32>
    %17 = vector.broadcast %16 : vector<16x1xf32> to vector<16x32xf32>
    %18 = arith.mulf %8, %17 : vector<16x32xf32>
    %19 = vector.broadcast %1 : vector<1x32xf32> to vector<16x32xf32>
    %20 = arith.mulf %18, %19 : vector<16x32xf32>
    %21 = vector.broadcast %2 : vector<1x32xf32> to vector<16x32xf32>
    %22 = arith.addf %20, %21 : vector<16x32xf32>
    %c0_9 = arith.constant 0 : index
    %c0_10 = arith.constant 0 : index
    %23 = vector.load %arg2[%c0_9, %c0_10] : memref<2x8xf32, #tpu.memory_space<vmem>>, vector<2x8xf32>
    %c0_11 = arith.constant 0 : index
    %c0_12 = arith.constant 0 : index
    %c0_13 = arith.constant 0 : index
    %24 = vector.load %arg5[%c0_11, %c0_12, %c0_13] : memref<2x32x96xbf16, #tpu.memory_space<vmem>>, vector<1x32x96xbf16>
    %25 = vector.shape_cast %24 : vector<1x32x96xbf16> to vector<32x96xbf16>
    %c0_14 = arith.constant 0 : index
    %c0_15 = arith.constant 0 : index
    %c0_16 = arith.constant 0 : index
    %26 = vector.load %arg6[%c0_14, %c0_15, %c0_16] : memref<2x1x96xf32, #tpu.memory_space<vmem>>, vector<1x1x96xf32>
    %27 = vector.shape_cast %26 : vector<1x1x96xf32> to vector<1x96xf32>
    %28 = arith.truncf %22 : vector<16x32xf32> to vector<16x32xbf16>
    %cst_17 = arith.constant dense<0.000000e+00> : vector<16x96xf32>
    %29 = tpu.matmul %28, %25, %cst_17 {dimension_numbers = #tpu.dot_dimension_numbers<[1], [0], [0], [1], [0, 0, 1, 1], [], []>} : vector<16x32xbf16>, vector<32x96xbf16>, vector<16x96xf32> -> vector<16x96xf32>
    %30 = vector.broadcast %27 : vector<1x96xf32> to vector<16x96xf32>
    %31 = arith.addf %29, %30 : vector<16x96xf32>
    %32 = vector.extract_strided_slice %31 {offsets = [0, 0], sizes = [8, 32], strides = [1, 1]} : vector<16x96xf32> to vector<8x32xf32>
    %33 = vector.extract_strided_slice %31 {offsets = [0, 32], sizes = [8, 32], strides = [1, 1]} : vector<16x96xf32> to vector<8x32xf32>
    %34 = vector.extract_strided_slice %31 {offsets = [0, 64], sizes = [8, 32], strides = [1, 1]} : vector<16x96xf32> to vector<8x32xf32>
    %35 = vector.extract_strided_slice %23 {offsets = [0, 0], sizes = [1, 8], strides = [1, 1]} : vector<2x8xf32> to vector<1x8xf32>
    %36 = vector.extract_strided_slice %32 {offsets = [0, 0], sizes = [8, 8], strides = [1, 1]} : vector<8x32xf32> to vector<8x8xf32>
    %37 = vector.extract_strided_slice %33 {offsets = [0, 0], sizes = [8, 8], strides = [1, 1]} : vector<8x32xf32> to vector<8x8xf32>
    %38 = vector.extract_strided_slice %34 {offsets = [0, 0], sizes = [8, 8], strides = [1, 1]} : vector<8x32xf32> to vector<8x8xf32>
    %cst_18 = arith.constant dense<0.000000e+00> : vector<8x8xf32>
    %39 = tpu.matmul %36, %37, %cst_18 {dimension_numbers = #tpu.dot_dimension_numbers<[1], [1], [0], [0], [0, 0, 1, 0], [], []>} : vector<8x8xf32>, vector<8x8xf32>, vector<8x8xf32> -> vector<8x8xf32>
    %40 = vector.broadcast %35 : vector<1x8xf32> to vector<8x8xf32>
    %41 = arith.addf %39, %40 : vector<8x8xf32>
    %cst_19 = arith.constant dense<0xFF800000> : vector<8xf32>
    %42 = vector.multi_reduction <maximumf>, %41, %cst_19 [1] : vector<8x8xf32> to vector<8xf32>
    %43 = vector.shape_cast %42 : vector<8xf32> to vector<8x1xf32>
    %44 = vector.broadcast %43 : vector<8x1xf32> to vector<8x8xf32>
    %45 = arith.subf %41, %44 : vector<8x8xf32>
    %46 = math.exp %45 : vector<8x8xf32>
    %cst_20 = arith.constant dense<0.000000e+00> : vector<8xf32>
    %47 = vector.multi_reduction <add>, %46, %cst_20 [1] : vector<8x8xf32> to vector<8xf32>
    %48 = vector.shape_cast %47 : vector<8xf32> to vector<8x1xf32>
    %49 = tpu.reciprocal %48 {approx = true} : vector<8x1xf32> -> vector<8x1xf32>
    %50 = vector.broadcast %49 : vector<8x1xf32> to vector<8x8xf32>
    %51 = arith.mulf %46, %50 : vector<8x8xf32>
    %cst_21 = arith.constant dense<0.000000e+00> : vector<8x8xf32>
    %52 = tpu.matmul %51, %38, %cst_21 {dimension_numbers = #tpu.dot_dimension_numbers<[1], [0], [0], [1], [0, 0, 1, 1], [], []>} : vector<8x8xf32>, vector<8x8xf32>, vector<8x8xf32> -> vector<8x8xf32>
    %53 = vector.extract_strided_slice %32 {offsets = [0, 8], sizes = [8, 8], strides = [1, 1]} : vector<8x32xf32> to vector<8x8xf32>
    %54 = vector.extract_strided_slice %33 {offsets = [0, 8], sizes = [8, 8], strides = [1, 1]} : vector<8x32xf32> to vector<8x8xf32>
    %55 = vector.extract_strided_slice %34 {offsets = [0, 8], sizes = [8, 8], strides = [1, 1]} : vector<8x32xf32> to vector<8x8xf32>
    %cst_22 = arith.constant dense<0.000000e+00> : vector<8x8xf32>
    %56 = tpu.matmul %53, %54, %cst_22 {dimension_numbers = #tpu.dot_dimension_numbers<[1], [1], [0], [0], [0, 0, 1, 0], [], []>} : vector<8x8xf32>, vector<8x8xf32>, vector<8x8xf32> -> vector<8x8xf32>
    %57 = vector.broadcast %35 : vector<1x8xf32> to vector<8x8xf32>
    %58 = arith.addf %56, %57 : vector<8x8xf32>
    %cst_23 = arith.constant dense<0xFF800000> : vector<8xf32>
    %59 = vector.multi_reduction <maximumf>, %58, %cst_23 [1] : vector<8x8xf32> to vector<8xf32>
    %60 = vector.shape_cast %59 : vector<8xf32> to vector<8x1xf32>
    %61 = vector.broadcast %60 : vector<8x1xf32> to vector<8x8xf32>
    %62 = arith.subf %58, %61 : vector<8x8xf32>
    %63 = math.exp %62 : vector<8x8xf32>
    %cst_24 = arith.constant dense<0.000000e+00> : vector<8xf32>
    %64 = vector.multi_reduction <add>, %63, %cst_24 [1] : vector<8x8xf32> to vector<8xf32>
    %65 = vector.shape_cast %64 : vector<8xf32> to vector<8x1xf32>
    %66 = tpu.reciprocal %65 {approx = true} : vector<8x1xf32> -> vector<8x1xf32>
    %67 = vector.broadcast %66 : vector<8x1xf32> to vector<8x8xf32>
    %68 = arith.mulf %63, %67 : vector<8x8xf32>
    %cst_25 = arith.constant dense<0.000000e+00> : vector<8x8xf32>
    %69 = tpu.matmul %68, %55, %cst_25 {dimension_numbers = #tpu.dot_dimension_numbers<[1], [0], [0], [1], [0, 0, 1, 1], [], []>} : vector<8x8xf32>, vector<8x8xf32>, vector<8x8xf32> -> vector<8x8xf32>
    %70 = vector.extract_strided_slice %32 {offsets = [0, 16], sizes = [8, 8], strides = [1, 1]} : vector<8x32xf32> to vector<8x8xf32>
    %71 = vector.extract_strided_slice %33 {offsets = [0, 16], sizes = [8, 8], strides = [1, 1]} : vector<8x32xf32> to vector<8x8xf32>
    %72 = vector.extract_strided_slice %34 {offsets = [0, 16], sizes = [8, 8], strides = [1, 1]} : vector<8x32xf32> to vector<8x8xf32>
    %cst_26 = arith.constant dense<0.000000e+00> : vector<8x8xf32>
    %73 = tpu.matmul %70, %71, %cst_26 {dimension_numbers = #tpu.dot_dimension_numbers<[1], [1], [0], [0], [0, 0, 1, 0], [], []>} : vector<8x8xf32>, vector<8x8xf32>, vector<8x8xf32> -> vector<8x8xf32>
    %74 = vector.broadcast %35 : vector<1x8xf32> to vector<8x8xf32>
    %75 = arith.addf %73, %74 : vector<8x8xf32>
    %cst_27 = arith.constant dense<0xFF800000> : vector<8xf32>
    %76 = vector.multi_reduction <maximumf>, %75, %cst_27 [1] : vector<8x8xf32> to vector<8xf32>
    %77 = vector.shape_cast %76 : vector<8xf32> to vector<8x1xf32>
    %78 = vector.broadcast %77 : vector<8x1xf32> to vector<8x8xf32>
    %79 = arith.subf %75, %78 : vector<8x8xf32>
    %80 = math.exp %79 : vector<8x8xf32>
    %cst_28 = arith.constant dense<0.000000e+00> : vector<8xf32>
    %81 = vector.multi_reduction <add>, %80, %cst_28 [1] : vector<8x8xf32> to vector<8xf32>
    %82 = vector.shape_cast %81 : vector<8xf32> to vector<8x1xf32>
    %83 = tpu.reciprocal %82 {approx = true} : vector<8x1xf32> -> vector<8x1xf32>
    %84 = vector.broadcast %83 : vector<8x1xf32> to vector<8x8xf32>
    %85 = arith.mulf %80, %84 : vector<8x8xf32>
    %cst_29 = arith.constant dense<0.000000e+00> : vector<8x8xf32>
    %86 = tpu.matmul %85, %72, %cst_29 {dimension_numbers = #tpu.dot_dimension_numbers<[1], [0], [0], [1], [0, 0, 1, 1], [], []>} : vector<8x8xf32>, vector<8x8xf32>, vector<8x8xf32> -> vector<8x8xf32>
    %87 = vector.extract_strided_slice %32 {offsets = [0, 24], sizes = [8, 8], strides = [1, 1]} : vector<8x32xf32> to vector<8x8xf32>
    %88 = vector.extract_strided_slice %33 {offsets = [0, 24], sizes = [8, 8], strides = [1, 1]} : vector<8x32xf32> to vector<8x8xf32>
    %89 = vector.extract_strided_slice %34 {offsets = [0, 24], sizes = [8, 8], strides = [1, 1]} : vector<8x32xf32> to vector<8x8xf32>
    %cst_30 = arith.constant dense<0.000000e+00> : vector<8x8xf32>
    %90 = tpu.matmul %87, %88, %cst_30 {dimension_numbers = #tpu.dot_dimension_numbers<[1], [1], [0], [0], [0, 0, 1, 0], [], []>} : vector<8x8xf32>, vector<8x8xf32>, vector<8x8xf32> -> vector<8x8xf32>
    %91 = vector.broadcast %35 : vector<1x8xf32> to vector<8x8xf32>
    %92 = arith.addf %90, %91 : vector<8x8xf32>
    %cst_31 = arith.constant dense<0xFF800000> : vector<8xf32>
    %93 = vector.multi_reduction <maximumf>, %92, %cst_31 [1] : vector<8x8xf32> to vector<8xf32>
    %94 = vector.shape_cast %93 : vector<8xf32> to vector<8x1xf32>
    %95 = vector.broadcast %94 : vector<8x1xf32> to vector<8x8xf32>
    %96 = arith.subf %92, %95 : vector<8x8xf32>
    %97 = math.exp %96 : vector<8x8xf32>
    %cst_32 = arith.constant dense<0.000000e+00> : vector<8xf32>
    %98 = vector.multi_reduction <add>, %97, %cst_32 [1] : vector<8x8xf32> to vector<8xf32>
    %99 = vector.shape_cast %98 : vector<8xf32> to vector<8x1xf32>
    %100 = tpu.reciprocal %99 {approx = true} : vector<8x1xf32> -> vector<8x1xf32>
    %101 = vector.broadcast %100 : vector<8x1xf32> to vector<8x8xf32>
    %102 = arith.mulf %97, %101 : vector<8x8xf32>
    %cst_33 = arith.constant dense<0.000000e+00> : vector<8x8xf32>
    %103 = tpu.matmul %102, %89, %cst_33 {dimension_numbers = #tpu.dot_dimension_numbers<[1], [0], [0], [1], [0, 0, 1, 1], [], []>} : vector<8x8xf32>, vector<8x8xf32>, vector<8x8xf32> -> vector<8x8xf32>
    %104 = tpu.concatenate %52, %69, %86, %103 in 1 : vector<8x8xf32>, vector<8x8xf32>, vector<8x8xf32>, vector<8x8xf32> -> vector<8x32xf32>
    %105 = vector.extract_strided_slice %31 {offsets = [8, 0], sizes = [8, 32], strides = [1, 1]} : vector<16x96xf32> to vector<8x32xf32>
    %106 = vector.extract_strided_slice %31 {offsets = [8, 32], sizes = [8, 32], strides = [1, 1]} : vector<16x96xf32> to vector<8x32xf32>
    %107 = vector.extract_strided_slice %31 {offsets = [8, 64], sizes = [8, 32], strides = [1, 1]} : vector<16x96xf32> to vector<8x32xf32>
    %108 = vector.extract_strided_slice %23 {offsets = [1, 0], sizes = [1, 8], strides = [1, 1]} : vector<2x8xf32> to vector<1x8xf32>
    %109 = vector.extract_strided_slice %105 {offsets = [0, 0], sizes = [8, 8], strides = [1, 1]} : vector<8x32xf32> to vector<8x8xf32>
    %110 = vector.extract_strided_slice %106 {offsets = [0, 0], sizes = [8, 8], strides = [1, 1]} : vector<8x32xf32> to vector<8x8xf32>
    %111 = vector.extract_strided_slice %107 {offsets = [0, 0], sizes = [8, 8], strides = [1, 1]} : vector<8x32xf32> to vector<8x8xf32>
    %cst_34 = arith.constant dense<0.000000e+00> : vector<8x8xf32>
    %112 = tpu.matmul %109, %110, %cst_34 {dimension_numbers = #tpu.dot_dimension_numbers<[1], [1], [0], [0], [0, 0, 1, 0], [], []>} : vector<8x8xf32>, vector<8x8xf32>, vector<8x8xf32> -> vector<8x8xf32>
    %113 = vector.broadcast %108 : vector<1x8xf32> to vector<8x8xf32>
    %114 = arith.addf %112, %113 : vector<8x8xf32>
    %cst_35 = arith.constant dense<0xFF800000> : vector<8xf32>
    %115 = vector.multi_reduction <maximumf>, %114, %cst_35 [1] : vector<8x8xf32> to vector<8xf32>
    %116 = vector.shape_cast %115 : vector<8xf32> to vector<8x1xf32>
    %117 = vector.broadcast %116 : vector<8x1xf32> to vector<8x8xf32>
    %118 = arith.subf %114, %117 : vector<8x8xf32>
    %119 = math.exp %118 : vector<8x8xf32>
    %cst_36 = arith.constant dense<0.000000e+00> : vector<8xf32>
    %120 = vector.multi_reduction <add>, %119, %cst_36 [1] : vector<8x8xf32> to vector<8xf32>
    %121 = vector.shape_cast %120 : vector<8xf32> to vector<8x1xf32>
    %122 = tpu.reciprocal %121 {approx = true} : vector<8x1xf32> -> vector<8x1xf32>
    %123 = vector.broadcast %122 : vector<8x1xf32> to vector<8x8xf32>
    %124 = arith.mulf %119, %123 : vector<8x8xf32>
    %cst_37 = arith.constant dense<0.000000e+00> : vector<8x8xf32>
    %125 = tpu.matmul %124, %111, %cst_37 {dimension_numbers = #tpu.dot_dimension_numbers<[1], [0], [0], [1], [0, 0, 1, 1], [], []>} : vector<8x8xf32>, vector<8x8xf32>, vector<8x8xf32> -> vector<8x8xf32>
    %126 = vector.extract_strided_slice %105 {offsets = [0, 8], sizes = [8, 8], strides = [1, 1]} : vector<8x32xf32> to vector<8x8xf32>
    %127 = vector.extract_strided_slice %106 {offsets = [0, 8], sizes = [8, 8], strides = [1, 1]} : vector<8x32xf32> to vector<8x8xf32>
    %128 = vector.extract_strided_slice %107 {offsets = [0, 8], sizes = [8, 8], strides = [1, 1]} : vector<8x32xf32> to vector<8x8xf32>
    %cst_38 = arith.constant dense<0.000000e+00> : vector<8x8xf32>
    %129 = tpu.matmul %126, %127, %cst_38 {dimension_numbers = #tpu.dot_dimension_numbers<[1], [1], [0], [0], [0, 0, 1, 0], [], []>} : vector<8x8xf32>, vector<8x8xf32>, vector<8x8xf32> -> vector<8x8xf32>
    %130 = vector.broadcast %108 : vector<1x8xf32> to vector<8x8xf32>
    %131 = arith.addf %129, %130 : vector<8x8xf32>
    %cst_39 = arith.constant dense<0xFF800000> : vector<8xf32>
    %132 = vector.multi_reduction <maximumf>, %131, %cst_39 [1] : vector<8x8xf32> to vector<8xf32>
    %133 = vector.shape_cast %132 : vector<8xf32> to vector<8x1xf32>
    %134 = vector.broadcast %133 : vector<8x1xf32> to vector<8x8xf32>
    %135 = arith.subf %131, %134 : vector<8x8xf32>
    %136 = math.exp %135 : vector<8x8xf32>
    %cst_40 = arith.constant dense<0.000000e+00> : vector<8xf32>
    %137 = vector.multi_reduction <add>, %136, %cst_40 [1] : vector<8x8xf32> to vector<8xf32>
    %138 = vector.shape_cast %137 : vector<8xf32> to vector<8x1xf32>
    %139 = tpu.reciprocal %138 {approx = true} : vector<8x1xf32> -> vector<8x1xf32>
    %140 = vector.broadcast %139 : vector<8x1xf32> to vector<8x8xf32>
    %141 = arith.mulf %136, %140 : vector<8x8xf32>
    %cst_41 = arith.constant dense<0.000000e+00> : vector<8x8xf32>
    %142 = tpu.matmul %141, %128, %cst_41 {dimension_numbers = #tpu.dot_dimension_numbers<[1], [0], [0], [1], [0, 0, 1, 1], [], []>} : vector<8x8xf32>, vector<8x8xf32>, vector<8x8xf32> -> vector<8x8xf32>
    %143 = vector.extract_strided_slice %105 {offsets = [0, 16], sizes = [8, 8], strides = [1, 1]} : vector<8x32xf32> to vector<8x8xf32>
    %144 = vector.extract_strided_slice %106 {offsets = [0, 16], sizes = [8, 8], strides = [1, 1]} : vector<8x32xf32> to vector<8x8xf32>
    %145 = vector.extract_strided_slice %107 {offsets = [0, 16], sizes = [8, 8], strides = [1, 1]} : vector<8x32xf32> to vector<8x8xf32>
    %cst_42 = arith.constant dense<0.000000e+00> : vector<8x8xf32>
    %146 = tpu.matmul %143, %144, %cst_42 {dimension_numbers = #tpu.dot_dimension_numbers<[1], [1], [0], [0], [0, 0, 1, 0], [], []>} : vector<8x8xf32>, vector<8x8xf32>, vector<8x8xf32> -> vector<8x8xf32>
    %147 = vector.broadcast %108 : vector<1x8xf32> to vector<8x8xf32>
    %148 = arith.addf %146, %147 : vector<8x8xf32>
    %cst_43 = arith.constant dense<0xFF800000> : vector<8xf32>
    %149 = vector.multi_reduction <maximumf>, %148, %cst_43 [1] : vector<8x8xf32> to vector<8xf32>
    %150 = vector.shape_cast %149 : vector<8xf32> to vector<8x1xf32>
    %151 = vector.broadcast %150 : vector<8x1xf32> to vector<8x8xf32>
    %152 = arith.subf %148, %151 : vector<8x8xf32>
    %153 = math.exp %152 : vector<8x8xf32>
    %cst_44 = arith.constant dense<0.000000e+00> : vector<8xf32>
    %154 = vector.multi_reduction <add>, %153, %cst_44 [1] : vector<8x8xf32> to vector<8xf32>
    %155 = vector.shape_cast %154 : vector<8xf32> to vector<8x1xf32>
    %156 = tpu.reciprocal %155 {approx = true} : vector<8x1xf32> -> vector<8x1xf32>
    %157 = vector.broadcast %156 : vector<8x1xf32> to vector<8x8xf32>
    %158 = arith.mulf %153, %157 : vector<8x8xf32>
    %cst_45 = arith.constant dense<0.000000e+00> : vector<8x8xf32>
    %159 = tpu.matmul %158, %145, %cst_45 {dimension_numbers = #tpu.dot_dimension_numbers<[1], [0], [0], [1], [0, 0, 1, 1], [], []>} : vector<8x8xf32>, vector<8x8xf32>, vector<8x8xf32> -> vector<8x8xf32>
    %160 = vector.extract_strided_slice %105 {offsets = [0, 24], sizes = [8, 8], strides = [1, 1]} : vector<8x32xf32> to vector<8x8xf32>
    %161 = vector.extract_strided_slice %106 {offsets = [0, 24], sizes = [8, 8], strides = [1, 1]} : vector<8x32xf32> to vector<8x8xf32>
    %162 = vector.extract_strided_slice %107 {offsets = [0, 24], sizes = [8, 8], strides = [1, 1]} : vector<8x32xf32> to vector<8x8xf32>
    %cst_46 = arith.constant dense<0.000000e+00> : vector<8x8xf32>
    %163 = tpu.matmul %160, %161, %cst_46 {dimension_numbers = #tpu.dot_dimension_numbers<[1], [1], [0], [0], [0, 0, 1, 0], [], []>} : vector<8x8xf32>, vector<8x8xf32>, vector<8x8xf32> -> vector<8x8xf32>
    %164 = vector.broadcast %108 : vector<1x8xf32> to vector<8x8xf32>
    %165 = arith.addf %163, %164 : vector<8x8xf32>
    %cst_47 = arith.constant dense<0xFF800000> : vector<8xf32>
    %166 = vector.multi_reduction <maximumf>, %165, %cst_47 [1] : vector<8x8xf32> to vector<8xf32>
    %167 = vector.shape_cast %166 : vector<8xf32> to vector<8x1xf32>
    %168 = vector.broadcast %167 : vector<8x1xf32> to vector<8x8xf32>
    %169 = arith.subf %165, %168 : vector<8x8xf32>
    %170 = math.exp %169 : vector<8x8xf32>
    %cst_48 = arith.constant dense<0.000000e+00> : vector<8xf32>
    %171 = vector.multi_reduction <add>, %170, %cst_48 [1] : vector<8x8xf32> to vector<8xf32>
    %172 = vector.shape_cast %171 : vector<8xf32> to vector<8x1xf32>
    %173 = tpu.reciprocal %172 {approx = true} : vector<8x1xf32> -> vector<8x1xf32>
    %174 = vector.broadcast %173 : vector<8x1xf32> to vector<8x8xf32>
    %175 = arith.mulf %170, %174 : vector<8x8xf32>
    %cst_49 = arith.constant dense<0.000000e+00> : vector<8x8xf32>
    %176 = tpu.matmul %175, %162, %cst_49 {dimension_numbers = #tpu.dot_dimension_numbers<[1], [0], [0], [1], [0, 0, 1, 1], [], []>} : vector<8x8xf32>, vector<8x8xf32>, vector<8x8xf32> -> vector<8x8xf32>
    %177 = tpu.concatenate %125, %142, %159, %176 in 1 : vector<8x8xf32>, vector<8x8xf32>, vector<8x8xf32>, vector<8x8xf32> -> vector<8x32xf32>
    %178 = tpu.concatenate %104, %177 in 0 : vector<8x32xf32>, vector<8x32xf32> -> vector<16x32xf32>
    %c0_50 = arith.constant 0 : index
    %c0_51 = arith.constant 0 : index
    %c0_52 = arith.constant 0 : index
    %179 = vector.load %arg7[%c0_50, %c0_51, %c0_52] : memref<2x32x32xbf16, #tpu.memory_space<vmem>>, vector<1x32x32xbf16>
    %180 = vector.shape_cast %179 : vector<1x32x32xbf16> to vector<32x32xbf16>
    %c0_53 = arith.constant 0 : index
    %c0_54 = arith.constant 0 : index
    %c0_55 = arith.constant 0 : index
    %181 = vector.load %arg8[%c0_53, %c0_54, %c0_55] : memref<2x1x32xf32, #tpu.memory_space<vmem>>, vector<1x1x32xf32>
    %182 = vector.shape_cast %181 : vector<1x1x32xf32> to vector<1x32xf32>
    %183 = arith.truncf %178 : vector<16x32xf32> to vector<16x32xbf16>
    %cst_56 = arith.constant dense<0.000000e+00> : vector<16x32xf32>
    %184 = tpu.matmul %183, %180, %cst_56 {dimension_numbers = #tpu.dot_dimension_numbers<[1], [0], [0], [1], [0, 0, 1, 1], [], []>} : vector<16x32xbf16>, vector<32x32xbf16>, vector<16x32xf32> -> vector<16x32xf32>
    %185 = vector.broadcast %182 : vector<1x32xf32> to vector<16x32xf32>
    %186 = arith.addf %184, %185 : vector<16x32xf32>
    %187 = arith.addf %186, %22 : vector<16x32xf32>
    %c0_57 = arith.constant 0 : index
    %c0_58 = arith.constant 0 : index
    %c0_59 = arith.constant 0 : index
    %188 = vector.load %arg9[%c0_57, %c0_58, %c0_59] : memref<2x1x32xf32, #tpu.memory_space<vmem>>, vector<1x1x32xf32>
    %189 = vector.shape_cast %188 : vector<1x1x32xf32> to vector<1x32xf32>
    %c0_60 = arith.constant 0 : index
    %c0_61 = arith.constant 0 : index
    %c0_62 = arith.constant 0 : index
    %190 = vector.load %arg10[%c0_60, %c0_61, %c0_62] : memref<2x1x32xf32, #tpu.memory_space<vmem>>, vector<1x1x32xf32>
    %191 = vector.shape_cast %190 : vector<1x1x32xf32> to vector<1x32xf32>
    %cst_63 = arith.constant dense<0.000000e+00> : vector<16xf32>
    %192 = vector.multi_reduction <add>, %187, %cst_63 [1] : vector<16x32xf32> to vector<16xf32>
    %193 = vector.shape_cast %192 : vector<16xf32> to vector<16x1xf32>
    %cst_64 = arith.constant 3.200000e+01 : f32
    %194 = vector.broadcast %cst_64 : f32 to vector<16x1xf32>
    %195 = arith.divf %193, %194 : vector<16x1xf32>
    %196 = vector.broadcast %195 : vector<16x1xf32> to vector<16x32xf32>
    %197 = arith.subf %187, %196 : vector<16x32xf32>
    %198 = arith.mulf %197, %197 : vector<16x32xf32>
    %cst_65 = arith.constant dense<0.000000e+00> : vector<16xf32>
    %199 = vector.multi_reduction <add>, %198, %cst_65 [1] : vector<16x32xf32> to vector<16xf32>
    %200 = vector.shape_cast %199 : vector<16xf32> to vector<16x1xf32>
    %cst_66 = arith.constant 3.200000e+01 : f32
    %201 = vector.broadcast %cst_66 : f32 to vector<16x1xf32>
    %202 = arith.divf %200, %201 : vector<16x1xf32>
    %cst_67 = arith.constant 9.99999996E-13 : f32
    %203 = vector.broadcast %cst_67 : f32 to vector<16x1xf32>
    %204 = arith.addf %202, %203 : vector<16x1xf32>
    %205 = math.rsqrt %204 : vector<16x1xf32>
    %206 = vector.broadcast %205 : vector<16x1xf32> to vector<16x32xf32>
    %207 = arith.mulf %197, %206 : vector<16x32xf32>
    %208 = vector.broadcast %189 : vector<1x32xf32> to vector<16x32xf32>
    %209 = arith.mulf %207, %208 : vector<16x32xf32>
    %210 = vector.broadcast %191 : vector<1x32xf32> to vector<16x32xf32>
    %211 = arith.addf %209, %210 : vector<16x32xf32>
    %c0_68 = arith.constant 0 : index
    %c0_69 = arith.constant 0 : index
    %c0_70 = arith.constant 0 : index
    %212 = vector.load %arg11[%c0_68, %c0_69, %c0_70] : memref<2x32x64xbf16, #tpu.memory_space<vmem>>, vector<1x32x64xbf16>
    %213 = vector.shape_cast %212 : vector<1x32x64xbf16> to vector<32x64xbf16>
    %c0_71 = arith.constant 0 : index
    %c0_72 = arith.constant 0 : index
    %c0_73 = arith.constant 0 : index
    %214 = vector.load %arg12[%c0_71, %c0_72, %c0_73] : memref<2x1x64xf32, #tpu.memory_space<vmem>>, vector<1x1x64xf32>
    %215 = vector.shape_cast %214 : vector<1x1x64xf32> to vector<1x64xf32>
    %216 = arith.truncf %211 : vector<16x32xf32> to vector<16x32xbf16>
    %cst_74 = arith.constant dense<0.000000e+00> : vector<16x64xf32>
    %217 = tpu.matmul %216, %213, %cst_74 {dimension_numbers = #tpu.dot_dimension_numbers<[1], [0], [0], [1], [0, 0, 1, 1], [], []>} : vector<16x32xbf16>, vector<32x64xbf16>, vector<16x64xf32> -> vector<16x64xf32>
    %218 = vector.broadcast %215 : vector<1x64xf32> to vector<16x64xf32>
    %219 = arith.addf %217, %218 : vector<16x64xf32>
    %cst_75 = arith.constant 5.000000e-01 : f32
    %220 = vector.broadcast %cst_75 : f32 to vector<16x64xf32>
    %221 = arith.mulf %220, %219 : vector<16x64xf32>
    %cst_76 = arith.constant 4.471500e-02 : f32
    %222 = vector.broadcast %cst_76 : f32 to vector<16x64xf32>
    %223 = arith.mulf %222, %219 : vector<16x64xf32>
    %224 = arith.mulf %223, %219 : vector<16x64xf32>
    %225 = arith.mulf %224, %219 : vector<16x64xf32>
    %226 = arith.addf %219, %225 : vector<16x64xf32>
    %cst_77 = arith.constant 0.797884583 : f32
    %227 = vector.broadcast %cst_77 : f32 to vector<16x64xf32>
    %228 = arith.mulf %227, %226 : vector<16x64xf32>
    %229 = math.tanh %228 : vector<16x64xf32>
    %cst_78 = arith.constant 1.000000e+00 : f32
    %230 = vector.broadcast %cst_78 : f32 to vector<16x64xf32>
    %231 = arith.addf %230, %229 : vector<16x64xf32>
    %232 = arith.mulf %221, %231 : vector<16x64xf32>
    %c0_79 = arith.constant 0 : index
    %c0_80 = arith.constant 0 : index
    %c0_81 = arith.constant 0 : index
    %233 = vector.load %arg13[%c0_79, %c0_80, %c0_81] : memref<2x64x32xbf16, #tpu.memory_space<vmem>>, vector<1x64x32xbf16>
    %234 = vector.shape_cast %233 : vector<1x64x32xbf16> to vector<64x32xbf16>
    %c0_82 = arith.constant 0 : index
    %c0_83 = arith.constant 0 : index
    %c0_84 = arith.constant 0 : index
    %235 = vector.load %arg14[%c0_82, %c0_83, %c0_84] : memref<2x1x32xf32, #tpu.memory_space<vmem>>, vector<1x1x32xf32>
    %236 = vector.shape_cast %235 : vector<1x1x32xf32> to vector<1x32xf32>
    %237 = arith.truncf %232 : vector<16x64xf32> to vector<16x64xbf16>
    %cst_85 = arith.constant dense<0.000000e+00> : vector<16x32xf32>
    %238 = tpu.matmul %237, %234, %cst_85 {dimension_numbers = #tpu.dot_dimension_numbers<[1], [0], [0], [1], [0, 0, 1, 1], [], []>} : vector<16x64xbf16>, vector<64x32xbf16>, vector<16x32xf32> -> vector<16x32xf32>
    %239 = vector.broadcast %236 : vector<1x32xf32> to vector<16x32xf32>
    %240 = arith.addf %238, %239 : vector<16x32xf32>
    %241 = arith.addf %240, %211 : vector<16x32xf32>
    %c0_86 = arith.constant 0 : index
    %c0_87 = arith.constant 0 : index
    %c0_88 = arith.constant 0 : index
    %242 = vector.load %arg15[%c0_86, %c0_87, %c0_88] : memref<2x1x32xf32, #tpu.memory_space<vmem>>, vector<1x1x32xf32>
    %243 = vector.shape_cast %242 : vector<1x1x32xf32> to vector<1x32xf32>
    %c0_89 = arith.constant 0 : index
    %c0_90 = arith.constant 0 : index
    %c0_91 = arith.constant 0 : index
    %244 = vector.load %arg16[%c0_89, %c0_90, %c0_91] : memref<2x1x32xf32, #tpu.memory_space<vmem>>, vector<1x1x32xf32>
    %245 = vector.shape_cast %244 : vector<1x1x32xf32> to vector<1x32xf32>
    %cst_92 = arith.constant dense<0.000000e+00> : vector<16xf32>
    %246 = vector.multi_reduction <add>, %241, %cst_92 [1] : vector<16x32xf32> to vector<16xf32>
    %247 = vector.shape_cast %246 : vector<16xf32> to vector<16x1xf32>
    %cst_93 = arith.constant 3.200000e+01 : f32
    %248 = vector.broadcast %cst_93 : f32 to vector<16x1xf32>
    %249 = arith.divf %247, %248 : vector<16x1xf32>
    %250 = vector.broadcast %249 : vector<16x1xf32> to vector<16x32xf32>
    %251 = arith.subf %241, %250 : vector<16x32xf32>
    %252 = arith.mulf %251, %251 : vector<16x32xf32>
    %cst_94 = arith.constant dense<0.000000e+00> : vector<16xf32>
    %253 = vector.multi_reduction <add>, %252, %cst_94 [1] : vector<16x32xf32> to vector<16xf32>
    %254 = vector.shape_cast %253 : vector<16xf32> to vector<16x1xf32>
    %cst_95 = arith.constant 3.200000e+01 : f32
    %255 = vector.broadcast %cst_95 : f32 to vector<16x1xf32>
    %256 = arith.divf %254, %255 : vector<16x1xf32>
    %cst_96 = arith.constant 9.99999996E-13 : f32
    %257 = vector.broadcast %cst_96 : f32 to vector<16x1xf32>
    %258 = arith.addf %256, %257 : vector<16x1xf32>
    %259 = math.rsqrt %258 : vector<16x1xf32>
    %260 = vector.broadcast %259 : vector<16x1xf32> to vector<16x32xf32>
    %261 = arith.mulf %251, %260 : vector<16x32xf32>
    %262 = vector.broadcast %243 : vector<1x32xf32> to vector<16x32xf32>
    %263 = arith.mulf %261, %262 : vector<16x32xf32>
    %264 = vector.broadcast %245 : vector<1x32xf32> to vector<16x32xf32>
    %265 = arith.addf %263, %264 : vector<16x32xf32>
    %c1 = arith.constant 1 : index
    %c0_97 = arith.constant 0 : index
    %c0_98 = arith.constant 0 : index
    %266 = vector.load %arg5[%c1, %c0_97, %c0_98] : memref<2x32x96xbf16, #tpu.memory_space<vmem>>, vector<1x32x96xbf16>
    %267 = vector.shape_cast %266 : vector<1x32x96xbf16> to vector<32x96xbf16>
    %c1_99 = arith.constant 1 : index
    %c0_100 = arith.constant 0 : index
    %c0_101 = arith.constant 0 : index
    %268 = vector.load %arg6[%c1_99, %c0_100, %c0_101] : memref<2x1x96xf32, #tpu.memory_space<vmem>>, vector<1x1x96xf32>
    %269 = vector.shape_cast %268 : vector<1x1x96xf32> to vector<1x96xf32>
    %270 = arith.truncf %265 : vector<16x32xf32> to vector<16x32xbf16>
    %cst_102 = arith.constant dense<0.000000e+00> : vector<16x96xf32>
    %271 = tpu.matmul %270, %267, %cst_102 {dimension_numbers = #tpu.dot_dimension_numbers<[1], [0], [0], [1], [0, 0, 1, 1], [], []>} : vector<16x32xbf16>, vector<32x96xbf16>, vector<16x96xf32> -> vector<16x96xf32>
    %272 = vector.broadcast %269 : vector<1x96xf32> to vector<16x96xf32>
    %273 = arith.addf %271, %272 : vector<16x96xf32>
    %274 = vector.extract_strided_slice %273 {offsets = [0, 0], sizes = [8, 32], strides = [1, 1]} : vector<16x96xf32> to vector<8x32xf32>
    %275 = vector.extract_strided_slice %273 {offsets = [0, 32], sizes = [8, 32], strides = [1, 1]} : vector<16x96xf32> to vector<8x32xf32>
    %276 = vector.extract_strided_slice %273 {offsets = [0, 64], sizes = [8, 32], strides = [1, 1]} : vector<16x96xf32> to vector<8x32xf32>
    %277 = vector.extract_strided_slice %23 {offsets = [0, 0], sizes = [1, 8], strides = [1, 1]} : vector<2x8xf32> to vector<1x8xf32>
    %278 = vector.extract_strided_slice %274 {offsets = [0, 0], sizes = [8, 8], strides = [1, 1]} : vector<8x32xf32> to vector<8x8xf32>
    %279 = vector.extract_strided_slice %275 {offsets = [0, 0], sizes = [8, 8], strides = [1, 1]} : vector<8x32xf32> to vector<8x8xf32>
    %280 = vector.extract_strided_slice %276 {offsets = [0, 0], sizes = [8, 8], strides = [1, 1]} : vector<8x32xf32> to vector<8x8xf32>
    %cst_103 = arith.constant dense<0.000000e+00> : vector<8x8xf32>
    %281 = tpu.matmul %278, %279, %cst_103 {dimension_numbers = #tpu.dot_dimension_numbers<[1], [1], [0], [0], [0, 0, 1, 0], [], []>} : vector<8x8xf32>, vector<8x8xf32>, vector<8x8xf32> -> vector<8x8xf32>
    %282 = vector.broadcast %277 : vector<1x8xf32> to vector<8x8xf32>
    %283 = arith.addf %281, %282 : vector<8x8xf32>
    %cst_104 = arith.constant dense<0xFF800000> : vector<8xf32>
    %284 = vector.multi_reduction <maximumf>, %283, %cst_104 [1] : vector<8x8xf32> to vector<8xf32>
    %285 = vector.shape_cast %284 : vector<8xf32> to vector<8x1xf32>
    %286 = vector.broadcast %285 : vector<8x1xf32> to vector<8x8xf32>
    %287 = arith.subf %283, %286 : vector<8x8xf32>
    %288 = math.exp %287 : vector<8x8xf32>
    %cst_105 = arith.constant dense<0.000000e+00> : vector<8xf32>
    %289 = vector.multi_reduction <add>, %288, %cst_105 [1] : vector<8x8xf32> to vector<8xf32>
    %290 = vector.shape_cast %289 : vector<8xf32> to vector<8x1xf32>
    %291 = tpu.reciprocal %290 {approx = true} : vector<8x1xf32> -> vector<8x1xf32>
    %292 = vector.broadcast %291 : vector<8x1xf32> to vector<8x8xf32>
    %293 = arith.mulf %288, %292 : vector<8x8xf32>
    %cst_106 = arith.constant dense<0.000000e+00> : vector<8x8xf32>
    %294 = tpu.matmul %293, %280, %cst_106 {dimension_numbers = #tpu.dot_dimension_numbers<[1], [0], [0], [1], [0, 0, 1, 1], [], []>} : vector<8x8xf32>, vector<8x8xf32>, vector<8x8xf32> -> vector<8x8xf32>
    %295 = vector.extract_strided_slice %274 {offsets = [0, 8], sizes = [8, 8], strides = [1, 1]} : vector<8x32xf32> to vector<8x8xf32>
    %296 = vector.extract_strided_slice %275 {offsets = [0, 8], sizes = [8, 8], strides = [1, 1]} : vector<8x32xf32> to vector<8x8xf32>
    %297 = vector.extract_strided_slice %276 {offsets = [0, 8], sizes = [8, 8], strides = [1, 1]} : vector<8x32xf32> to vector<8x8xf32>
    %cst_107 = arith.constant dense<0.000000e+00> : vector<8x8xf32>
    %298 = tpu.matmul %295, %296, %cst_107 {dimension_numbers = #tpu.dot_dimension_numbers<[1], [1], [0], [0], [0, 0, 1, 0], [], []>} : vector<8x8xf32>, vector<8x8xf32>, vector<8x8xf32> -> vector<8x8xf32>
    %299 = vector.broadcast %277 : vector<1x8xf32> to vector<8x8xf32>
    %300 = arith.addf %298, %299 : vector<8x8xf32>
    %cst_108 = arith.constant dense<0xFF800000> : vector<8xf32>
    %301 = vector.multi_reduction <maximumf>, %300, %cst_108 [1] : vector<8x8xf32> to vector<8xf32>
    %302 = vector.shape_cast %301 : vector<8xf32> to vector<8x1xf32>
    %303 = vector.broadcast %302 : vector<8x1xf32> to vector<8x8xf32>
    %304 = arith.subf %300, %303 : vector<8x8xf32>
    %305 = math.exp %304 : vector<8x8xf32>
    %cst_109 = arith.constant dense<0.000000e+00> : vector<8xf32>
    %306 = vector.multi_reduction <add>, %305, %cst_109 [1] : vector<8x8xf32> to vector<8xf32>
    %307 = vector.shape_cast %306 : vector<8xf32> to vector<8x1xf32>
    %308 = tpu.reciprocal %307 {approx = true} : vector<8x1xf32> -> vector<8x1xf32>
    %309 = vector.broadcast %308 : vector<8x1xf32> to vector<8x8xf32>
    %310 = arith.mulf %305, %309 : vector<8x8xf32>
    %cst_110 = arith.constant dense<0.000000e+00> : vector<8x8xf32>
    %311 = tpu.matmul %310, %297, %cst_110 {dimension_numbers = #tpu.dot_dimension_numbers<[1], [0], [0], [1], [0, 0, 1, 1], [], []>} : vector<8x8xf32>, vector<8x8xf32>, vector<8x8xf32> -> vector<8x8xf32>
    %312 = vector.extract_strided_slice %274 {offsets = [0, 16], sizes = [8, 8], strides = [1, 1]} : vector<8x32xf32> to vector<8x8xf32>
    %313 = vector.extract_strided_slice %275 {offsets = [0, 16], sizes = [8, 8], strides = [1, 1]} : vector<8x32xf32> to vector<8x8xf32>
    %314 = vector.extract_strided_slice %276 {offsets = [0, 16], sizes = [8, 8], strides = [1, 1]} : vector<8x32xf32> to vector<8x8xf32>
    %cst_111 = arith.constant dense<0.000000e+00> : vector<8x8xf32>
    %315 = tpu.matmul %312, %313, %cst_111 {dimension_numbers = #tpu.dot_dimension_numbers<[1], [1], [0], [0], [0, 0, 1, 0], [], []>} : vector<8x8xf32>, vector<8x8xf32>, vector<8x8xf32> -> vector<8x8xf32>
    %316 = vector.broadcast %277 : vector<1x8xf32> to vector<8x8xf32>
    %317 = arith.addf %315, %316 : vector<8x8xf32>
    %cst_112 = arith.constant dense<0xFF800000> : vector<8xf32>
    %318 = vector.multi_reduction <maximumf>, %317, %cst_112 [1] : vector<8x8xf32> to vector<8xf32>
    %319 = vector.shape_cast %318 : vector<8xf32> to vector<8x1xf32>
    %320 = vector.broadcast %319 : vector<8x1xf32> to vector<8x8xf32>
    %321 = arith.subf %317, %320 : vector<8x8xf32>
    %322 = math.exp %321 : vector<8x8xf32>
    %cst_113 = arith.constant dense<0.000000e+00> : vector<8xf32>
    %323 = vector.multi_reduction <add>, %322, %cst_113 [1] : vector<8x8xf32> to vector<8xf32>
    %324 = vector.shape_cast %323 : vector<8xf32> to vector<8x1xf32>
    %325 = tpu.reciprocal %324 {approx = true} : vector<8x1xf32> -> vector<8x1xf32>
    %326 = vector.broadcast %325 : vector<8x1xf32> to vector<8x8xf32>
    %327 = arith.mulf %322, %326 : vector<8x8xf32>
    %cst_114 = arith.constant dense<0.000000e+00> : vector<8x8xf32>
    %328 = tpu.matmul %327, %314, %cst_114 {dimension_numbers = #tpu.dot_dimension_numbers<[1], [0], [0], [1], [0, 0, 1, 1], [], []>} : vector<8x8xf32>, vector<8x8xf32>, vector<8x8xf32> -> vector<8x8xf32>
    %329 = vector.extract_strided_slice %274 {offsets = [0, 24], sizes = [8, 8], strides = [1, 1]} : vector<8x32xf32> to vector<8x8xf32>
    %330 = vector.extract_strided_slice %275 {offsets = [0, 24], sizes = [8, 8], strides = [1, 1]} : vector<8x32xf32> to vector<8x8xf32>
    %331 = vector.extract_strided_slice %276 {offsets = [0, 24], sizes = [8, 8], strides = [1, 1]} : vector<8x32xf32> to vector<8x8xf32>
    %cst_115 = arith.constant dense<0.000000e+00> : vector<8x8xf32>
    %332 = tpu.matmul %329, %330, %cst_115 {dimension_numbers = #tpu.dot_dimension_numbers<[1], [1], [0], [0], [0, 0, 1, 0], [], []>} : vector<8x8xf32>, vector<8x8xf32>, vector<8x8xf32> -> vector<8x8xf32>
    %333 = vector.broadcast %277 : vector<1x8xf32> to vector<8x8xf32>
    %334 = arith.addf %332, %333 : vector<8x8xf32>
    %cst_116 = arith.constant dense<0xFF800000> : vector<8xf32>
    %335 = vector.multi_reduction <maximumf>, %334, %cst_116 [1] : vector<8x8xf32> to vector<8xf32>
    %336 = vector.shape_cast %335 : vector<8xf32> to vector<8x1xf32>
    %337 = vector.broadcast %336 : vector<8x1xf32> to vector<8x8xf32>
    %338 = arith.subf %334, %337 : vector<8x8xf32>
    %339 = math.exp %338 : vector<8x8xf32>
    %cst_117 = arith.constant dense<0.000000e+00> : vector<8xf32>
    %340 = vector.multi_reduction <add>, %339, %cst_117 [1] : vector<8x8xf32> to vector<8xf32>
    %341 = vector.shape_cast %340 : vector<8xf32> to vector<8x1xf32>
    %342 = tpu.reciprocal %341 {approx = true} : vector<8x1xf32> -> vector<8x1xf32>
    %343 = vector.broadcast %342 : vector<8x1xf32> to vector<8x8xf32>
    %344 = arith.mulf %339, %343 : vector<8x8xf32>
    %cst_118 = arith.constant dense<0.000000e+00> : vector<8x8xf32>
    %345 = tpu.matmul %344, %331, %cst_118 {dimension_numbers = #tpu.dot_dimension_numbers<[1], [0], [0], [1], [0, 0, 1, 1], [], []>} : vector<8x8xf32>, vector<8x8xf32>, vector<8x8xf32> -> vector<8x8xf32>
    %346 = tpu.concatenate %294, %311, %328, %345 in 1 : vector<8x8xf32>, vector<8x8xf32>, vector<8x8xf32>, vector<8x8xf32> -> vector<8x32xf32>
    %347 = vector.extract_strided_slice %273 {offsets = [8, 0], sizes = [8, 32], strides = [1, 1]} : vector<16x96xf32> to vector<8x32xf32>
    %348 = vector.extract_strided_slice %273 {offsets = [8, 32], sizes = [8, 32], strides = [1, 1]} : vector<16x96xf32> to vector<8x32xf32>
    %349 = vector.extract_strided_slice %273 {offsets = [8, 64], sizes = [8, 32], strides = [1, 1]} : vector<16x96xf32> to vector<8x32xf32>
    %350 = vector.extract_strided_slice %23 {offsets = [1, 0], sizes = [1, 8], strides = [1, 1]} : vector<2x8xf32> to vector<1x8xf32>
    %351 = vector.extract_strided_slice %347 {offsets = [0, 0], sizes = [8, 8], strides = [1, 1]} : vector<8x32xf32> to vector<8x8xf32>
    %352 = vector.extract_strided_slice %348 {offsets = [0, 0], sizes = [8, 8], strides = [1, 1]} : vector<8x32xf32> to vector<8x8xf32>
    %353 = vector.extract_strided_slice %349 {offsets = [0, 0], sizes = [8, 8], strides = [1, 1]} : vector<8x32xf32> to vector<8x8xf32>
    %cst_119 = arith.constant dense<0.000000e+00> : vector<8x8xf32>
    %354 = tpu.matmul %351, %352, %cst_119 {dimension_numbers = #tpu.dot_dimension_numbers<[1], [1], [0], [0], [0, 0, 1, 0], [], []>} : vector<8x8xf32>, vector<8x8xf32>, vector<8x8xf32> -> vector<8x8xf32>
    %355 = vector.broadcast %350 : vector<1x8xf32> to vector<8x8xf32>
    %356 = arith.addf %354, %355 : vector<8x8xf32>
    %cst_120 = arith.constant dense<0xFF800000> : vector<8xf32>
    %357 = vector.multi_reduction <maximumf>, %356, %cst_120 [1] : vector<8x8xf32> to vector<8xf32>
    %358 = vector.shape_cast %357 : vector<8xf32> to vector<8x1xf32>
    %359 = vector.broadcast %358 : vector<8x1xf32> to vector<8x8xf32>
    %360 = arith.subf %356, %359 : vector<8x8xf32>
    %361 = math.exp %360 : vector<8x8xf32>
    %cst_121 = arith.constant dense<0.000000e+00> : vector<8xf32>
    %362 = vector.multi_reduction <add>, %361, %cst_121 [1] : vector<8x8xf32> to vector<8xf32>
    %363 = vector.shape_cast %362 : vector<8xf32> to vector<8x1xf32>
    %364 = tpu.reciprocal %363 {approx = true} : vector<8x1xf32> -> vector<8x1xf32>
    %365 = vector.broadcast %364 : vector<8x1xf32> to vector<8x8xf32>
    %366 = arith.mulf %361, %365 : vector<8x8xf32>
    %cst_122 = arith.constant dense<0.000000e+00> : vector<8x8xf32>
    %367 = tpu.matmul %366, %353, %cst_122 {dimension_numbers = #tpu.dot_dimension_numbers<[1], [0], [0], [1], [0, 0, 1, 1], [], []>} : vector<8x8xf32>, vector<8x8xf32>, vector<8x8xf32> -> vector<8x8xf32>
    %368 = vector.extract_strided_slice %347 {offsets = [0, 8], sizes = [8, 8], strides = [1, 1]} : vector<8x32xf32> to vector<8x8xf32>
    %369 = vector.extract_strided_slice %348 {offsets = [0, 8], sizes = [8, 8], strides = [1, 1]} : vector<8x32xf32> to vector<8x8xf32>
    %370 = vector.extract_strided_slice %349 {offsets = [0, 8], sizes = [8, 8], strides = [1, 1]} : vector<8x32xf32> to vector<8x8xf32>
    %cst_123 = arith.constant dense<0.000000e+00> : vector<8x8xf32>
    %371 = tpu.matmul %368, %369, %cst_123 {dimension_numbers = #tpu.dot_dimension_numbers<[1], [1], [0], [0], [0, 0, 1, 0], [], []>} : vector<8x8xf32>, vector<8x8xf32>, vector<8x8xf32> -> vector<8x8xf32>
    %372 = vector.broadcast %350 : vector<1x8xf32> to vector<8x8xf32>
    %373 = arith.addf %371, %372 : vector<8x8xf32>
    %cst_124 = arith.constant dense<0xFF800000> : vector<8xf32>
    %374 = vector.multi_reduction <maximumf>, %373, %cst_124 [1] : vector<8x8xf32> to vector<8xf32>
    %375 = vector.shape_cast %374 : vector<8xf32> to vector<8x1xf32>
    %376 = vector.broadcast %375 : vector<8x1xf32> to vector<8x8xf32>
    %377 = arith.subf %373, %376 : vector<8x8xf32>
    %378 = math.exp %377 : vector<8x8xf32>
    %cst_125 = arith.constant dense<0.000000e+00> : vector<8xf32>
    %379 = vector.multi_reduction <add>, %378, %cst_125 [1] : vector<8x8xf32> to vector<8xf32>
    %380 = vector.shape_cast %379 : vector<8xf32> to vector<8x1xf32>
    %381 = tpu.reciprocal %380 {approx = true} : vector<8x1xf32> -> vector<8x1xf32>
    %382 = vector.broadcast %381 : vector<8x1xf32> to vector<8x8xf32>
    %383 = arith.mulf %378, %382 : vector<8x8xf32>
    %cst_126 = arith.constant dense<0.000000e+00> : vector<8x8xf32>
    %384 = tpu.matmul %383, %370, %cst_126 {dimension_numbers = #tpu.dot_dimension_numbers<[1], [0], [0], [1], [0, 0, 1, 1], [], []>} : vector<8x8xf32>, vector<8x8xf32>, vector<8x8xf32> -> vector<8x8xf32>
    %385 = vector.extract_strided_slice %347 {offsets = [0, 16], sizes = [8, 8], strides = [1, 1]} : vector<8x32xf32> to vector<8x8xf32>
    %386 = vector.extract_strided_slice %348 {offsets = [0, 16], sizes = [8, 8], strides = [1, 1]} : vector<8x32xf32> to vector<8x8xf32>
    %387 = vector.extract_strided_slice %349 {offsets = [0, 16], sizes = [8, 8], strides = [1, 1]} : vector<8x32xf32> to vector<8x8xf32>
    %cst_127 = arith.constant dense<0.000000e+00> : vector<8x8xf32>
    %388 = tpu.matmul %385, %386, %cst_127 {dimension_numbers = #tpu.dot_dimension_numbers<[1], [1], [0], [0], [0, 0, 1, 0], [], []>} : vector<8x8xf32>, vector<8x8xf32>, vector<8x8xf32> -> vector<8x8xf32>
    %389 = vector.broadcast %350 : vector<1x8xf32> to vector<8x8xf32>
    %390 = arith.addf %388, %389 : vector<8x8xf32>
    %cst_128 = arith.constant dense<0xFF800000> : vector<8xf32>
    %391 = vector.multi_reduction <maximumf>, %390, %cst_128 [1] : vector<8x8xf32> to vector<8xf32>
    %392 = vector.shape_cast %391 : vector<8xf32> to vector<8x1xf32>
    %393 = vector.broadcast %392 : vector<8x1xf32> to vector<8x8xf32>
    %394 = arith.subf %390, %393 : vector<8x8xf32>
    %395 = math.exp %394 : vector<8x8xf32>
    %cst_129 = arith.constant dense<0.000000e+00> : vector<8xf32>
    %396 = vector.multi_reduction <add>, %395, %cst_129 [1] : vector<8x8xf32> to vector<8xf32>
    %397 = vector.shape_cast %396 : vector<8xf32> to vector<8x1xf32>
    %398 = tpu.reciprocal %397 {approx = true} : vector<8x1xf32> -> vector<8x1xf32>
    %399 = vector.broadcast %398 : vector<8x1xf32> to vector<8x8xf32>
    %400 = arith.mulf %395, %399 : vector<8x8xf32>
    %cst_130 = arith.constant dense<0.000000e+00> : vector<8x8xf32>
    %401 = tpu.matmul %400, %387, %cst_130 {dimension_numbers = #tpu.dot_dimension_numbers<[1], [0], [0], [1], [0, 0, 1, 1], [], []>} : vector<8x8xf32>, vector<8x8xf32>, vector<8x8xf32> -> vector<8x8xf32>
    %402 = vector.extract_strided_slice %347 {offsets = [0, 24], sizes = [8, 8], strides = [1, 1]} : vector<8x32xf32> to vector<8x8xf32>
    %403 = vector.extract_strided_slice %348 {offsets = [0, 24], sizes = [8, 8], strides = [1, 1]} : vector<8x32xf32> to vector<8x8xf32>
    %404 = vector.extract_strided_slice %349 {offsets = [0, 24], sizes = [8, 8], strides = [1, 1]} : vector<8x32xf32> to vector<8x8xf32>
    %cst_131 = arith.constant dense<0.000000e+00> : vector<8x8xf32>
    %405 = tpu.matmul %402, %403, %cst_131 {dimension_numbers = #tpu.dot_dimension_numbers<[1], [1], [0], [0], [0, 0, 1, 0], [], []>} : vector<8x8xf32>, vector<8x8xf32>, vector<8x8xf32> -> vector<8x8xf32>
    %406 = vector.broadcast %350 : vector<1x8xf32> to vector<8x8xf32>
    %407 = arith.addf %405, %406 : vector<8x8xf32>
    %cst_132 = arith.constant dense<0xFF800000> : vector<8xf32>
    %408 = vector.multi_reduction <maximumf>, %407, %cst_132 [1] : vector<8x8xf32> to vector<8xf32>
    %409 = vector.shape_cast %408 : vector<8xf32> to vector<8x1xf32>
    %410 = vector.broadcast %409 : vector<8x1xf32> to vector<8x8xf32>
    %411 = arith.subf %407, %410 : vector<8x8xf32>
    %412 = math.exp %411 : vector<8x8xf32>
    %cst_133 = arith.constant dense<0.000000e+00> : vector<8xf32>
    %413 = vector.multi_reduction <add>, %412, %cst_133 [1] : vector<8x8xf32> to vector<8xf32>
    %414 = vector.shape_cast %413 : vector<8xf32> to vector<8x1xf32>
    %415 = tpu.reciprocal %414 {approx = true} : vector<8x1xf32> -> vector<8x1xf32>
    %416 = vector.broadcast %415 : vector<8x1xf32> to vector<8x8xf32>
    %417 = arith.mulf %412, %416 : vector<8x8xf32>
    %cst_134 = arith.constant dense<0.000000e+00> : vector<8x8xf32>
    %418 = tpu.matmul %417, %404, %cst_134 {dimension_numbers = #tpu.dot_dimension_numbers<[1], [0], [0], [1], [0, 0, 1, 1], [], []>} : vector<8x8xf32>, vector<8x8xf32>, vector<8x8xf32> -> vector<8x8xf32>
    %419 = tpu.concatenate %367, %384, %401, %418 in 1 : vector<8x8xf32>, vector<8x8xf32>, vector<8x8xf32>, vector<8x8xf32> -> vector<8x32xf32>
    %420 = tpu.concatenate %346, %419 in 0 : vector<8x32xf32>, vector<8x32xf32> -> vector<16x32xf32>
    %c1_135 = arith.constant 1 : index
    %c0_136 = arith.constant 0 : index
    %c0_137 = arith.constant 0 : index
    %421 = vector.load %arg7[%c1_135, %c0_136, %c0_137] : memref<2x32x32xbf16, #tpu.memory_space<vmem>>, vector<1x32x32xbf16>
    %422 = vector.shape_cast %421 : vector<1x32x32xbf16> to vector<32x32xbf16>
    %c1_138 = arith.constant 1 : index
    %c0_139 = arith.constant 0 : index
    %c0_140 = arith.constant 0 : index
    %423 = vector.load %arg8[%c1_138, %c0_139, %c0_140] : memref<2x1x32xf32, #tpu.memory_space<vmem>>, vector<1x1x32xf32>
    %424 = vector.shape_cast %423 : vector<1x1x32xf32> to vector<1x32xf32>
    %425 = arith.truncf %420 : vector<16x32xf32> to vector<16x32xbf16>
    %cst_141 = arith.constant dense<0.000000e+00> : vector<16x32xf32>
    %426 = tpu.matmul %425, %422, %cst_141 {dimension_numbers = #tpu.dot_dimension_numbers<[1], [0], [0], [1], [0, 0, 1, 1], [], []>} : vector<16x32xbf16>, vector<32x32xbf16>, vector<16x32xf32> -> vector<16x32xf32>
    %427 = vector.broadcast %424 : vector<1x32xf32> to vector<16x32xf32>
    %428 = arith.addf %426, %427 : vector<16x32xf32>
    %429 = arith.addf %428, %265 : vector<16x32xf32>
    %c1_142 = arith.constant 1 : index
    %c0_143 = arith.constant 0 : index
    %c0_144 = arith.constant 0 : index
    %430 = vector.load %arg9[%c1_142, %c0_143, %c0_144] : memref<2x1x32xf32, #tpu.memory_space<vmem>>, vector<1x1x32xf32>
    %431 = vector.shape_cast %430 : vector<1x1x32xf32> to vector<1x32xf32>
    %c1_145 = arith.constant 1 : index
    %c0_146 = arith.constant 0 : index
    %c0_147 = arith.constant 0 : index
    %432 = vector.load %arg10[%c1_145, %c0_146, %c0_147] : memref<2x1x32xf32, #tpu.memory_space<vmem>>, vector<1x1x32xf32>
    %433 = vector.shape_cast %432 : vector<1x1x32xf32> to vector<1x32xf32>
    %cst_148 = arith.constant dense<0.000000e+00> : vector<16xf32>
    %434 = vector.multi_reduction <add>, %429, %cst_148 [1] : vector<16x32xf32> to vector<16xf32>
    %435 = vector.shape_cast %434 : vector<16xf32> to vector<16x1xf32>
    %cst_149 = arith.constant 3.200000e+01 : f32
    %436 = vector.broadcast %cst_149 : f32 to vector<16x1xf32>
    %437 = arith.divf %435, %436 : vector<16x1xf32>
    %438 = vector.broadcast %437 : vector<16x1xf32> to vector<16x32xf32>
    %439 = arith.subf %429, %438 : vector<16x32xf32>
    %440 = arith.mulf %439, %439 : vector<16x32xf32>
    %cst_150 = arith.constant dense<0.000000e+00> : vector<16xf32>
    %441 = vector.multi_reduction <add>, %440, %cst_150 [1] : vector<16x32xf32> to vector<16xf32>
    %442 = vector.shape_cast %441 : vector<16xf32> to vector<16x1xf32>
    %cst_151 = arith.constant 3.200000e+01 : f32
    %443 = vector.broadcast %cst_151 : f32 to vector<16x1xf32>
    %444 = arith.divf %442, %443 : vector<16x1xf32>
    %cst_152 = arith.constant 9.99999996E-13 : f32
    %445 = vector.broadcast %cst_152 : f32 to vector<16x1xf32>
    %446 = arith.addf %444, %445 : vector<16x1xf32>
    %447 = math.rsqrt %446 : vector<16x1xf32>
    %448 = vector.broadcast %447 : vector<16x1xf32> to vector<16x32xf32>
    %449 = arith.mulf %439, %448 : vector<16x32xf32>
    %450 = vector.broadcast %431 : vector<1x32xf32> to vector<16x32xf32>
    %451 = arith.mulf %449, %450 : vector<16x32xf32>
    %452 = vector.broadcast %433 : vector<1x32xf32> to vector<16x32xf32>
    %453 = arith.addf %451, %452 : vector<16x32xf32>
    %c1_153 = arith.constant 1 : index
    %c0_154 = arith.constant 0 : index
    %c0_155 = arith.constant 0 : index
    %454 = vector.load %arg11[%c1_153, %c0_154, %c0_155] : memref<2x32x64xbf16, #tpu.memory_space<vmem>>, vector<1x32x64xbf16>
    %455 = vector.shape_cast %454 : vector<1x32x64xbf16> to vector<32x64xbf16>
    %c1_156 = arith.constant 1 : index
    %c0_157 = arith.constant 0 : index
    %c0_158 = arith.constant 0 : index
    %456 = vector.load %arg12[%c1_156, %c0_157, %c0_158] : memref<2x1x64xf32, #tpu.memory_space<vmem>>, vector<1x1x64xf32>
    %457 = vector.shape_cast %456 : vector<1x1x64xf32> to vector<1x64xf32>
    %458 = arith.truncf %453 : vector<16x32xf32> to vector<16x32xbf16>
    %cst_159 = arith.constant dense<0.000000e+00> : vector<16x64xf32>
    %459 = tpu.matmul %458, %455, %cst_159 {dimension_numbers = #tpu.dot_dimension_numbers<[1], [0], [0], [1], [0, 0, 1, 1], [], []>} : vector<16x32xbf16>, vector<32x64xbf16>, vector<16x64xf32> -> vector<16x64xf32>
    %460 = vector.broadcast %457 : vector<1x64xf32> to vector<16x64xf32>
    %461 = arith.addf %459, %460 : vector<16x64xf32>
    %cst_160 = arith.constant 5.000000e-01 : f32
    %462 = vector.broadcast %cst_160 : f32 to vector<16x64xf32>
    %463 = arith.mulf %462, %461 : vector<16x64xf32>
    %cst_161 = arith.constant 4.471500e-02 : f32
    %464 = vector.broadcast %cst_161 : f32 to vector<16x64xf32>
    %465 = arith.mulf %464, %461 : vector<16x64xf32>
    %466 = arith.mulf %465, %461 : vector<16x64xf32>
    %467 = arith.mulf %466, %461 : vector<16x64xf32>
    %468 = arith.addf %461, %467 : vector<16x64xf32>
    %cst_162 = arith.constant 0.797884583 : f32
    %469 = vector.broadcast %cst_162 : f32 to vector<16x64xf32>
    %470 = arith.mulf %469, %468 : vector<16x64xf32>
    %471 = math.tanh %470 : vector<16x64xf32>
    %cst_163 = arith.constant 1.000000e+00 : f32
    %472 = vector.broadcast %cst_163 : f32 to vector<16x64xf32>
    %473 = arith.addf %472, %471 : vector<16x64xf32>
    %474 = arith.mulf %463, %473 : vector<16x64xf32>
    %c1_164 = arith.constant 1 : index
    %c0_165 = arith.constant 0 : index
    %c0_166 = arith.constant 0 : index
    %475 = vector.load %arg13[%c1_164, %c0_165, %c0_166] : memref<2x64x32xbf16, #tpu.memory_space<vmem>>, vector<1x64x32xbf16>
    %476 = vector.shape_cast %475 : vector<1x64x32xbf16> to vector<64x32xbf16>
    %c1_167 = arith.constant 1 : index
    %c0_168 = arith.constant 0 : index
    %c0_169 = arith.constant 0 : index
    %477 = vector.load %arg14[%c1_167, %c0_168, %c0_169] : memref<2x1x32xf32, #tpu.memory_space<vmem>>, vector<1x1x32xf32>
    %478 = vector.shape_cast %477 : vector<1x1x32xf32> to vector<1x32xf32>
    %479 = arith.truncf %474 : vector<16x64xf32> to vector<16x64xbf16>
    %cst_170 = arith.constant dense<0.000000e+00> : vector<16x32xf32>
    %480 = tpu.matmul %479, %476, %cst_170 {dimension_numbers = #tpu.dot_dimension_numbers<[1], [0], [0], [1], [0, 0, 1, 1], [], []>} : vector<16x64xbf16>, vector<64x32xbf16>, vector<16x32xf32> -> vector<16x32xf32>
    %481 = vector.broadcast %478 : vector<1x32xf32> to vector<16x32xf32>
    %482 = arith.addf %480, %481 : vector<16x32xf32>
    %483 = arith.addf %482, %453 : vector<16x32xf32>
    %c1_171 = arith.constant 1 : index
    %c0_172 = arith.constant 0 : index
    %c0_173 = arith.constant 0 : index
    %484 = vector.load %arg15[%c1_171, %c0_172, %c0_173] : memref<2x1x32xf32, #tpu.memory_space<vmem>>, vector<1x1x32xf32>
    %485 = vector.shape_cast %484 : vector<1x1x32xf32> to vector<1x32xf32>
    %c1_174 = arith.constant 1 : index
    %c0_175 = arith.constant 0 : index
    %c0_176 = arith.constant 0 : index
    %486 = vector.load %arg16[%c1_174, %c0_175, %c0_176] : memref<2x1x32xf32, #tpu.memory_space<vmem>>, vector<1x1x32xf32>
    %487 = vector.shape_cast %486 : vector<1x1x32xf32> to vector<1x32xf32>
    %cst_177 = arith.constant dense<0.000000e+00> : vector<16xf32>
    %488 = vector.multi_reduction <add>, %483, %cst_177 [1] : vector<16x32xf32> to vector<16xf32>
    %489 = vector.shape_cast %488 : vector<16xf32> to vector<16x1xf32>
    %cst_178 = arith.constant 3.200000e+01 : f32
    %490 = vector.broadcast %cst_178 : f32 to vector<16x1xf32>
    %491 = arith.divf %489, %490 : vector<16x1xf32>
    %492 = vector.broadcast %491 : vector<16x1xf32> to vector<16x32xf32>
    %493 = arith.subf %483, %492 : vector<16x32xf32>
    %494 = arith.mulf %493, %493 : vector<16x32xf32>
    %cst_179 = arith.constant dense<0.000000e+00> : vector<16xf32>
    %495 = vector.multi_reduction <add>, %494, %cst_179 [1] : vector<16x32xf32> to vector<16xf32>
    %496 = vector.shape_cast %495 : vector<16xf32> to vector<16x1xf32>
    %cst_180 = arith.constant 3.200000e+01 : f32
    %497 = vector.broadcast %cst_180 : f32 to vector<16x1xf32>
    %498 = arith.divf %496, %497 : vector<16x1xf32>
    %cst_181 = arith.constant 9.99999996E-13 : f32
    %499 = vector.broadcast %cst_181 : f32 to vector<16x1xf32>
    %500 = arith.addf %498, %499 : vector<16x1xf32>
    %501 = math.rsqrt %500 : vector<16x1xf32>
    %502 = vector.broadcast %501 : vector<16x1xf32> to vector<16x32xf32>
    %503 = arith.mulf %493, %502 : vector<16x32xf32>
    %504 = vector.broadcast %485 : vector<1x32xf32> to vector<16x32xf32>
    %505 = arith.mulf %503, %504 : vector<16x32xf32>
    %506 = vector.broadcast %487 : vector<1x32xf32> to vector<16x32xf32>
    %507 = arith.addf %505, %506 : vector<16x32xf32>
    %508 = vector.extract_strided_slice %507 {offsets = [0, 0], sizes = [1, 32], strides = [1, 1]} : vector<16x32xf32> to vector<1x32xf32>
    %509 = vector.extract_strided_slice %507 {offsets = [8, 0], sizes = [1, 32], strides = [1, 1]} : vector<16x32xf32> to vector<1x32xf32>
    %510 = tpu.concatenate %508, %509 in 0 : vector<1x32xf32>, vector<1x32xf32> -> vector<2x32xf32>
    %c0_182 = arith.constant 0 : index
    %c0_183 = arith.constant 0 : index
    %511 = vector.load %arg17[%c0_182, %c0_183] : memref<32x32xbf16, #tpu.memory_space<vmem>>, vector<32x32xbf16>
    %c0_184 = arith.constant 0 : index
    %c0_185 = arith.constant 0 : index
    %512 = vector.load %arg18[%c0_184, %c0_185] : memref<1x32xf32, #tpu.memory_space<vmem>>, vector<1x32xf32>
    %513 = arith.truncf %510 : vector<2x32xf32> to vector<2x32xbf16>
    %cst_186 = arith.constant dense<0.000000e+00> : vector<2x32xf32>
    %514 = tpu.matmul %513, %511, %cst_186 {dimension_numbers = #tpu.dot_dimension_numbers<[1], [0], [0], [1], [0, 0, 1, 1], [], []>} : vector<2x32xbf16>, vector<32x32xbf16>, vector<2x32xf32> -> vector<2x32xf32>
    %515 = vector.broadcast %512 : vector<1x32xf32> to vector<2x32xf32>
    %516 = arith.addf %514, %515 : vector<2x32xf32>
    %517 = math.tanh %516 : vector<2x32xf32>
    %c0_187 = arith.constant 0 : index
    %c0_188 = arith.constant 0 : index
    %518 = vector.load %arg19[%c0_187, %c0_188] : memref<32x4xbf16, #tpu.memory_space<vmem>>, vector<32x4xbf16>
    %c0_189 = arith.constant 0 : index
    %c0_190 = arith.constant 0 : index
    %519 = vector.load %arg20[%c0_189, %c0_190] : memref<1x4xf32, #tpu.memory_space<vmem>>, vector<1x4xf32>
    %520 = arith.truncf %517 : vector<2x32xf32> to vector<2x32xbf16>
    %cst_191 = arith.constant dense<0.000000e+00> : vector<2x4xf32>
    %521 = tpu.matmul %520, %518, %cst_191 {dimension_numbers = #tpu.dot_dimension_numbers<[1], [0], [0], [1], [0, 0, 1, 1], [], []>} : vector<2x32xbf16>, vector<32x4xbf16>, vector<2x4xf32> -> vector<2x4xf32>
    %522 = vector.broadcast %519 : vector<1x4xf32> to vector<2x4xf32>
    %523 = arith.addf %521, %522 : vector<2x4xf32>
    %c0_192 = arith.constant 0 : index
    %c0_193 = arith.constant 0 : index
    %524 = vector.load %arg21[%c0_192, %c0_193] : memref<2x4xf32, #tpu.memory_space<vmem>>, vector<2x4xf32>
    tpu.vector_store %arg21[%c0_192, %c0_193], %523 {strides = array<i32>} : memref<2x4xf32, #tpu.memory_space<vmem>>, vector<2x4xf32>,
    return
  }
  func.func @transform_0(%arg0: i32) -> (i32, i32) {
    %c0_i32 = arith.constant 0 : i32
    %c0_i32_0 = arith.constant 0 : i32
    %c0_i32_1 = arith.constant 0 : i32
    return %c0_i32, %c0_i32_0 : i32, i32
  }
  func.func @transform_1(%arg0: i32) -> (i32, i32) {
    %c0_i32 = arith.constant 0 : i32
    %c0_i32_0 = arith.constant 0 : i32
    %c0_i32_1 = arith.constant 0 : i32
    return %c0_i32, %c0_i32_0 : i32, i32
  }
  func.func @transform_2(%arg0: i32) -> (i32, i32) {
    %c0_i32 = arith.constant 0 : i32
    %c0_i32_0 = arith.constant 0 : i32
    %c0_i32_1 = arith.constant 0 : i32
    return %c0_i32, %c0_i32_0 : i32, i32
  }
  func.func @transform_3(%arg0: i32) -> (i32, i32) {
    %c0_i32 = arith.constant 0 : i32
    %c0_i32_0 = arith.constant 0 : i32
    %c0_i32_1 = arith.constant 0 : i32
    return %c0_i32, %c0_i32_0 : i32, i32
  }
  func.func @transform_4(%arg0: i32) -> (i32, i32, i32) {
    %c0_i32 = arith.constant 0 : i32
    %c0_i32_0 = arith.constant 0 : i32
    %c0_i32_1 = arith.constant 0 : i32
    %c0_i32_2 = arith.constant 0 : i32
    return %c0_i32, %c0_i32_0, %c0_i32_1 : i32, i32, i32
  }
  func.func @transform_5(%arg0: i32) -> (i32, i32, i32) {
    %c0_i32 = arith.constant 0 : i32
    %c0_i32_0 = arith.constant 0 : i32
    %c0_i32_1 = arith.constant 0 : i32
    %c0_i32_2 = arith.constant 0 : i32
    return %c0_i32, %c0_i32_0, %c0_i32_1 : i32, i32, i32
  }
  func.func @transform_6(%arg0: i32) -> (i32, i32, i32) {
    %c0_i32 = arith.constant 0 : i32
    %c0_i32_0 = arith.constant 0 : i32
    %c0_i32_1 = arith.constant 0 : i32
    %c0_i32_2 = arith.constant 0 : i32
    return %c0_i32, %c0_i32_0, %c0_i32_1 : i32, i32, i32
  }
  func.func @transform_7(%arg0: i32) -> (i32, i32, i32) {
    %c0_i32 = arith.constant 0 : i32
    %c0_i32_0 = arith.constant 0 : i32
    %c0_i32_1 = arith.constant 0 : i32
    %c0_i32_2 = arith.constant 0 : i32
    return %c0_i32, %c0_i32_0, %c0_i32_1 : i32, i32, i32
  }
  func.func @transform_8(%arg0: i32) -> (i32, i32, i32) {
    %c0_i32 = arith.constant 0 : i32
    %c0_i32_0 = arith.constant 0 : i32
    %c0_i32_1 = arith.constant 0 : i32
    %c0_i32_2 = arith.constant 0 : i32
    return %c0_i32, %c0_i32_0, %c0_i32_1 : i32, i32, i32
  }
  func.func @transform_9(%arg0: i32) -> (i32, i32, i32) {
    %c0_i32 = arith.constant 0 : i32
    %c0_i32_0 = arith.constant 0 : i32
    %c0_i32_1 = arith.constant 0 : i32
    %c0_i32_2 = arith.constant 0 : i32
    return %c0_i32, %c0_i32_0, %c0_i32_1 : i32, i32, i32
  }
  func.func @transform_10(%arg0: i32) -> (i32, i32, i32) {
    %c0_i32 = arith.constant 0 : i32
    %c0_i32_0 = arith.constant 0 : i32
    %c0_i32_1 = arith.constant 0 : i32
    %c0_i32_2 = arith.constant 0 : i32
    return %c0_i32, %c0_i32_0, %c0_i32_1 : i32, i32, i32
  }
  func.func @transform_11(%arg0: i32) -> (i32, i32, i32) {
    %c0_i32 = arith.constant 0 : i32
    %c0_i32_0 = arith.constant 0 : i32
    %c0_i32_1 = arith.constant 0 : i32
    %c0_i32_2 = arith.constant 0 : i32
    return %c0_i32, %c0_i32_0, %c0_i32_1 : i32, i32, i32
  }
  func.func @transform_12(%arg0: i32) -> (i32, i32, i32) {
    %c0_i32 = arith.constant 0 : i32
    %c0_i32_0 = arith.constant 0 : i32
    %c0_i32_1 = arith.constant 0 : i32
    %c0_i32_2 = arith.constant 0 : i32
    return %c0_i32, %c0_i32_0, %c0_i32_1 : i32, i32, i32
  }
  func.func @transform_13(%arg0: i32) -> (i32, i32, i32) {
    %c0_i32 = arith.constant 0 : i32
    %c0_i32_0 = arith.constant 0 : i32
    %c0_i32_1 = arith.constant 0 : i32
    %c0_i32_2 = arith.constant 0 : i32
    return %c0_i32, %c0_i32_0, %c0_i32_1 : i32, i32, i32
  }
  func.func @transform_14(%arg0: i32) -> (i32, i32, i32) {
    %c0_i32 = arith.constant 0 : i32
    %c0_i32_0 = arith.constant 0 : i32
    %c0_i32_1 = arith.constant 0 : i32
    %c0_i32_2 = arith.constant 0 : i32
    return %c0_i32, %c0_i32_0, %c0_i32_1 : i32, i32, i32
  }
  func.func @transform_15(%arg0: i32) -> (i32, i32, i32) {
    %c0_i32 = arith.constant 0 : i32
    %c0_i32_0 = arith.constant 0 : i32
    %c0_i32_1 = arith.constant 0 : i32
    %c0_i32_2 = arith.constant 0 : i32
    return %c0_i32, %c0_i32_0, %c0_i32_1 : i32, i32, i32
  }
  func.func @transform_16(%arg0: i32) -> (i32, i32) {
    %c0_i32 = arith.constant 0 : i32
    %c0_i32_0 = arith.constant 0 : i32
    %c0_i32_1 = arith.constant 0 : i32
    return %c0_i32, %c0_i32_0 : i32, i32
  }
  func.func @transform_17(%arg0: i32) -> (i32, i32) {
    %c0_i32 = arith.constant 0 : i32
    %c0_i32_0 = arith.constant 0 : i32
    %c0_i32_1 = arith.constant 0 : i32
    return %c0_i32, %c0_i32_0 : i32, i32
  }
  func.func @transform_18(%arg0: i32) -> (i32, i32) {
    %c0_i32 = arith.constant 0 : i32
    %c0_i32_0 = arith.constant 0 : i32
    %c0_i32_1 = arith.constant 0 : i32
    return %c0_i32, %c0_i32_0 : i32, i32
  }
  func.func @transform_19(%arg0: i32) -> (i32, i32) {
    %c0_i32 = arith.constant 0 : i32
    %c0_i32_0 = arith.constant 0 : i32
    %c0_i32_1 = arith.constant 0 : i32
    return %c0_i32, %c0_i32_0 : i32, i32
  }
  func.func @transform_20(%arg0: i32) -> (i32, i32) {
    %c0_i32 = arith.constant 0 : i32
    %c0_i32_0 = arith.constant 0 : i32
    %c0_i32_1 = arith.constant 0 : i32
    return %c0_i32, %c0_i32_0 : i32, i32
  }
}

</mosaic_0001>

<bundles_post_ra>
// kernel: tpu_custom_call.1
= control target key start
LH: loop header
LB: loop body
LE: loop exit
PB: predicated region body
PF: predicated region fallthrough
CT: control target
= control target key end

     0   :  { %s5376_s0 = inlined_call_operand.hbm [shape: f32[16,32], index: 0, kind: input, shape index: {}]   ;;  %s5377_s1 = inlined_call_operand.vmem [shape: f32[2,8], index: 1, kind: input, shape index: {}]   ;;  %s5378_s2 = inlined_call_operand.vmem [shape: f32[1,32], index: 2, kind: input, shape index: {}]   ;;  %s5379_s3 = inlined_call_operand.hbm [shape: f32[1,32], index: 3, kind: input, shape index: {}]   ;;  %s5380_s4 = inlined_call_operand.vmem [shape: bf16[2,32,96], index: 4, kind: input, shape index: {}]   ;;  %s5381_s5 = inlined_call_operand.vmem [shape: f32[2,1,96], index: 5, kind: input, shape index: {}]   ;;  %s5382_s6 = inlined_call_operand.vmem [shape: bf16[2,32,32], index: 6, kind: input, shape index: {}]   ;;  %s5383_s7 = inlined_call_operand.vmem [shape: f32[2,1,32], index: 7, kind: input, shape index: {}]   ;;  %s5384_s8 = inlined_call_operand.hbm [shape: f32[2,1,32], index: 8, kind: input, shape index: {}]   ;;  %s5385_s9 = inlined_call_operand.hbm [shape: f32[2,1,32], index: 9, kind: input, shape index: {}]   ;;  %s5386_s10 = inlined_call_operand.vmem [shape: bf16[2,32,64], index: 10, kind: input, shape index: {}]   ;;  %s5387_s11 = inlined_call_operand.hbm [shape: f32[2,1,64], index: 11, kind: input, shape index: {}]   ;;  %s5388_s12 = inlined_call_operand.vmem [shape: bf16[2,64,32], index: 12, kind: input, shape index: {}]   ;;  %s5389_s13 = inlined_call_operand.vmem [shape: f32[2,1,32], index: 13, kind: input, shape index: {}]   ;;  %s5390_s14 = inlined_call_operand.vmem [shape: f32[2,1,32], index: 14, kind: input, shape index: {}]   ;;  %s5391_s15 = inlined_call_operand.vmem [shape: f32[2,1,32], index: 15, kind: input, shape index: {}]   ;;  %s5392_s16 = inlined_call_operand.hbm [shape: bf16[32,32], index: 16, kind: input, shape index: {}]   ;;  %s5393_s17 = inlined_call_operand.vmem [shape: f32[1,32], index: 17, kind: input, shape index: {}]   ;;  %s5394_s18 = inlined_call_operand.vmem [shape: bf16[32,4], index: 18, kind: input, shape index: {}]   ;;  %s5395_s19 = inlined_call_operand.vmem [shape: f32[1,4], index: 19, kind: input, shape index: {}]   ;;  %s5396_s20 = inlined_call_operand.hbm [shape: f32[2,4], index: 20, kind: output, shape index: {}]  }
   0x1   :  { %5403 = sst [smem:[#allocation19_spill]] %s5376_s0 }
   0x2   :  { %5404 = sst [smem:[#allocation20_spill]] %s5377_s1 }
   0x3   :  { %5405 = sst [smem:[#allocation21_spill]] %s5378_s2 }
   0x4   :  { %5406 = sst [smem:[#allocation22_spill]] %s5379_s3 }
   0x5   :  { %5407 = sst [smem:[#allocation23_spill]] %s5380_s4 }
   0x6   :  { %25 = vsyncpa [#allocation3], 0 }
   0x7   :  { %26 = vsyncpa [#allocation6], 0 }
   0x8   :  { %27 = vsyncpa [#allocation9], 0 }
   0x9   :  { %28 = vsyncpa [#allocation12], 0 }
   0xa   :  { %29 = vsyncpa [#allocation4], 0  ;;  %s4669_s1 = smov [#allocation5]  }
   0xb   :  { %s52_s22 = sshll.u32 %s4669_s1, 4  ;;  %s53_s22 = int_to_ptr.vmem [resolvable:$true] %s52_s22 }
   0xc   :  { %s4527_s23 = scalar_lea.vmem %s53_s22, 16  ;;  %s4531_s24 = scalar_lea.vmem %s53_s22, 32 }
   0xd   :  { %p4528_p0 = scmp.ne.s32.totalorder %s53_s22, %s4527_s23  ;;  %p4532_p1 = scmp.lt.s32.totalorder %s53_s22, %s53_s22 }
   0xe   :  { %p4533_p2 = scmp.lt.s32.totalorder %s4531_s24, %s4527_s23 }
  0x10   :  { %p4534_p3 = por %p4533_p2, %p4532_p1 }
  0x12   :  { %p4535_p4 = pnand %p4534_p3, %p4528_p0 }
  0x14   :  { %4538 = shalt.err (!%p4535_p4)
}
  0x15   :  { %s5408_s3 = sld [smem:[#allocation22_spill]]  ;;  %s4670_s26 = smov [#allocation8]  }
  0x16   :  { %s81_s27 = sshll.u32 %s4670_s26, 4  ;;  %s4671_s28 = smov [#allocation2]   ;;  %s82_s27 = int_to_ptr.vmem [resolvable:$true] %s81_s27 }
  0x17   :  { %s35_s4 = sshll.u32 %s4671_s28, 4  ;;  %s4547_s29 = scalar_lea.vmem %s82_s27, 32  ;;  %s36_s4 = int_to_ptr.vmem [resolvable:$true] %s35_s4 }
  0x18   :  { %p4548_p5 = scmp.ne.s32.totalorder %s82_s27, %s4547_s29  ;;  %p4552_p6 = scmp.lt.s32.totalorder %s82_s27, %s82_s27 }
  0x19   :  { %p4553_p7 = scmp.lt.s32.totalorder %s4547_s29, %s4547_s29 }
  0x1b   :  { %55 = dma.hbm_to_vmem [thread:$0]  %s5408_s3, 16, %s53_s22, [#allocation6]  }
  0x1c   :  { %p4554_p8 = por %p4553_p7, %p4552_p6 }
  0x1e   :  { %p4555_p9 = pnand %p4554_p8, %p4548_p5 }
  0x20   :  { %4558 = shalt.err (!%p4555_p9)
}
  0x21   :  { %s5399_s30 = smov 16   ;;  %s4673_s0 = smov 1  }
  0x22   :  { %87 = dma.hbm_to_vmem [thread:$0]  %s5385_s9, 32, %s82_s27, [#allocation9], %s5399_s30, %s5399_s30, %s4673_s0  }
  0x23   :  { %s4567_s22 = scalar_lea.vmem %s36_s4, 256  ;;  %p4572_p11 = scmp.lt.s32.totalorder %s36_s4, %s36_s4 }
  0x24   :  { %p4568_p10 = scmp.ne.s32.totalorder %s36_s4, %s4567_s22  ;;  %p4573_p12 = scmp.lt.s32.totalorder %s4567_s22, %s4567_s22 }
  0x26   :  { %p4574_p13 = por %p4573_p12, %p4572_p11 }
  0x28   :  { %p4575_p0 = pnand %p4574_p13, %p4568_p10 }
  0x2a   :  { %4578 = shalt.err (!%p4575_p0)
}
  0x2b   :  { %s4674_s23 = smov 128   ;;  %s5400_s24 = smov 8  }
  0x2c   :  { %s5409_s3 = sld [smem:[#allocation19_spill]]  ;;  %s4676_s26 = smov [#allocation7]  }
  0x2d   :  { %s69_s28 = sshll.u32 %s4676_s26, 4  ;;  %s4677_s29 = smov [#allocation10]   ;;  %s70_s28 = int_to_ptr.vmem [resolvable:$true] %s69_s28 }
  0x2e   :  { %s95_s9 = sshll.u32 %s4677_s29, 4  ;;  %s4587_s27 = scalar_lea.vmem %s70_s28, 32  ;;  %s96_s9 = int_to_ptr.vmem [resolvable:$true] %s95_s9 }
  0x2f   :  { %p4588_p1 = scmp.ne.s32.totalorder %s70_s28, %s4587_s27  ;;  %p4592_p2 = scmp.lt.s32.totalorder %s70_s28, %s70_s28 }
  0x30   :  { %p4593_p3 = scmp.lt.s32.totalorder %s4587_s27, %s4587_s27 }
  0x32   :  { %41 = dma.hbm_to_vmem [thread:$0]  %s5409_s3, 256, %s36_s4, [#allocation3], %s4674_s23, %s4674_s23, %s5400_s24  }
  0x33   :  { %p4594_p4 = por %p4593_p3, %p4592_p2 }
  0x35   :  { %p4595_p5 = pnand %p4594_p4, %p4588_p1 }
  0x37   :  { %4598 = shalt.err (!%p4595_p5)
}
  0x38   :  { %75 = dma.hbm_to_vmem [thread:$0]  %s5384_s8, 32, %s70_s28, [#allocation6], %s5399_s30, %s5399_s30, %s4673_s0  }
  0x39   :  { %s4607_s4 = scalar_lea.vmem %s96_s9, 32  ;;  %p4612_p7 = scmp.lt.s32.totalorder %s96_s9, %s96_s9 }
  0x3a   :  { %p4608_p6 = scmp.ne.s32.totalorder %s96_s9, %s4607_s4  ;;  %p4613_p8 = scmp.lt.s32.totalorder %s4607_s4, %s4607_s4 }
  0x3c   :  { %p4614_p9 = por %p4613_p8, %p4612_p7 }
  0x3e   :  { %p4615_p10 = pnand %p4614_p9, %p4608_p6 }
  0x40   :  { %4618 = shalt.err (!%p4615_p10)
}
  0x41   :  { %101 = dma.hbm_to_vmem [thread:$0]  %s5387_s11, 32, %s96_s9, [#allocation9], %s5399_s30, %s5399_s30, %s4673_s0  }
  0x42   :  { %s4678_s2 = smov [#allocation11]  }
  0x43   :  { %s115_s25 = sshll.u32 %s4678_s2, 4  ;;  %s116_s25 = int_to_ptr.vmem [resolvable:$true] %s115_s25 }
  0x44   :  { %s4627_s3 = scalar_lea.vmem %s116_s25, 256  ;;  %p4632_p12 = scmp.lt.s32.totalorder %s116_s25, %s116_s25 }
  0x45   :  { %p4628_p11 = scmp.ne.s32.totalorder %s116_s25, %s4627_s3  ;;  %p4633_p13 = scmp.lt.s32.totalorder %s4627_s3, %s4627_s3 }
  0x47   :  { %p4634_p0 = por %p4633_p13, %p4632_p12 }
  0x49   :  { %p4635_p1 = pnand %p4634_p0, %p4628_p11 }
  0x4b   :  { %4638 = shalt.err (!%p4635_p1)
}
  0x4c   :  { %s4679_s8 = smov 64   ;;  %s4680_s26 = smov 4  }
  0x4d   :  { %121 = dma.hbm_to_vmem [thread:$0]  %s5392_s16, 256, %s116_s25, [#allocation12], %s4679_s8, %s4679_s8, %s4680_s26  }
  0x4e   :  { %4659 = dma.done.wait [#allocation3], 256  }
  0x4f   :  { %4660 = vsyncadd [#allocation3], 4294967040 }
  0x50   :  { %4661 = dma.done.wait [#allocation6], 48  }
  0x51   :  { %4662 = vsyncadd [#allocation6], 4294967248 }
  0x52   :  { %4663 = dma.done.wait [#allocation9], 64  }
  0x53   :  { %4664 = vsyncadd [#allocation9], 4294967232 }
  0x54   :  { %4665 = dma.done.wait [#allocation12], 256  }
  0x55   :  { %4666 = vsyncadd [#allocation12], 4294967040  ;;  %vm151_vm0 = vcmask 261120   ;;  %v147_v0 = vld [vmem:[#allocation2] sm:$0xff]  ;;  %v148_v1 = vld [vmem:[#allocation2 + $0x8] sm:$0xff]  ;;  %s5410_s0 = sld [smem:[#allocation23_spill]]  ;;  %v264_v42 = vlaneseq }
  0x56   :  { %v152_v2 = vsel %vm151_vm0, %v147_v0, 0.0  ;;  %v155_v3 = vsel %vm151_vm0, %v148_v1, 0.0  ;;  %v4681_v15 = vmov 0.0   ;;  %vm4682_vm1 = vmmov 0   ;;  %s5411_s4 = sld [smem:[#allocation21_spill]]  ;;  %s4683_s2 = smov 96  }
  0x57   :  { %153 = vadd.xlane.f32.xlu0 %v152_v2  ;;  %4097 = vmatprep.subr.bf16.mxu0 %v4681_v15  ;;  %v3873_v29 = vld [vmem:[#allocation5] ss:$0 sm:$0xff]  ;;  %v3874_v34 = vld [vmem:[%s5381_s5] ss:$0 sm:$0xff]  ;;  %s4684_s25 = smov 88   ;;  %s4685_s3 = smov 80  }
  0x58   :  { %4101 = vmatprep.mubr.msk.bf16.mxu0 %vm4682_vm1, %v4681_v15  ;;  %4105 = vmatprep.subr.mxu1 %v4681_v15  ;;  %s4686_s26 = smov 72   ;;  %s4687_s28 = smov 120   ;;  %vm271_vm2 = vcmask 64512   ;;  %v4889_v43 = vshrl.u32 %v264_v42, 7  ;;  %vm941_vm3 = vcmask 130048   ;;  %vm943_vm4 = vcmask 195584  }
  0x59   :  { %4107 = vmatprep.mubr.msk.f32.mxu1 %vm4682_vm1, %v4681_v15  ;;  %s4688_s29 = smov 112   ;;  %s4689_s11 = smov 104   ;;  %vm1863_vm5 = vcmask 523264   ;;  %vm3715_vm6 = vcmask 1040384   ;;  %vm3852_vm7 = vcmask 25600  }
  0x5a   :  { %v266_v44 = vsub.s32 0, %v4889_v43  ;;  %s5412_s27 = sld [smem:[#allocation20_spill]]  ;;  %s4690_s21 = smov 56  }
  0x5b   :  { %156 = vadd.xlane.f32.xlu0 %v155_v3  ;;  %v4401_v14 = vld [vmem:[%s5410_s0 + $0x8] sm:$0xff]   ;;  %v4402_v16 = vld [vmem:[%s5410_s0] sm:$0xff]   ;;  %s5401_s1 = smov 40  }
  0x5c   :  { %4098 = vmatpush3.bf16.msra.mxu0 %v4401_v14  ;;  %v3872_v25 = vld [vmem:[%s5411_s4] ss:$0 sm:$0xff]  ;;  %s4692_s4 = smov 48  }
  0x5d   :  { %4099 = vmatprep.subr.bf16.mxu0 %v4681_v15 }
  0x60   :  { %4100 = vmatpush3.bf16.msra.mxu0 %v4402_v16  ;;  %v4895_v45 = vld [vmem:[%s5412_s27] sm:$0x3]  ;;  %s5398_s27 = smov 24  }
  0x61   :  { %4120 = vmatprep.subr.mxu0 %v4681_v15  ;;  %v4898_v46 = vrot.slane %v4895_v45, %v266_v44 }
  0xe0   :  { %v154_v4 = vpop.xlane.xlu0 %153 }
  0xe1   :  { %v159_v5 = vmul.f32 0.03125, %v154_v4 }
  0xe3   :  { %v161_v6 = vsub.f32 %v147_v0, %v159_v5 }
  0xe4   :  { %v157_v7 = vpop.xlane.xlu0 %156 }
  0xe5   :  { %v160_v8 = vmul.f32 0.03125, %v157_v7  ;;  %v163_v9 = vmul.f32 %v161_v6, %v161_v6 }
  0xe7   :  { %v162_v10 = vsub.f32 %v148_v1, %v160_v8  ;;  %v165_v11 = vsel %vm151_vm0, %v163_v9, 0.0 }
  0xe8   :  { %166 = vadd.xlane.f32.xlu1 %v165_v11 }
  0xe9   :  { %v164_v12 = vmul.f32 %v162_v10, %v162_v10 }
  0xeb   :  { %v168_v13 = vsel %vm151_vm0, %v164_v12, 0.0 }
  0xec   :  { %169 = vadd.xlane.f32.xlu1 %v168_v13 }
 0x171   :  { %v167_v17 = vpop.xlane.xlu1 %166 }
 0x172   :  { %v171_v18 = vmul.f32 0.03125, %v167_v17 }
 0x174   :  { %v173_v19 = vadd.f32 1e-12, %v171_v18  ;;  %v947_v18 = vsub.s32 1, %v4889_v43 }
 0x175   :  { %v170_v20 = vpop.xlane.xlu1 %169 }
 0x176   :  { %4425 = vrsqrt.f32 %v173_v19  ;;  %v172_v21 = vmul.f32 0.03125, %v170_v20 }
 0x178   :  { %v174_v22 = vadd.f32 1e-12, %v172_v21 }
 0x17a   :  { %4427 = vrsqrt.f32 %v174_v22 }
 0x183   :  { %v4426_v23 = vpop.eup %4425 }
 0x184   :  { %v177_v24 = vmul.f32 %v4426_v23, %v161_v6  ;;  %v4966_v23 = vrot.slane %v4895_v45, %v947_v18 }
 0x186   :  { %v185_v28 = vmul.f32 %v3872_v25, %v177_v24 }
 0x187   :  { %v4428_v26 = vpop.eup %4427 }
 0x188   :  { %v178_v27 = vmul.f32 %v4428_v26, %v162_v10  ;;  %v4851_v31 = vadd.f32 %v3873_v29, %v185_v28 }
 0x18a   :  { %v186_v30 = vmul.f32 %v3872_v25, %v178_v27 }
 0x18c   :  { %v4853_v32 = vadd.f32 %v3873_v29, %v186_v30 }
 0x18e   :  { %v201_v33 = vpack.c.bf16 %v4853_v32, %v4851_v31 }
 0x190   :  { %4102 = vmatmul.mubr.msk.bf16.vlgmr.msra.gmra.mxu0 %vm151_vm0, %v201_v33 }
 0x191   :  { %4122 = vmatprep.mubr.msk.f32.mxu0 %vm4682_vm1, %v4681_v15 }
 0x250   :  { %v257_v35 = vpop.f32.mrf.mxu0 }
 0x251   :  { %v4863_v36 = vadd.f32 %v3874_v34, %v257_v35 }
 0x252   :  { %v4103_v37 = vpop.f32.mrf.mxu0 }
 0x253   :  { %269 = vrot.lane.b32.xlu0 %v4863_v36, %s4683_s2 }
 0x254   :  { %v260_v38 = vpop.f32.mrf.mxu0 }
 0x255   :  { %v4873_v40 = vadd.f32 %v3874_v34, %v260_v38 }
 0x256   :  { %v4104_v39 = vpop.f32.mrf.mxu0 }
 0x257   :  { %435 = vrot.lane.b32.xlu0 %v4863_v36, %s4684_s25 }
 0x25b   :  { %600 = vrot.lane.b32.xlu0 %v4863_v36, %s4685_s3 }
 0x25f   :  { %765 = vrot.lane.b32.xlu0 %v4863_v36, %s4686_s26 }
 0x263   :  { %950 = vrot.lane.b32.xlu0 %v4873_v40, %s4683_s2 }
 0x267   :  { %1113 = vrot.lane.b32.xlu0 %v4873_v40, %s4687_s28 }
 0x26b   :  { %1278 = vrot.lane.b32.xlu0 %v4873_v40, %s4688_s29 }
 0x26f   :  { %1443 = vrot.lane.b32.xlu0 %v4873_v40, %s4689_s11 }
 0x2c5   :  { %v270_v41 = vpop.permute.xlu0 %269 }
 0x2c6   :  { %4106 = vmatpush3.xpose.msk.msra.mxu1 %vm271_vm2, %v270_v41 }
 0x2c7   :  { %4110 = vmatprep.subr.mxu1 %v4681_v15 }
 0x2c9   :  { %4108 = vmatmul.mubr.msk.f32.vlgmr.msra.gmra.mxu1 %vm271_vm2, %v4863_v36  ;;  %v436_v59 = vpop.permute.xlu0 %435 }
 0x2ca   :  { %4112 = vmatprep.mubr.msk.f32.mxu1 %vm4682_vm1, %v4681_v15 }
 0x2cd   :  { %v601_v61 = vpop.permute.xlu0 %600 }
 0x2d1   :  { %v766_v0 = vpop.permute.xlu0 %765 }
 0x2d5   :  { %v951_v2 = vpop.permute.xlu0 %950 }
 0x2d9   :  { %v1114_v4 = vpop.permute.xlu0 %1113 }
 0x2dd   :  { %v1279_v6 = vpop.permute.xlu0 %1278 }
 0x2e1   :  { %v1444_v8 = vpop.permute.xlu0 %1443 }
 0x389   :  { %v342_v47 = vpop.f32.mrf.mxu1 }
 0x38a   :  { %v343_v48 = vadd.f32 %v342_v47, %v4898_v46 }
 0x38b   :  { %v4109_v49 = vpop.f32.mrf.mxu1 }
 0x38c   :  { %v346_v50 = vsel %vm271_vm2, %v343_v48, -inf }
 0x38d   :  { %347 = vmax.xlane.f32.xlu1 %v346_v50 }
 0x39e   :  { %357 = vrot.lane.b32.xlu1 %v4863_v36, %s4679_s8 }
 0x3a2   :  { %433 = vrot.lane.b32.xlu1 %v4863_v36, %s4687_s28 }
 0x416   :  { %v348_v51 = vpop.xlane.xlu1 %347 }
 0x417   :  { %v349_v52 = vsub.f32 %v343_v48, %v348_v51 }
 0x419   :  { %v350_v53 = vmul.f32 1.442695, %v349_v52 }
 0x41a   :  { %v358_v54 = vpop.permute.xlu1 %357 }
 0x41b   :  { %4429 = vpow2.f32 %v350_v53  ;;  %4111 = vmatpush3.msra.mxu1 %v358_v54 }
 0x41c   :  { %4115 = vmatprep.subr.mxu1 %v4681_v15 }
 0x41e   :  { %v434_v57 = vpop.permute.xlu1 %433 }
 0x428   :  { %v4430_v55 = vpop.eup %4429 }
 0x429   :  { %v352_v56 = vsel %vm271_vm2, %v4430_v55, 0.0 }
 0x42a   :  { %353 = vadd.xlane.f32.xlu1 %v352_v56 }
 0x43b   :  { %598 = vrot.lane.b32.xlu1 %v4863_v36, %s4688_s29 }
 0x43f   :  { %763 = vrot.lane.b32.xlu1 %v4863_v36, %s4689_s11 }
 0x443   :  { %1115 = vrot.lane.b32.xlu1 %v4873_v40, %s4684_s25 }
 0x447   :  { %1280 = vrot.lane.b32.xlu1 %v4873_v40, %s4685_s3 }
 0x44b   :  { %1445 = vrot.lane.b32.xlu1 %v4873_v40, %s4686_s26 }
 0x4b3   :  { %v354_v58 = vpop.xlane.xlu1 %353 }
 0x4b4   :  { %4431 = vrcp.f32 %v354_v58 }
 0x4b7   :  { %v599_v63 = vpop.permute.xlu1 %598 }
 0x4bb   :  { %v764_v1 = vpop.permute.xlu1 %763 }
 0x4bf   :  { %v1116_v3 = vpop.permute.xlu1 %1115 }
 0x4c1   :  { %v4432_v60 = vpop.eup %4431 }
 0x4c2   :  { %v356_v62 = vmul.f32 %v4432_v60, %v4430_v55 }
 0x4c3   :  { %v1281_v5 = vpop.permute.xlu1 %1280 }
 0x4c4   :  { %4113 = vmatmul.mubr.msk.f32.vlgmr.msra.gmra.mxu1 %vm271_vm2, %v356_v62 }
 0x4c5   :  { %4116 = vmatpush3.xpose.msk.msra.mxu1 %vm271_vm2, %v436_v59  ;;  %4117 = vmatprep.mubr.msk.f32.mxu1 %vm4682_vm1, %v4681_v15 }
 0x4c6   :  { %4125 = vmatprep.subr.mxu1 %v4681_v15 }
 0x4c7   :  { %v1446_v7 = vpop.permute.xlu1 %1445 }
 0x4c8   :  { %4118 = vmatmul.mubr.msk.f32.vlgmr.msra.gmra.mxu1 %vm271_vm2, %v434_v57 }
 0x4c9   :  { %4126 = vmatpush3.xpose.msk.msra.mxu1 %vm271_vm2, %v601_v61  ;;  %4127 = vmatprep.mubr.msk.f32.mxu1 %vm4682_vm1, %v4681_v15 }
 0x4ca   :  { %4135 = vmatprep.subr.mxu1 %v4681_v15 }
 0x4cc   :  { %4128 = vmatmul.mubr.msk.f32.vlgmr.msra.gmra.mxu1 %vm271_vm2, %v599_v63 }
 0x4cd   :  { %4136 = vmatpush3.xpose.msk.msra.mxu1 %vm271_vm2, %v766_v0  ;;  %4137 = vmatprep.mubr.msk.f32.mxu1 %vm4682_vm1, %v4681_v15 }
 0x4ce   :  { %4145 = vmatprep.subr.mxu1 %v4681_v15 }
 0x4d0   :  { %4138 = vmatmul.mubr.msk.f32.vlgmr.msra.gmra.mxu1 %vm271_vm2, %v764_v1 }
 0x4d1   :  { %4146 = vmatpush3.xpose.msk.msra.mxu1 %vm271_vm2, %v951_v2  ;;  %4147 = vmatprep.mubr.msk.f32.mxu1 %vm4682_vm1, %v4681_v15 }
 0x4d2   :  { %4155 = vmatprep.subr.mxu1 %v4681_v15 }
 0x4d4   :  { %4148 = vmatmul.mubr.msk.f32.vlgmr.msra.gmra.mxu1 %vm271_vm2, %v4873_v40 }
 0x4d5   :  { %4156 = vmatpush3.xpose.msk.msra.mxu1 %vm271_vm2, %v1116_v3  ;;  %4157 = vmatprep.mubr.msk.f32.mxu1 %vm4682_vm1, %v4681_v15 }
 0x4d6   :  { %4165 = vmatprep.subr.mxu1 %v4681_v15 }
 0x4d8   :  { %4158 = vmatmul.mubr.msk.f32.vlgmr.msra.gmra.mxu1 %vm271_vm2, %v1114_v4 }
 0x4d9   :  { %4166 = vmatpush3.xpose.msk.msra.mxu1 %vm271_vm2, %v1281_v5  ;;  %4167 = vmatprep.mubr.msk.f32.mxu1 %vm4682_vm1, %v4681_v15 }
 0x4da   :  { %4175 = vmatprep.subr.mxu1 %v4681_v15 }
 0x4dc   :  { %4168 = vmatmul.mubr.msk.f32.vlgmr.msra.gmra.mxu1 %vm271_vm2, %v1279_v6 }
 0x4dd   :  { %4176 = vmatpush3.xpose.msk.msra.mxu1 %vm271_vm2, %v1446_v7  ;;  %4177 = vmatprep.mubr.msk.f32.mxu1 %vm4682_vm1, %v4681_v15 }
 0x4de   :  { %4185 = vmatprep.subr.bf16.mxu1 %v4681_v15 }
 0x4e0   :  { %4178 = vmatmul.mubr.msk.f32.vlgmr.msra.gmra.mxu1 %vm271_vm2, %v1444_v8 }
 0x4e1   :  { %4189 = vmatprep.mubr.msk.bf16.mxu1 %vm4682_vm1, %v4681_v15 }
 0x584   :  { %v4957_v9 = vpop.f32.mrf.mxu1 }
 0x586   :  { %v4114_v10 = vpop.f32.mrf.mxu1 }
 0x588   :  { %v507_v11 = vpop.f32.mrf.mxu1 }
 0x589   :  { %v508_v12 = vadd.f32 %v507_v11, %v4898_v46 }
 0x58a   :  { %v4119_v13 = vpop.f32.mrf.mxu1 }
 0x58b   :  { %v511_v14 = vsel %vm271_vm2, %v508_v12, -inf }
 0x58c   :  { %v672_v16 = vpop.f32.mrf.mxu1  ;;  %512 = vmax.xlane.f32.xlu1 %v511_v14 }
 0x58d   :  { %v673_v17 = vadd.f32 %v672_v16, %v4898_v46 }
 0x58e   :  { %v4129_v19 = vpop.f32.mrf.mxu1 }
 0x58f   :  { %v676_v20 = vsel %vm271_vm2, %v673_v17, -inf }
 0x590   :  { %v837_v21 = vpop.f32.mrf.mxu1  ;;  %677 = vmax.xlane.f32.xlu0 %v676_v20 }
 0x591   :  { %v838_v22 = vadd.f32 %v837_v21, %v4898_v46 }
 0x592   :  { %v4139_v24 = vpop.f32.mrf.mxu1 }
 0x593   :  { %v841_v25 = vsel %vm271_vm2, %v838_v22, -inf }
 0x594   :  { %842 = vmax.xlane.f32.xlu0 %v841_v25  ;;  %v1022_v26 = vpop.f32.mrf.mxu1 }
 0x595   :  { %v1023_v27 = vadd.f32 %v1022_v26, %v4966_v23 }
 0x596   :  { %v4149_v28 = vpop.f32.mrf.mxu1 }
 0x597   :  { %v1026_v29 = vsel %vm271_vm2, %v1023_v27, -inf }
 0x598   :  { %1027 = vmax.xlane.f32.xlu0 %v1026_v29  ;;  %v1187_v30 = vpop.f32.mrf.mxu1 }
 0x599   :  { %v1188_v33 = vadd.f32 %v1187_v30, %v4966_v23 }
 0x59a   :  { %v4159_v34 = vpop.f32.mrf.mxu1 }
 0x59b   :  { %v1191_v35 = vsel %vm271_vm2, %v1188_v33, -inf }
 0x59c   :  { %1192 = vmax.xlane.f32.xlu1 %v1191_v35  ;;  %v1352_v37 = vpop.f32.mrf.mxu1 }
 0x59d   :  { %v1353_v38 = vadd.f32 %v1352_v37, %v4966_v23 }
 0x59e   :  { %v4169_v39 = vpop.f32.mrf.mxu1 }
 0x59f   :  { %v1356_v41 = vsel %vm271_vm2, %v1353_v38, -inf }
 0x5a0   :  { %1357 = vmax.xlane.f32.xlu0 %v1356_v41  ;;  %v1517_v42 = vpop.f32.mrf.mxu1 }
 0x5a1   :  { %v1518_v44 = vadd.f32 %v1517_v42, %v4966_v23 }
 0x5a2   :  { %v4179_v43 = vpop.f32.mrf.mxu1 }
 0x5a3   :  { %v1521_v45 = vsel %vm271_vm2, %v1518_v44, -inf }
 0x5ad   :  { %522 = vrot.lane.b32.xlu1 %v4863_v36, %s4690_s21 }
 0x5d1   :  { %1522 = vmax.xlane.f32.xlu1 %v1521_v45 }
 0x5e2   :  { %852 = vrot.lane.b32.xlu1 %v4863_v36, %s5401_s1 }
 0x5e6   :  { %1037 = vrot.lane.b32.xlu1 %v4873_v40, %s4679_s8 }
 0x615   :  { %v513_v47 = vpop.xlane.xlu1 %512 }
 0x616   :  { %v514_v48 = vsub.f32 %v508_v12, %v513_v47 }
 0x618   :  { %v515_v49 = vmul.f32 1.442695, %v514_v48 }
 0x619   :  { %v678_v50 = vpop.xlane.xlu0 %677 }
 0x61a   :  { %4433 = vpow2.f32 %v515_v49  ;;  %v679_v51 = vsub.f32 %v673_v17, %v678_v50 }
 0x61c   :  { %v680_v52 = vmul.f32 1.442695, %v679_v51 }
 0x61d   :  { %v843_v59 = vpop.xlane.xlu0 %842 }
 0x61e   :  { %4435 = vpow2.f32 %v680_v52  ;;  %v844_v60 = vsub.f32 %v838_v22, %v843_v59 }
 0x620   :  { %v845_v63 = vmul.f32 1.442695, %v844_v60 }
 0x621   :  { %v1028_v61 = vpop.xlane.xlu0 %1027 }
 0x622   :  { %v1029_v62 = vsub.f32 %v1023_v27, %v1028_v61  ;;  %4437 = vpow2.f32 %v845_v63  ;;  %v4404_v61 = vld [vmem:[%s5382_s6] sm:$0xff]  }
 0x624   :  { %v1030_v2 = vmul.f32 1.442695, %v1029_v62 }
 0x625   :  { %v1193_v53 = vpop.xlane.xlu1 %1192 }
 0x626   :  { %v1194_v0 = vsub.f32 %v1188_v33, %v1193_v53  ;;  %4439 = vpow2.f32 %v1030_v2 }
 0x627   :  { %v4434_v54 = vpop.eup %4433 }
 0x628   :  { %v517_v55 = vsel %vm271_vm2, %v4434_v54, 0.0  ;;  %v1195_v3 = vmul.f32 1.442695, %v1194_v0 }
 0x629   :  { %v523_v56 = vpop.permute.xlu1 %522  ;;  %518 = vadd.xlane.f32.xlu0 %v517_v55  ;;  %v1358_v1 = vpop.xlane.xlu0 %1357 }
 0x62a   :  { %4121 = vmatpush3.msra.mxu0 %v523_v56  ;;  %v1359_v4 = vsub.f32 %v1353_v38, %v1358_v1  ;;  %4441 = vpow2.f32 %v1195_v3 }
 0x62b   :  { %v4436_v57 = vpop.eup %4435  ;;  %4130 = vmatprep.subr.mxu0 %v4681_v15 }
 0x62c   :  { %v682_v58 = vsel %vm271_vm2, %v4436_v57, 0.0  ;;  %v1360_v5 = vmul.f32 1.442695, %v1359_v4 }
 0x62d   :  { %683 = vadd.xlane.f32.xlu1 %v682_v58  ;;  %v4403_v58 = vld [vmem:[%s5382_s6 + $0x8] sm:$0xff]  }
 0x62e   :  { %4443 = vpow2.f32 %v1360_v5  ;;  %4186 = vmatpush3.bf16.msra.mxu1 %v4403_v58 }
 0x62f   :  { %v4438_v6 = vpop.eup %4437  ;;  %4187 = vmatprep.subr.bf16.mxu1 %v4681_v15 }
 0x632   :  { %4188 = vmatpush3.bf16.msra.mxu1 %v4404_v61  ;;  %v3907_v61 = vld [vmem:[#allocation8] ss:$0 sm:$0xff] }
 0x633   :  { %v4440_v10 = vpop.eup %4439  ;;  %4201 = vmatprep.subr.bf16.mxu1 %v4681_v15 }
 0x634   :  { %v1032_v14 = vsel %vm271_vm2, %v4440_v10, 0.0 }
 0x637   :  { %v4442_v12 = vpop.eup %4441 }
 0x638   :  { %v1197_v13 = vsel %vm271_vm2, %v4442_v12, 0.0 }
 0x63b   :  { %v4444_v16 = vpop.eup %4443 }
 0x63c   :  { %v1362_v17 = vsel %vm271_vm2, %v4444_v16, 0.0 }
 0x63e   :  { %1202 = vrot.lane.b32.xlu1 %v4873_v40, %s4690_s21 }
 0x63f   :  { %687 = vrot.lane.b32.xlu0 %v4863_v36, %s4692_s4  ;;  %v847_v36 = vsel %vm271_vm2, %v4438_v6, 0.0 }
 0x65a   :  { %v1523_v7 = vpop.xlane.xlu1 %1522 }
 0x65b   :  { %v1524_v8 = vsub.f32 %v1518_v44, %v1523_v7 }
 0x65d   :  { %v1525_v11 = vmul.f32 1.442695, %v1524_v8 }
 0x65e   :  { %848 = vadd.xlane.f32.xlu0 %v847_v36  ;;  %v853_v20 = vpop.permute.xlu1 %852 }
 0x65f   :  { %4445 = vpow2.f32 %v1525_v11 }
 0x662   :  { %1198 = vadd.xlane.f32.xlu0 %v1197_v13  ;;  %1033 = vadd.xlane.f32.xlu1 %v1032_v14  ;;  %v1038_v21 = vpop.permute.xlu1 %1037 }
 0x666   :  { %1363 = vadd.xlane.f32.xlu1 %v1362_v17 }
 0x66c   :  { %v4446_v18 = vpop.eup %4445 }
 0x66d   :  { %v1527_v19 = vsel %vm271_vm2, %v4446_v18, 0.0 }
 0x66e   :  { %1528 = vadd.xlane.f32.xlu0 %v1527_v19 }
 0x677   :  { %1532 = vrot.lane.b32.xlu1 %v4873_v40, %s5401_s1 }
 0x684   :  { %1367 = vrot.lane.b32.xlu0 %v4873_v40, %s4692_s4 }
 0x6b2   :  { %v519_v22 = vpop.xlane.xlu0 %518 }
 0x6b3   :  { %4447 = vrcp.f32 %v519_v22 }
 0x6b6   :  { %v684_v24 = vpop.xlane.xlu1 %683  ;;  %v688_v27 = vpop.permute.xlu0 %687 }
 0x6b7   :  { %4449 = vrcp.f32 %v684_v24 }
 0x6ba   :  { %v1203_v40 = vpop.permute.xlu1 %1202 }
 0x6c0   :  { %v4448_v25 = vpop.eup %4447 }
 0x6c1   :  { %v521_v26 = vmul.f32 %v4448_v25, %v4434_v54 }
 0x6c3   :  { %4123 = vmatmul.mubr.msk.f32.vlgmr.msra.gmra.mxu0 %vm271_vm2, %v521_v26 }
 0x6c4   :  { %v4450_v28 = vpop.eup %4449  ;;  %4131 = vmatpush3.msra.mxu0 %v688_v27  ;;  %4132 = vmatprep.mubr.msk.f32.mxu0 %vm4682_vm1, %v4681_v15 }
 0x6c5   :  { %4140 = vmatprep.subr.mxu0 %v4681_v15  ;;  %v686_v29 = vmul.f32 %v4450_v28, %v4436_v57 }
 0x6c7   :  { %4133 = vmatmul.mubr.msk.f32.vlgmr.msra.gmra.mxu0 %vm271_vm2, %v686_v29 }
 0x6c8   :  { %4141 = vmatpush3.msra.mxu0 %v853_v20  ;;  %4142 = vmatprep.mubr.msk.f32.mxu0 %vm4682_vm1, %v4681_v15 }
 0x6c9   :  { %4150 = vmatprep.subr.mxu0 %v4681_v15 }
 0x6e7   :  { %v849_v30 = vpop.xlane.xlu0 %848 }
 0x6e8   :  { %4451 = vrcp.f32 %v849_v30 }
 0x6eb   :  { %v1034_v33 = vpop.xlane.xlu1 %1033  ;;  %v1199_v34 = vpop.xlane.xlu0 %1198 }
 0x6ec   :  { %4453 = vrcp.f32 %v1034_v33 }
 0x6ed   :  { %4455 = vrcp.f32 %v1199_v34 }
 0x6ef   :  { %v1364_v35 = vpop.xlane.xlu1 %1363 }
 0x6f0   :  { %4457 = vrcp.f32 %v1364_v35 }
 0x6f3   :  { %v1533_v49 = vpop.permute.xlu1 %1532 }
 0x6f5   :  { %v4452_v37 = vpop.eup %4451 }
 0x6f6   :  { %v851_v38 = vmul.f32 %v4452_v37, %v4438_v6 }
 0x6f7   :  { %v1529_v39 = vpop.xlane.xlu0 %1528 }
 0x6f8   :  { %4459 = vrcp.f32 %v1529_v39  ;;  %4143 = vmatmul.mubr.msk.f32.vlgmr.msra.gmra.mxu0 %vm271_vm2, %v851_v38 }
 0x6f9   :  { %v4454_v41 = vpop.eup %4453  ;;  %4151 = vmatpush3.msra.mxu0 %v1038_v21  ;;  %4152 = vmatprep.mubr.msk.f32.mxu0 %vm4682_vm1, %v4681_v15 }
 0x6fa   :  { %4160 = vmatprep.subr.mxu0 %v4681_v15  ;;  %v1036_v42 = vmul.f32 %v4454_v41, %v4440_v10  ;;  %v4456_v43 = vpop.eup %4455 }
 0x6fb   :  { %v1201_v44 = vmul.f32 %v4456_v43, %v4442_v12  ;;  %v1368_v47 = vpop.permute.xlu0 %1367 }
 0x6fc   :  { %4153 = vmatmul.mubr.msk.f32.vlgmr.msra.gmra.mxu0 %vm271_vm2, %v1036_v42 }
 0x6fd   :  { %4161 = vmatpush3.msra.mxu0 %v1203_v40  ;;  %4162 = vmatprep.mubr.msk.f32.mxu0 %vm4682_vm1, %v4681_v15  ;;  %v4458_v45 = vpop.eup %4457 }
 0x6fe   :  { %4170 = vmatprep.subr.mxu0 %v4681_v15  ;;  %v1366_v48 = vmul.f32 %v4458_v45, %v4444_v16 }
 0x700   :  { %4163 = vmatmul.mubr.msk.f32.vlgmr.msra.gmra.mxu0 %vm271_vm2, %v1201_v44 }
 0x701   :  { %4171 = vmatpush3.msra.mxu0 %v1368_v47  ;;  %4172 = vmatprep.mubr.msk.f32.mxu0 %vm4682_vm1, %v4681_v15 }
 0x702   :  { %4180 = vmatprep.subr.mxu0 %v4681_v15 }
 0x704   :  { %4173 = vmatmul.mubr.msk.f32.vlgmr.msra.gmra.mxu0 %vm271_vm2, %v1366_v48  ;;  %v4406_v48 = vld [vmem:[%s5386_s10] sm:$0xff]  }
 0x705   :  { %v4460_v50 = vpop.eup %4459  ;;  %4181 = vmatpush3.msra.mxu0 %v1533_v49  ;;  %4182 = vmatprep.mubr.msk.f32.mxu0 %vm4682_vm1, %v4681_v15 }
 0x706   :  { %v1531_v51 = vmul.f32 %v4460_v50, %v4446_v18  ;;  %4193 = vmatprep.subr.bf16.mxu0 %v4681_v15 }
 0x708   :  { %4183 = vmatmul.mubr.msk.f32.vlgmr.msra.gmra.mxu0 %vm271_vm2, %v1531_v51 }
 0x709   :  { %4197 = vmatprep.mubr.msk.bf16.mxu0 %vm4682_vm1, %v4681_v15 }
 0x783   :  { %v594_v52 = vpop.f32.mrf.mxu0 }
 0x785   :  { %v4124_v53 = vpop.f32.mrf.mxu0 }
 0x787   :  { %v759_v54 = vpop.f32.mrf.mxu0 }
 0x789   :  { %v4134_v55 = vpop.f32.mrf.mxu0 }
 0x7b8   :  { %v924_v56 = vpop.f32.mrf.mxu0 }
 0x7ba   :  { %v4144_v57 = vpop.f32.mrf.mxu0 }
 0x7bb   :  { %v3906_v57 = vld [vmem:[#allocation7] ss:$0 sm:$0xff] }
 0x7bc   :  { %v1109_v59 = vpop.f32.mrf.mxu0 }
 0x7be   :  { %v4154_v60 = vpop.f32.mrf.mxu0 }
 0x7c0   :  { %v1274_v62 = vpop.f32.mrf.mxu0 }
 0x7c1   :  { %v4371_v63 = vpack.i.bf16 %v1274_v62, %v594_v52 }
 0x7c2   :  { %v4164_v0 = vpop.f32.mrf.mxu0 }
 0x7c3   :  { %4372 = vrot.lane.b32.xlu0 %v4371_v63, %s5400_s24 }
 0x7c4   :  { %v1439_v1 = vpop.f32.mrf.mxu0 }
 0x7c5   :  { %v4376_v2 = vpack.i.bf16 %v1439_v1, %v759_v54 }
 0x7c6   :  { %v4174_v3 = vpop.f32.mrf.mxu0 }
 0x7c7   :  { %4377 = vrot.lane.b32.xlu1 %v4376_v2, %s5399_s30  ;;  %v4407_v2 = vld [vmem:[%s5388_s12 + $0x18] sm:$0xff]   ;;  %v4408_v3 = vld [vmem:[%s5388_s12 + $0x10] sm:$0xff]  }
 0x7c8   :  { %v1604_v4 = vpop.f32.mrf.mxu0 }
 0x7c9   :  { %v4381_v5 = vpack.i.bf16 %v1604_v4, %v924_v56  ;;  %v4409_v4 = vld [vmem:[%s5388_s12 + $0x8] sm:$0xff]  }
 0x7ca   :  { %v4184_v6 = vpop.f32.mrf.mxu0 }
 0x7cb   :  { %4382 = vrot.lane.b32.xlu0 %v4381_v5, %s5398_s27  ;;  %v4410_v5 = vld [vmem:[%s5388_s12] sm:$0xff]   ;;  %v3908_v6 = vld [vmem:[#allocation10] ss:$0 sm:$0xff] }
 0x835   :  { %v4373_v7 = vpop.permute.xlu0 %4372 }
 0x836   :  { %v4375_v10 = vunpack.i.h.bf16 %v4373_v7  ;;  %v4374_v11 = vunpack.i.l.bf16 %v4373_v7 }
 0x838   :  { %v1620_v14 = vsel %vm271_vm2, %v1109_v59, %v4375_v10  ;;  %v940_v16 = vsel %vm271_vm2, %v4957_v9, %v4374_v11  ;;  %v3902_v9 = vld [vmem:[%s5383_s7] ss:$0 sm:$0xff] }
 0x839   :  { %v4378_v8 = vpop.permute.xlu1 %4377 }
 0x83a   :  { %v4380_v36 = vunpack.i.h.bf16 %v4378_v8  ;;  %v4379_v12 = vunpack.i.l.bf16 %v4378_v8 }
 0x83c   :  { %v1621_v19 = vsel %vm941_vm3, %v1620_v14, %v4380_v36  ;;  %v942_v20 = vsel %vm941_vm3, %v940_v16, %v4379_v12 }
 0x83d   :  { %v4383_v13 = vpop.permute.xlu0 %4382 }
 0x83e   :  { %v4385_v17 = vunpack.i.h.bf16 %v4383_v13  ;;  %v4384_v18 = vunpack.i.l.bf16 %v4383_v13 }
 0x840   :  { %v1622_v21 = vsel %vm943_vm4, %v1621_v19, %v4385_v17  ;;  %v944_v22 = vsel %vm943_vm4, %v942_v20, %v4384_v18 }
 0x841   :  { %v1628_v24 = vpack.c.bf16 %v1622_v21, %v944_v22 }
 0x843   :  { %4190 = vmatmul.mubr.msk.bf16.vlgmr.msra.gmra.mxu1 %vm151_vm0, %v1628_v24 }
 0x844   :  { %4209 = vmatprep.mubr.msk.bf16.mxu1 %vm4682_vm1, %v4681_v15  ;;  %4202 = vmatpush3.bf16.msra.mxu1 %v4407_v2  ;;  %v3918_v2 = vld [vmem:[%s5390_s14] ss:$0 sm:$0xff] }
 0x845   :  { %4203 = vmatprep.subr.bf16.mxu1 %v4681_v15 }
 0x848   :  { %4204 = vmatpush3.bf16.msra.mxu1 %v4408_v3 }
 0x849   :  { %4205 = vmatprep.subr.bf16.mxu1 %v4681_v15 }
 0x84c   :  { %4206 = vmatpush3.bf16.msra.mxu1 %v4409_v4 }
 0x84d   :  { %4207 = vmatprep.subr.bf16.mxu1 %v4681_v15 }
 0x850   :  { %4208 = vmatpush3.bf16.msra.mxu1 %v4410_v5 }
 0x851   :  { %4231 = vmatprep.subr.mxu1 %v4681_v15 }
 0x903   :  { %v1684_v25 = vpop.f32.mrf.mxu1 }
 0x904   :  { %v1685_v26 = vadd.f32 %v3902_v9, %v1684_v25 }
 0x905   :  { %v4191_v27 = vpop.f32.mrf.mxu1 }
 0x906   :  { %v1691_v28 = vadd.f32 %v1685_v26, %v4851_v31 }
 0x907   :  { %v1687_v29 = vpop.f32.mrf.mxu1 }
 0x908   :  { %v1688_v40 = vadd.f32 %v3902_v9, %v1687_v29  ;;  %v1695_v30 = vsel %vm151_vm0, %v1691_v28, 0.0 }
 0x909   :  { %1696 = vadd.xlane.f32.xlu1 %v1695_v30  ;;  %v4192_v33 = vpop.f32.mrf.mxu1 }
 0x90a   :  { %v1692_v34 = vadd.f32 %v1688_v40, %v4853_v32  ;;  %v4405_v32 = vld [vmem:[%s5386_s10 + $0x8] sm:$0xff]  }
 0x90b   :  { %4194 = vmatpush3.bf16.msra.mxu0 %v4405_v32 }
 0x90c   :  { %v1698_v35 = vsel %vm151_vm0, %v1692_v34, 0.0  ;;  %4195 = vmatprep.subr.bf16.mxu0 %v4681_v15 }
 0x90d   :  { %1699 = vadd.xlane.f32.xlu0 %v1698_v35 }
 0x90f   :  { %4196 = vmatpush3.bf16.msra.mxu0 %v4406_v48 }
 0x910   :  { %4213 = vmatprep.subr.bf16.mxu0 %v4681_v15 }
 0x992   :  { %v1697_v37 = vpop.xlane.xlu1 %1696 }
 0x993   :  { %v1701_v38 = vmul.f32 0.03125, %v1697_v37 }
 0x995   :  { %v1703_v39 = vsub.f32 %v1691_v28, %v1701_v38 }
 0x996   :  { %v1700_v41 = vpop.xlane.xlu0 %1699 }
 0x997   :  { %v1702_v42 = vmul.f32 0.03125, %v1700_v41  ;;  %v1705_v43 = vmul.f32 %v1703_v39, %v1703_v39 }
 0x999   :  { %v1704_v44 = vsub.f32 %v1692_v34, %v1702_v42  ;;  %v1707_v31 = vsel %vm151_vm0, %v1705_v43, 0.0  ;;  %v3912_v34 = vld [vmem:[%s5389_s13] ss:$0 sm:$0xff] }
 0x99a   :  { %1708 = vadd.xlane.f32.xlu0 %v1707_v31 }
 0x99b   :  { %v1706_v45 = vmul.f32 %v1704_v44, %v1704_v44 }
 0x99d   :  { %v1710_v47 = vsel %vm151_vm0, %v1706_v45, 0.0 }
 0x99e   :  { %1711 = vadd.xlane.f32.xlu0 %v1710_v47 }
 0xa23   :  { %v1709_v49 = vpop.xlane.xlu0 %1708 }
 0xa24   :  { %v1713_v50 = vmul.f32 0.03125, %v1709_v49 }
 0xa26   :  { %v1715_v51 = vadd.f32 1e-12, %v1713_v50 }
 0xa27   :  { %v1712_v52 = vpop.xlane.xlu0 %1711 }
 0xa28   :  { %4461 = vrsqrt.f32 %v1715_v51  ;;  %v1714_v53 = vmul.f32 0.03125, %v1712_v52 }
 0xa2a   :  { %v1716_v54 = vadd.f32 1e-12, %v1714_v53 }
 0xa2c   :  { %4463 = vrsqrt.f32 %v1716_v54 }
 0xa35   :  { %v4462_v55 = vpop.eup %4461 }
 0xa36   :  { %v1719_v56 = vmul.f32 %v4462_v55, %v1703_v39 }
 0xa38   :  { %v1727_v60 = vmul.f32 %v3906_v57, %v1719_v56  ;;  %v4411_v56 = vld [vmem:[%s5410_s0 + $0x18] sm:$0xff]  }
 0xa39   :  { %v4464_v58 = vpop.eup %4463 }
 0xa3a   :  { %v1720_v59 = vmul.f32 %v4464_v58, %v1704_v44  ;;  %v1735_v63 = vadd.f32 %v3907_v61, %v1727_v60 }
 0xa3c   :  { %v1728_v62 = vmul.f32 %v3906_v57, %v1720_v59  ;;  %v4412_v57 = vld [vmem:[%s5410_s0 + $0x10] sm:$0xff]  }
 0xa3e   :  { %v1736_v0 = vadd.f32 %v3907_v61, %v1728_v62 }
 0xa40   :  { %v1742_v1 = vpack.c.bf16 %v1736_v0, %v1735_v63 }
 0xa42   :  { %4198 = vmatmul.mubr.msk.bf16.vlgmr.msra.gmra.mxu0 %vm151_vm0, %v1742_v1 }
 0xa43   :  { %4217 = vmatprep.mubr.msk.bf16.mxu0 %vm4682_vm1, %v4681_v15  ;;  %4214 = vmatpush3.bf16.msra.mxu0 %v4411_v56 }
 0xa44   :  { %4215 = vmatprep.subr.bf16.mxu0 %v4681_v15 }
 0xa47   :  { %4216 = vmatpush3.bf16.msra.mxu0 %v4412_v57 }
 0xa48   :  { %4221 = vmatprep.subr.mxu0 %v4681_v15 }
 0xb02   :  { %v1798_v7 = vpop.f32.mrf.mxu0 }
 0xb03   :  { %v1799_v8 = vadd.f32 %v3908_v6, %v1798_v7 }
 0xb04   :  { %v4199_v10 = vpop.f32.mrf.mxu0 }
 0xb05   :  { %v1807_v11 = vmul.f32 0.044715, %v1799_v8  ;;  %v1805_v27 = vmul.f32 0.5, %v1799_v8 }
 0xb06   :  { %v1801_v36 = vpop.f32.mrf.mxu0 }
 0xb07   :  { %v1809_v12 = vmul.f32 %v1807_v11, %v1799_v8  ;;  %v1802_v13 = vadd.f32 %v3908_v6, %v1801_v36  ;;  %v3919_v6 = vld [vmem:[%s5391_s15] ss:$0 sm:$0xff]  ;;  %v3925_v36 = vld [vmem:[%s5381_s5 + $0x1] ss:$0 sm:$0xff]  ;;  %s5413_s5 = smov 40  }
 0xb08   :  { %v4200_v14 = vpop.f32.mrf.mxu0 }
 0xb09   :  { %v1811_v16 = vmul.f32 %v1809_v12, %v1799_v8  ;;  %v1808_v17 = vmul.f32 0.044715, %v1802_v13  ;;  %v1806_v28 = vmul.f32 0.5, %v1802_v13 }
 0xb0b   :  { %v1813_v18 = vadd.f32 %v1811_v16, %v1799_v8  ;;  %v1810_v19 = vmul.f32 %v1808_v17, %v1802_v13 }
 0xb0d   :  { %v1815_v20 = vmul.f32 0.7978846, %v1813_v18  ;;  %v1812_v21 = vmul.f32 %v1810_v19, %v1802_v13 }
 0xb0f   :  { %4465 = vtanh.f32 %v1815_v20  ;;  %v1814_v22 = vadd.f32 %v1812_v21, %v1802_v13 }
 0xb11   :  { %v1816_v24 = vmul.f32 0.7978846, %v1814_v22 }
 0xb13   :  { %4467 = vtanh.f32 %v1816_v24 }
 0xb1c   :  { %v4466_v9 = vpop.eup %4465 }
 0xb1d   :  { %v1819_v25 = vadd.f32 1.0, %v4466_v9 }
 0xb1f   :  { %v1821_v40 = vmul.f32 %v1819_v25, %v1805_v27 }
 0xb20   :  { %v4468_v26 = vpop.eup %4467 }
 0xb21   :  { %v1820_v29 = vadd.f32 1.0, %v4468_v26 }
 0xb23   :  { %v1822_v30 = vmul.f32 %v1820_v29, %v1806_v28 }
 0xb25   :  { %v1832_v33 = vpack.c.bf16 %v1822_v30, %v1821_v40 }
 0xb27   :  { %4210 = vmatmul.mubr.msk.bf16.vlgmr.msra.gmra.mxu1 %vm1863_vm5, %v1832_v33 }
 0xb28   :  { %4233 = vmatprep.mubr.msk.f32.mxu1 %vm4682_vm1, %v4681_v15 }
 0xbe7   :  { %v1901_v35 = vpop.f32.mrf.mxu1 }
 0xbe8   :  { %v1902_v37 = vadd.f32 %v3912_v34, %v1901_v35 }
 0xbe9   :  { %v4211_v38 = vpop.f32.mrf.mxu1 }
 0xbea   :  { %v1908_v39 = vadd.f32 %v1902_v37, %v1735_v63 }
 0xbeb   :  { %v1904_v41 = vpop.f32.mrf.mxu1 }
 0xbec   :  { %v1905_v42 = vadd.f32 %v3912_v34, %v1904_v41  ;;  %v1912_v43 = vsel %vm151_vm0, %v1908_v39, 0.0 }
 0xbed   :  { %1913 = vadd.xlane.f32.xlu1 %v1912_v43  ;;  %v4212_v44 = vpop.f32.mrf.mxu1 }
 0xbee   :  { %v1909_v31 = vadd.f32 %v1905_v42, %v1736_v0 }
 0xbf0   :  { %v1915_v45 = vsel %vm151_vm0, %v1909_v31, 0.0 }
 0xbf1   :  { %1916 = vadd.xlane.f32.xlu0 %v1915_v45 }
 0xc76   :  { %v1914_v47 = vpop.xlane.xlu1 %1913 }
 0xc77   :  { %v1918_v32 = vmul.f32 0.03125, %v1914_v47 }
 0xc79   :  { %v1920_v48 = vsub.f32 %v1908_v39, %v1918_v32 }
 0xc7a   :  { %v1917_v49 = vpop.xlane.xlu0 %1916 }
 0xc7b   :  { %v1919_v50 = vmul.f32 0.03125, %v1917_v49  ;;  %v1922_v51 = vmul.f32 %v1920_v48, %v1920_v48 }
 0xc7d   :  { %v1921_v52 = vsub.f32 %v1909_v31, %v1919_v50  ;;  %v1924_v53 = vsel %vm151_vm0, %v1922_v51, 0.0 }
 0xc7e   :  { %1925 = vadd.xlane.f32.xlu1 %v1924_v53 }
 0xc7f   :  { %v1923_v54 = vmul.f32 %v1921_v52, %v1921_v52 }
 0xc81   :  { %v1927_v55 = vsel %vm151_vm0, %v1923_v54, 0.0 }
 0xc82   :  { %1928 = vadd.xlane.f32.xlu0 %v1927_v55 }
 0xd07   :  { %v1926_v58 = vpop.xlane.xlu1 %1925 }
 0xd08   :  { %v1930_v59 = vmul.f32 0.03125, %v1926_v58 }
 0xd0a   :  { %v1932_v60 = vadd.f32 1e-12, %v1930_v59 }
 0xd0b   :  { %v1929_v61 = vpop.xlane.xlu0 %1928 }
 0xd0c   :  { %4469 = vrsqrt.f32 %v1932_v60  ;;  %v1931_v62 = vmul.f32 0.03125, %v1929_v61 }
 0xd0e   :  { %v1933_v63 = vadd.f32 1e-12, %v1931_v62 }
 0xd10   :  { %4471 = vrsqrt.f32 %v1933_v63 }
 0xd19   :  { %v4470_v0 = vpop.eup %4469 }
 0xd1a   :  { %v1936_v1 = vmul.f32 %v4470_v0, %v1920_v48 }
 0xd1c   :  { %v1944_v5 = vmul.f32 %v3918_v2, %v1936_v1 }
 0xd1d   :  { %v4472_v3 = vpop.eup %4471 }
 0xd1e   :  { %v1937_v4 = vmul.f32 %v4472_v3, %v1921_v52  ;;  %v5107_v8 = vadd.f32 %v3919_v6, %v1944_v5 }
 0xd20   :  { %v1945_v7 = vmul.f32 %v3918_v2, %v1937_v4 }
 0xd22   :  { %v5109_v10 = vadd.f32 %v3919_v6, %v1945_v7 }
 0xd24   :  { %v1961_v11 = vpack.c.bf16 %v5109_v10, %v5107_v8 }
 0xd26   :  { %4218 = vmatmul.mubr.msk.bf16.vlgmr.msra.gmra.mxu0 %vm151_vm0, %v1961_v11 }
 0xd27   :  { %4223 = vmatprep.mubr.msk.f32.mxu0 %vm4682_vm1, %v4681_v15 }
 0xde6   :  { %v2017_v12 = vpop.f32.mrf.mxu0 }
 0xde7   :  { %v5119_v13 = vadd.f32 %v3925_v36, %v2017_v12 }
 0xde8   :  { %v4219_v14 = vpop.f32.mrf.mxu0 }
 0xde9   :  { %2190 = vrot.lane.b32.xlu0 %v5119_v13, %s4684_s25  ;;  %2025 = vrot.lane.b32.xlu1 %v5119_v13, %s4683_s2 }
 0xdea   :  { %v2020_v16 = vpop.f32.mrf.mxu0 }
 0xdeb   :  { %v5129_v18 = vadd.f32 %v3925_v36, %v2020_v16 }
 0xdec   :  { %v4220_v17 = vpop.f32.mrf.mxu0 }
 0xded   :  { %2520 = vrot.lane.b32.xlu0 %v5119_v13, %s4686_s26  ;;  %2188 = vrot.lane.b32.xlu1 %v5119_v13, %s4687_s28 }
 0xdf1   :  { %2355 = vrot.lane.b32.xlu1 %v5119_v13, %s4685_s3  ;;  %2699 = vrot.lane.b32.xlu0 %v5129_v18, %s4683_s2 }
 0xdf5   :  { %2353 = vrot.lane.b32.xlu1 %v5119_v13, %s4688_s29  ;;  %2862 = vrot.lane.b32.xlu0 %v5129_v18, %s4687_s28  ;;  %s5415_s28 = smov 16  }
 0xdf9   :  { %2518 = vrot.lane.b32.xlu1 %v5119_v13, %s4689_s11  ;;  %3027 = vrot.lane.b32.xlu0 %v5129_v18, %s4688_s29  ;;  %s5416_s29 = smov 24  }
 0xdfd   :  { %2864 = vrot.lane.b32.xlu1 %v5129_v18, %s4684_s25  ;;  %3192 = vrot.lane.b32.xlu0 %v5129_v18, %s4689_s11 }
 0xe01   :  { %3029 = vrot.lane.b32.xlu1 %v5129_v18, %s4685_s3 }
 0xe05   :  { %3194 = vrot.lane.b32.xlu1 %v5129_v18, %s4686_s26  ;;  %s5414_s26 = smov 8  }
 0xe5b   :  { %v2191_v19 = vpop.permute.xlu0 %2190  ;;  %v2026_v20 = vpop.permute.xlu1 %2025 }
 0xe5c   :  { %4222 = vmatpush3.xpose.msk.msra.mxu0 %vm271_vm2, %v2026_v20  ;;  %4232 = vmatpush3.xpose.msk.msra.mxu1 %vm271_vm2, %v2191_v19 }
 0xe5d   :  { %4241 = vmatprep.subr.mxu1 %v4681_v15  ;;  %4226 = vmatprep.subr.mxu0 %v4681_v15 }
 0xe5f   :  { %4224 = vmatmul.mubr.msk.f32.vlgmr.msra.gmra.mxu0 %vm271_vm2, %v5119_v13  ;;  %v2189_v21 = vpop.permute.xlu1 %2188  ;;  %v2521_v22 = vpop.permute.xlu0 %2520 }
 0xe60   :  { %4234 = vmatmul.mubr.msk.f32.vlgmr.msra.gmra.mxu1 %vm271_vm2, %v2189_v21  ;;  %4228 = vmatprep.mubr.msk.f32.mxu0 %vm4682_vm1, %v4681_v15 }
 0xe61   :  { %4243 = vmatprep.mubr.msk.f32.mxu1 %vm4682_vm1, %v4681_v15 }
 0xe63   :  { %v2356_v24 = vpop.permute.xlu1 %2355  ;;  %v2700_v25 = vpop.permute.xlu0 %2699 }
 0xe64   :  { %4242 = vmatpush3.xpose.msk.msra.mxu1 %vm271_vm2, %v2356_v24 }
 0xe65   :  { %4251 = vmatprep.subr.mxu1 %v4681_v15 }
 0xe67   :  { %v2354_v9 = vpop.permute.xlu1 %2353  ;;  %v2863_v27 = vpop.permute.xlu0 %2862 }
 0xe68   :  { %4244 = vmatmul.mubr.msk.f32.vlgmr.msra.gmra.mxu1 %vm271_vm2, %v2354_v9 }
 0xe69   :  { %4252 = vmatpush3.xpose.msk.msra.mxu1 %vm271_vm2, %v2521_v22  ;;  %4253 = vmatprep.mubr.msk.f32.mxu1 %vm4682_vm1, %v4681_v15 }
 0xe6a   :  { %4261 = vmatprep.subr.mxu1 %v4681_v15 }
 0xe6b   :  { %v2519_v26 = vpop.permute.xlu1 %2518  ;;  %v3028_v40 = vpop.permute.xlu0 %3027 }
 0xe6c   :  { %4254 = vmatmul.mubr.msk.f32.vlgmr.msra.gmra.mxu1 %vm271_vm2, %v2519_v26 }
 0xe6d   :  { %4262 = vmatpush3.xpose.msk.msra.mxu1 %vm271_vm2, %v2700_v25  ;;  %4263 = vmatprep.mubr.msk.f32.mxu1 %vm4682_vm1, %v4681_v15 }
 0xe6e   :  { %4271 = vmatprep.subr.mxu1 %v4681_v15 }
 0xe6f   :  { %v2865_v28 = vpop.permute.xlu1 %2864  ;;  %v3193_v33 = vpop.permute.xlu0 %3192 }
 0xe70   :  { %4264 = vmatmul.mubr.msk.f32.vlgmr.msra.gmra.mxu1 %vm271_vm2, %v5129_v18 }
 0xe71   :  { %4272 = vmatpush3.xpose.msk.msra.mxu1 %vm271_vm2, %v2865_v28  ;;  %4273 = vmatprep.mubr.msk.f32.mxu1 %vm4682_vm1, %v4681_v15 }
 0xe72   :  { %4281 = vmatprep.subr.mxu1 %v4681_v15 }
 0xe73   :  { %v3030_v29 = vpop.permute.xlu1 %3029 }
 0xe74   :  { %4274 = vmatmul.mubr.msk.f32.vlgmr.msra.gmra.mxu1 %vm271_vm2, %v2863_v27 }
 0xe75   :  { %4282 = vmatpush3.xpose.msk.msra.mxu1 %vm271_vm2, %v3030_v29  ;;  %4283 = vmatprep.mubr.msk.f32.mxu1 %vm4682_vm1, %v4681_v15 }
 0xe76   :  { %4291 = vmatprep.subr.mxu1 %v4681_v15 }
 0xe77   :  { %v3195_v30 = vpop.permute.xlu1 %3194 }
 0xe78   :  { %4284 = vmatmul.mubr.msk.f32.vlgmr.msra.gmra.mxu1 %vm271_vm2, %v3028_v40 }
 0xe79   :  { %4292 = vmatpush3.xpose.msk.msra.mxu1 %vm271_vm2, %v3195_v30  ;;  %4293 = vmatprep.mubr.msk.f32.mxu1 %vm4682_vm1, %v4681_v15 }
 0xe7a   :  { %4301 = vmatprep.subr.bf16.mxu1 %v4681_v15 }
 0xe7c   :  { %4294 = vmatmul.mubr.msk.f32.vlgmr.msra.gmra.mxu1 %vm271_vm2, %v3193_v33 }
 0xe7d   :  { %4305 = vmatprep.mubr.msk.bf16.mxu1 %vm4682_vm1, %v4681_v15 }
 0xf1f   :  { %v2097_v34 = vpop.f32.mrf.mxu0 }
 0xf20   :  { %v2098_v35 = vadd.f32 %v2097_v34, %v4898_v46  ;;  %v2262_v37 = vpop.f32.mrf.mxu1 }
 0xf21   :  { %v2263_v38 = vadd.f32 %v2262_v37, %v4898_v46  ;;  %v4225_v39 = vpop.f32.mrf.mxu0 }
 0xf22   :  { %v4235_v41 = vpop.f32.mrf.mxu1  ;;  %v2101_v42 = vsel %vm271_vm2, %v2098_v35, -inf }
 0xf23   :  { %2102 = vmax.xlane.f32.xlu1 %v2101_v42  ;;  %v2266_v43 = vsel %vm271_vm2, %v2263_v38, -inf }
 0xf24   :  { %2267 = vmax.xlane.f32.xlu0 %v2266_v43 }
 0xf28   :  { %v2427_v44 = vpop.f32.mrf.mxu1 }
 0xf29   :  { %v2428_v31 = vadd.f32 %v2427_v44, %v4898_v46 }
 0xf2a   :  { %v4245_v45 = vpop.f32.mrf.mxu1 }
 0xf2b   :  { %v2431_v47 = vsel %vm271_vm2, %v2428_v31, -inf }
 0xf2c   :  { %v2592_v32 = vpop.f32.mrf.mxu1  ;;  %2432 = vmax.xlane.f32.xlu0 %v2431_v47 }
 0xf2d   :  { %v2593_v48 = vadd.f32 %v2592_v32, %v4898_v46 }
 0xf2e   :  { %v4255_v49 = vpop.f32.mrf.mxu1 }
 0xf2f   :  { %v2596_v50 = vsel %vm271_vm2, %v2593_v48, -inf }
 0xf30   :  { %2597 = vmax.xlane.f32.xlu0 %v2596_v50  ;;  %v2771_v51 = vpop.f32.mrf.mxu1 }
 0xf31   :  { %v2772_v52 = vadd.f32 %v2771_v51, %v4966_v23 }
 0xf32   :  { %v4265_v53 = vpop.f32.mrf.mxu1 }
 0xf33   :  { %v2775_v54 = vsel %vm271_vm2, %v2772_v52, -inf }
 0xf34   :  { %v2936_v55 = vpop.f32.mrf.mxu1  ;;  %2776 = vmax.xlane.f32.xlu1 %v2775_v54 }
 0xf35   :  { %v2937_v56 = vadd.f32 %v2936_v55, %v4966_v23 }
 0xf36   :  { %v4275_v57 = vpop.f32.mrf.mxu1 }
 0xf37   :  { %v2940_v58 = vsel %vm271_vm2, %v2937_v56, -inf }
 0xf38   :  { %2941 = vmax.xlane.f32.xlu0 %v2940_v58  ;;  %v3101_v59 = vpop.f32.mrf.mxu1 }
 0xf39   :  { %v3102_v46 = vadd.f32 %v3101_v59, %v4966_v23 }
 0xf3a   :  { %v4285_v60 = vpop.f32.mrf.mxu1 }
 0xf3b   :  { %v3105_v61 = vsel %vm271_vm2, %v3102_v46, -inf }
 0xf3c   :  { %v3266_v62 = vpop.f32.mrf.mxu1  ;;  %3106 = vmax.xlane.f32.xlu1 %v3105_v61 }
 0xf3d   :  { %v3267_v63 = vadd.f32 %v3266_v62, %v4966_v23 }
 0xf3e   :  { %v4295_v0 = vpop.f32.mrf.mxu1 }
 0xf3f   :  { %v3270_v1 = vsel %vm271_vm2, %v3267_v63, -inf }
 0xf40   :  { %3271 = vmax.xlane.f32.xlu0 %v3270_v1 }
 0xf4d   :  { %2277 = vrot.lane.b32.xlu1 %v5119_v13, %s4690_s21 }
 0xf51   :  { %2442 = vrot.lane.b32.xlu1 %v5119_v13, %s4692_s4 }
 0xf56   :  { %2112 = vrot.lane.b32.xlu0 %v5119_v13, %s4679_s8 }
 0xfac   :  { %v2103_v2 = vpop.xlane.xlu1 %2102 }
 0xfad   :  { %v2104_v3 = vsub.f32 %v2098_v35, %v2103_v2  ;;  %v2268_v4 = vpop.xlane.xlu0 %2267 }
 0xfae   :  { %v2269_v5 = vsub.f32 %v2263_v38, %v2268_v4 }
 0xfaf   :  { %v2105_v6 = vmul.f32 1.442695, %v2104_v3 }
 0xfb0   :  { %v2270_v7 = vmul.f32 1.442695, %v2269_v5 }
 0xfb1   :  { %4473 = vpow2.f32 %v2105_v6 }
 0xfb2   :  { %4475 = vpow2.f32 %v2270_v7 }
 0xfb5   :  { %v2433_v23 = vpop.xlane.xlu0 %2432 }
 0xfb6   :  { %v2434_v21 = vsub.f32 %v2428_v31, %v2433_v23 }
 0xfb8   :  { %v2435_v9 = vmul.f32 1.442695, %v2434_v21 }
 0xfb9   :  { %v2598_v16 = vpop.xlane.xlu0 %2597 }
 0xfba   :  { %v2599_v22 = vsub.f32 %v2593_v48, %v2598_v16  ;;  %4477 = vpow2.f32 %v2435_v9 }
 0xfbc   :  { %v2600_v26 = vmul.f32 1.442695, %v2599_v22 }
 0xfbd   :  { %v2777_v24 = vpop.xlane.xlu1 %2776 }
 0xfbe   :  { %v4474_v11 = vpop.eup %4473  ;;  %v2778_v25 = vsub.f32 %v2772_v52, %v2777_v24  ;;  %4479 = vpow2.f32 %v2600_v26 }
 0xfbf   :  { %v5215_v36 = vpop.eup %4475  ;;  %v2107_v12 = vsel %vm271_vm2, %v4474_v11, 0.0 }
 0xfc0   :  { %2108 = vadd.xlane.f32.xlu1 %v2107_v12  ;;  %v2272_v14 = vsel %vm271_vm2, %v5215_v36, 0.0  ;;  %v2779_v29 = vmul.f32 1.442695, %v2778_v25  ;;  %v4413_v25 = vld [vmem:[%s5382_s6 + $0x18] sm:$0xff]  }
 0xfc1   :  { %2273 = vadd.xlane.f32.xlu0 %v2272_v14  ;;  %v2942_v17 = vpop.xlane.xlu0 %2941  ;;  %4302 = vmatpush3.bf16.msra.mxu1 %v4413_v25 }
 0xfc2   :  { %v2943_v27 = vsub.f32 %v2937_v56, %v2942_v17  ;;  %4481 = vpow2.f32 %v2779_v29  ;;  %4303 = vmatprep.subr.bf16.mxu1 %v4681_v15 }
 0xfc4   :  { %v2944_v30 = vmul.f32 1.442695, %v2943_v27 }
 0xfc5   :  { %v3107_v28 = vpop.xlane.xlu1 %3106 }
 0xfc6   :  { %v3108_v40 = vsub.f32 %v3102_v46, %v3107_v28  ;;  %4483 = vpow2.f32 %v2944_v30  ;;  %v4414_v28 = vld [vmem:[%s5382_s6 + $0x10] sm:$0xff]  }
 0xfc7   :  { %4304 = vmatpush3.bf16.msra.mxu1 %v4414_v28 }
 0xfc8   :  { %v3109_v33 = vmul.f32 1.442695, %v3108_v40  ;;  %4317 = vmatprep.subr.bf16.mxu1 %v4681_v15 }
 0xfc9   :  { %v3272_v19 = vpop.xlane.xlu0 %3271  ;;  %v2278_v48 = vpop.permute.xlu1 %2277 }
 0xfca   :  { %v3273_v34 = vsub.f32 %v3267_v63, %v3272_v19  ;;  %4485 = vpow2.f32 %v3109_v33 }
 0xfcc   :  { %v3274_v35 = vmul.f32 1.442695, %v3273_v34 }
 0xfcd   :  { %v2113_v20 = vpop.permute.xlu0 %2112  ;;  %v2443_v49 = vpop.permute.xlu1 %2442 }
 0xfce   :  { %4227 = vmatpush3.msra.mxu0 %v2113_v20  ;;  %4487 = vpow2.f32 %v3274_v35 }
 0xfcf   :  { %4236 = vmatprep.subr.mxu0 %v4681_v15 }
 0xfd1   :  { %2786 = vrot.lane.b32.xlu1 %v5129_v18, %s4679_s8 }
 0xfd7   :  { %2607 = vrot.lane.b32.xlu0 %v5119_v13, %s5413_s5  ;;  %v4478_v13 = vpop.eup %4477 }
 0xfd8   :  { %v4480_v37 = vpop.eup %4479  ;;  %v2437_v38 = vsel %vm271_vm2, %v4478_v13, 0.0 }
 0xfd9   :  { %v5226_v39 = vpop.eup %4481  ;;  %v2602_v41 = vsel %vm271_vm2, %v4480_v37, 0.0 }
 0xfda   :  { %v5229_v42 = vpop.eup %4483  ;;  %v2781_v43 = vsel %vm271_vm2, %v5226_v39, 0.0 }
 0xfdb   :  { %v5233_v44 = vpop.eup %4485  ;;  %v2946_v31 = vsel %vm271_vm2, %v5229_v42, 0.0 }
 0xfdc   :  { %v3111_v45 = vsel %vm271_vm2, %v5233_v44, 0.0  ;;  %v5239_v47 = vpop.eup %4487 }
 0xfdd   :  { %v3276_v32 = vsel %vm271_vm2, %v5239_v47, 0.0 }
 0xff5   :  { %2438 = vadd.xlane.f32.xlu1 %v2437_v38 }
 0xff6   :  { %2603 = vadd.xlane.f32.xlu0 %v2602_v41 }
 0xff9   :  { %2782 = vadd.xlane.f32.xlu1 %v2781_v43 }
 0xffa   :  { %2947 = vadd.xlane.f32.xlu0 %v2946_v31 }
 0xffd   :  { %3112 = vadd.xlane.f32.xlu1 %v3111_v45 }
0x1001   :  { %3277 = vadd.xlane.f32.xlu1 %v3276_v32 }
0x1010   :  { %2951 = vrot.lane.b32.xlu0 %v5129_v18, %s4690_s21 }
0x1012   :  { %3116 = vrot.lane.b32.xlu1 %v5129_v18, %s4692_s4 }
0x1014   :  { %3281 = vrot.lane.b32.xlu0 %v5129_v18, %s5413_s5 }
0x1049   :  { %v2109_v50 = vpop.xlane.xlu1 %2108 }
0x104a   :  { %4489 = vrcp.f32 %v2109_v50  ;;  %v2274_v51 = vpop.xlane.xlu0 %2273 }
0x104b   :  { %4491 = vrcp.f32 %v2274_v51 }
0x104d   :  { %v2787_v18 = vpop.permute.xlu1 %2786 }
0x104e   :  { %v2608_v56 = vpop.permute.xlu0 %2607 }
0x1057   :  { %v4490_v52 = vpop.eup %4489 }
0x1058   :  { %v2111_v53 = vmul.f32 %v4490_v52, %v4474_v11  ;;  %v4492_v54 = vpop.eup %4491 }
0x1059   :  { %v2276_v55 = vmul.f32 %v4492_v54, %v5215_v36 }
0x105a   :  { %4229 = vmatmul.mubr.msk.f32.vlgmr.msra.gmra.mxu0 %vm271_vm2, %v2111_v53 }
0x105b   :  { %4237 = vmatpush3.msra.mxu0 %v2278_v48  ;;  %4238 = vmatprep.mubr.msk.f32.mxu0 %vm4682_vm1, %v4681_v15 }
0x105c   :  { %4246 = vmatprep.subr.mxu0 %v4681_v15 }
0x105e   :  { %4239 = vmatmul.mubr.msk.f32.vlgmr.msra.gmra.mxu0 %vm271_vm2, %v2276_v55  ;;  %v3958_v55 = vld [vmem:[%s5383_s7 + $0x1] ss:$0 sm:$0xff] }
0x105f   :  { %4247 = vmatpush3.msra.mxu0 %v2443_v49  ;;  %4248 = vmatprep.mubr.msk.f32.mxu0 %vm4682_vm1, %v4681_v15 }
0x1060   :  { %4256 = vmatprep.subr.mxu0 %v4681_v15 }
0x107e   :  { %v2439_v57 = vpop.xlane.xlu1 %2438 }
0x107f   :  { %4493 = vrcp.f32 %v2439_v57  ;;  %v2604_v58 = vpop.xlane.xlu0 %2603 }
0x1080   :  { %4495 = vrcp.f32 %v2604_v58 }
0x1082   :  { %v2783_v59 = vpop.xlane.xlu1 %2782 }
0x1083   :  { %4497 = vrcp.f32 %v2783_v59  ;;  %v2948_v46 = vpop.xlane.xlu0 %2947 }
0x1084   :  { %4499 = vrcp.f32 %v2948_v46 }
0x1086   :  { %v3113_v60 = vpop.xlane.xlu1 %3112 }
0x1087   :  { %4501 = vrcp.f32 %v3113_v60  ;;  %v2952_v5 = vpop.permute.xlu0 %2951 }
0x108a   :  { %v3278_v0 = vpop.xlane.xlu1 %3277 }
0x108b   :  { %4503 = vrcp.f32 %v3278_v0  ;;  %v3282_v12 = vpop.permute.xlu0 %3281 }
0x108c   :  { %v4494_v61 = vpop.eup %4493 }
0x108d   :  { %v2441_v62 = vmul.f32 %v4494_v61, %v4478_v13  ;;  %v4496_v63 = vpop.eup %4495 }
0x108e   :  { %v2606_v1 = vmul.f32 %v4496_v63, %v4480_v37  ;;  %v3117_v23 = vpop.permute.xlu1 %3116 }
0x108f   :  { %4249 = vmatmul.mubr.msk.f32.vlgmr.msra.gmra.mxu0 %vm271_vm2, %v2441_v62 }
0x1090   :  { %4257 = vmatpush3.msra.mxu0 %v2608_v56  ;;  %4258 = vmatprep.mubr.msk.f32.mxu0 %vm4682_vm1, %v4681_v15  ;;  %v4498_v2 = vpop.eup %4497 }
0x1091   :  { %4266 = vmatprep.subr.mxu0 %v4681_v15  ;;  %v2785_v3 = vmul.f32 %v4498_v2, %v5226_v39  ;;  %v4500_v4 = vpop.eup %4499 }
0x1092   :  { %v2950_v6 = vmul.f32 %v4500_v4, %v5229_v42 }
0x1093   :  { %4259 = vmatmul.mubr.msk.f32.vlgmr.msra.gmra.mxu0 %vm271_vm2, %v2606_v1 }
0x1094   :  { %4267 = vmatpush3.msra.mxu0 %v2787_v18  ;;  %4268 = vmatprep.mubr.msk.f32.mxu0 %vm4682_vm1, %v4681_v15  ;;  %v4502_v7 = vpop.eup %4501 }
0x1095   :  { %4276 = vmatprep.subr.mxu0 %v4681_v15  ;;  %v3115_v11 = vmul.f32 %v4502_v7, %v5233_v44 }
0x1097   :  { %4269 = vmatmul.mubr.msk.f32.vlgmr.msra.gmra.mxu0 %vm271_vm2, %v2785_v3 }
0x1098   :  { %4277 = vmatpush3.msra.mxu0 %v2952_v5  ;;  %4278 = vmatprep.mubr.msk.f32.mxu0 %vm4682_vm1, %v4681_v15  ;;  %v4504_v36 = vpop.eup %4503 }
0x1099   :  { %4286 = vmatprep.subr.mxu0 %v4681_v15  ;;  %v3280_v14 = vmul.f32 %v4504_v36, %v5239_v47 }
0x109b   :  { %4279 = vmatmul.mubr.msk.f32.vlgmr.msra.gmra.mxu0 %vm271_vm2, %v2950_v6 }
0x109c   :  { %4287 = vmatpush3.msra.mxu0 %v3117_v23  ;;  %4288 = vmatprep.mubr.msk.f32.mxu0 %vm4682_vm1, %v4681_v15 }
0x109d   :  { %4296 = vmatprep.subr.mxu0 %v4681_v15 }
0x109f   :  { %4289 = vmatmul.mubr.msk.f32.vlgmr.msra.gmra.mxu0 %vm271_vm2, %v3115_v11  ;;  %v4416_v11 = vld [vmem:[%s5386_s10 + $0x10] sm:$0xff]  }
0x10a0   :  { %4297 = vmatpush3.msra.mxu0 %v3282_v12  ;;  %4298 = vmatprep.mubr.msk.f32.mxu0 %vm4682_vm1, %v4681_v15 }
0x10a1   :  { %4309 = vmatprep.subr.bf16.mxu0 %v4681_v15 }
0x10a3   :  { %4299 = vmatmul.mubr.msk.f32.vlgmr.msra.gmra.mxu0 %vm271_vm2, %v3280_v14 }
0x10a4   :  { %4313 = vmatprep.mubr.msk.bf16.mxu0 %vm4682_vm1, %v4681_v15 }
0x111a   :  { %v2184_v16 = vpop.f32.mrf.mxu0 }
0x111c   :  { %v4230_v17 = vpop.f32.mrf.mxu0 }
0x111e   :  { %v2349_v19 = vpop.f32.mrf.mxu0 }
0x1120   :  { %v4240_v20 = vpop.f32.mrf.mxu0 }
0x114f   :  { %v2514_v21 = vpop.f32.mrf.mxu0 }
0x1151   :  { %v4250_v22 = vpop.f32.mrf.mxu0 }
0x1152   :  { %v3962_v22 = vld [vmem:[#allocation7 + $0x1] ss:$0 sm:$0xff] }
0x1153   :  { %v2679_v24 = vpop.f32.mrf.mxu0 }
0x1155   :  { %v4260_v9 = vpop.f32.mrf.mxu0 }
0x1157   :  { %v2858_v26 = vpop.f32.mrf.mxu0 }
0x1159   :  { %v4270_v27 = vpop.f32.mrf.mxu0 }
0x115b   :  { %v3023_v29 = vpop.f32.mrf.mxu0 }
0x115c   :  { %v4386_v40 = vpack.i.bf16 %v3023_v29, %v2349_v19 }
0x115d   :  { %v4280_v30 = vpop.f32.mrf.mxu0 }
0x115e   :  { %4387 = vrot.lane.b32.xlu1 %v4386_v40, %s5414_s26  ;;  %v4417_v30 = vld [vmem:[%s5388_s12 + $0x38] sm:$0xff]  }
0x115f   :  { %v3188_v33 = vpop.f32.mrf.mxu0 }
0x1160   :  { %v4391_v34 = vpack.i.bf16 %v3188_v33, %v2514_v21  ;;  %v4418_v33 = vld [vmem:[%s5388_s12 + $0x30] sm:$0xff]  }
0x1161   :  { %v4290_v35 = vpop.f32.mrf.mxu0 }
0x1162   :  { %4392 = vrot.lane.b32.xlu0 %v4391_v34, %s5415_s28  ;;  %v4419_v34 = vld [vmem:[%s5388_s12 + $0x28] sm:$0xff]   ;;  %v4420_v35 = vld [vmem:[%s5388_s12 + $0x20] sm:$0xff]  }
0x1163   :  { %v3353_v13 = vpop.f32.mrf.mxu0 }
0x1164   :  { %v4396_v37 = vpack.i.bf16 %v3353_v13, %v2679_v24  ;;  %v3968_v13 = vld [vmem:[#allocation10 + $0x1] ss:$0 sm:$0xff] }
0x1165   :  { %v4300_v38 = vpop.f32.mrf.mxu0 }
0x1166   :  { %4397 = vrot.lane.b32.xlu1 %v4396_v37, %s5416_s29 }
0x11d0   :  { %v4388_v39 = vpop.permute.xlu1 %4387 }
0x11d1   :  { %v4390_v42 = vunpack.i.h.bf16 %v4388_v39  ;;  %v4389_v43 = vunpack.i.l.bf16 %v4388_v39 }
0x11d3   :  { %v3369_v47 = vsel %vm271_vm2, %v2858_v26, %v4390_v42  ;;  %v2695_v32 = vsel %vm271_vm2, %v2184_v16, %v4389_v43  ;;  %v3963_v26 = vld [vmem:[#allocation8 + $0x1] ss:$0 sm:$0xff] }
0x11d4   :  { %v4393_v41 = vpop.permute.xlu0 %4392 }
0x11d5   :  { %v4395_v44 = vunpack.i.h.bf16 %v4393_v41  ;;  %v4394_v31 = vunpack.i.l.bf16 %v4393_v41 }
0x11d7   :  { %v3370_v50 = vsel %vm941_vm3, %v3369_v47, %v4395_v44  ;;  %v2696_v51 = vsel %vm941_vm3, %v2695_v32, %v4394_v31 }
0x11d8   :  { %v4398_v45 = vpop.permute.xlu1 %4397 }
0x11d9   :  { %v4400_v48 = vunpack.i.h.bf16 %v4398_v45  ;;  %v4399_v49 = vunpack.i.l.bf16 %v4398_v45 }
0x11db   :  { %v3371_v52 = vsel %vm943_vm4, %v3370_v50, %v4400_v48  ;;  %v2697_v53 = vsel %vm943_vm4, %v2696_v51, %v4399_v49 }
0x11dc   :  { %v3379_v54 = vpack.c.bf16 %v3371_v52, %v2697_v53 }
0x11de   :  { %4306 = vmatmul.mubr.msk.bf16.vlgmr.msra.gmra.mxu1 %vm151_vm0, %v3379_v54 }
0x11df   :  { %4325 = vmatprep.mubr.msk.bf16.mxu1 %vm4682_vm1, %v4681_v15  ;;  %4318 = vmatpush3.bf16.msra.mxu1 %v4417_v30 }
0x11e0   :  { %4319 = vmatprep.subr.bf16.mxu1 %v4681_v15 }
0x11e3   :  { %4320 = vmatpush3.bf16.msra.mxu1 %v4418_v33 }
0x11e4   :  { %4321 = vmatprep.subr.bf16.mxu1 %v4681_v15 }
0x11e7   :  { %4322 = vmatpush3.bf16.msra.mxu1 %v4419_v34 }
0x11e8   :  { %4323 = vmatprep.subr.bf16.mxu1 %v4681_v15 }
0x11eb   :  { %4324 = vmatpush3.bf16.msra.mxu1 %v4420_v35  ;;  %v3990_v35 = vld [vmem:[%s5391_s15 + $0x1] ss:$0 sm:$0xff] }
0x129e   :  { %v3435_v18 = vpop.f32.mrf.mxu1 }
0x129f   :  { %v3436_v56 = vadd.f32 %v3958_v55, %v3435_v18 }
0x12a0   :  { %v4307_v57 = vpop.f32.mrf.mxu1 }
0x12a1   :  { %v3442_v58 = vadd.f32 %v3436_v56, %v5107_v8 }
0x12a2   :  { %v3438_v59 = vpop.f32.mrf.mxu1 }
0x12a3   :  { %v3439_v46 = vadd.f32 %v3958_v55, %v3438_v59  ;;  %v3448_v60 = vsel %vm151_vm0, %v3442_v58, 0.0 }
0x12a4   :  { %3449 = vadd.xlane.f32.xlu0 %v3448_v60  ;;  %v4308_v61 = vpop.f32.mrf.mxu1  ;;  %v3981_v60 = vld [vmem:[%s5389_s13 + $0x1] ss:$0 sm:$0xff] }
0x12a5   :  { %v3443_v62 = vadd.f32 %v3439_v46, %v5109_v10  ;;  %v4415_v10 = vld [vmem:[%s5386_s10 + $0x18] sm:$0xff]  }
0x12a6   :  { %4310 = vmatpush3.bf16.msra.mxu0 %v4415_v10 }
0x12a7   :  { %v3451_v63 = vsel %vm151_vm0, %v3443_v62, 0.0  ;;  %4311 = vmatprep.subr.bf16.mxu0 %v4681_v15 }
0x12a8   :  { %3452 = vadd.xlane.f32.xlu1 %v3451_v63 }
0x12aa   :  { %4312 = vmatpush3.bf16.msra.mxu0 %v4416_v11 }
0x12ab   :  { %4329 = vmatprep.subr.bf16.mxu0 %v4681_v15 }
0x132d   :  { %v3450_v0 = vpop.xlane.xlu0 %3449 }
0x132e   :  { %v3454_v1 = vmul.f32 0.03125, %v3450_v0 }
0x1330   :  { %v3456_v2 = vsub.f32 %v3442_v58, %v3454_v1 }
0x1331   :  { %v3453_v3 = vpop.xlane.xlu1 %3452 }
0x1332   :  { %v3455_v4 = vmul.f32 0.03125, %v3453_v3  ;;  %v3458_v5 = vmul.f32 %v3456_v2, %v3456_v2 }
0x1334   :  { %v3457_v6 = vsub.f32 %v3443_v62, %v3455_v4  ;;  %v3460_v8 = vsel %vm151_vm0, %v3458_v5, 0.0 }
0x1335   :  { %3461 = vadd.xlane.f32.xlu0 %v3460_v8 }
0x1336   :  { %v3459_v7 = vmul.f32 %v3457_v6, %v3457_v6 }
0x1338   :  { %v3463_v23 = vsel %vm151_vm0, %v3459_v7, 0.0 }
0x1339   :  { %3464 = vadd.xlane.f32.xlu0 %v3463_v23 }
0x13be   :  { %v3462_v36 = vpop.xlane.xlu0 %3461 }
0x13bf   :  { %v3466_v12 = vmul.f32 0.03125, %v3462_v36 }
0x13c1   :  { %v3468_v14 = vadd.f32 1e-12, %v3466_v12 }
0x13c2   :  { %v3465_v16 = vpop.xlane.xlu0 %3464 }
0x13c3   :  { %4505 = vrsqrt.f32 %v3468_v14  ;;  %v3467_v17 = vmul.f32 0.03125, %v3465_v16 }
0x13c5   :  { %v3469_v19 = vadd.f32 1e-12, %v3467_v17 }
0x13c7   :  { %4507 = vrsqrt.f32 %v3469_v19  ;;  %v4421_v19 = vld [vmem:[#allocation11 + $0x8] sm:$0xff]  }
0x13d0   :  { %v4506_v20 = vpop.eup %4505 }
0x13d1   :  { %v3472_v21 = vmul.f32 %v4506_v20, %v3456_v2  ;;  %v4422_v20 = vld [vmem:[#allocation11] sm:$0xff]  }
0x13d3   :  { %v3480_v25 = vmul.f32 %v3962_v22, %v3472_v21 }
0x13d4   :  { %v4508_v24 = vpop.eup %4507 }
0x13d5   :  { %v3473_v9 = vmul.f32 %v4508_v24, %v3457_v6  ;;  %v3488_v28 = vadd.f32 %v3963_v26, %v3480_v25 }
0x13d7   :  { %v3481_v27 = vmul.f32 %v3962_v22, %v3473_v9 }
0x13d9   :  { %v3489_v29 = vadd.f32 %v3963_v26, %v3481_v27 }
0x13db   :  { %v3497_v40 = vpack.c.bf16 %v3489_v29, %v3488_v28 }
0x13dd   :  { %4314 = vmatmul.mubr.msk.bf16.vlgmr.msra.gmra.mxu0 %vm151_vm0, %v3497_v40  ;;  %v3989_v40 = vld [vmem:[%s5390_s14 + $0x1] ss:$0 sm:$0xff] }
0x13de   :  { %4333 = vmatprep.mubr.msk.bf16.mxu0 %vm4682_vm1, %v4681_v15  ;;  %4330 = vmatpush3.bf16.msra.mxu0 %v4421_v19 }
0x13df   :  { %4331 = vmatprep.subr.bf16.mxu0 %v4681_v15 }
0x13e2   :  { %4332 = vmatpush3.bf16.msra.mxu0 %v4422_v20 }
0x13e3   :  { %4337 = vmatprep.subr.bf16.mxu0 %v4681_v15 }
0x149d   :  { %v3553_v37 = vpop.f32.mrf.mxu0 }
0x149e   :  { %v3554_v38 = vadd.f32 %v3968_v13, %v3553_v37 }
0x149f   :  { %v4315_v39 = vpop.f32.mrf.mxu0 }
0x14a0   :  { %v3562_v41 = vmul.f32 0.044715, %v3554_v38  ;;  %v3560_v18 = vmul.f32 0.5, %v3554_v38 }
0x14a1   :  { %v3556_v42 = vpop.f32.mrf.mxu0 }
0x14a2   :  { %v3564_v43 = vmul.f32 %v3562_v41, %v3554_v38  ;;  %v3557_v44 = vadd.f32 %v3968_v13, %v3556_v42  ;;  %v4423_v42 = vld [vmem:[%s5394_s18 + $0x8] sm:$0xff]  }
0x14a3   :  { %v4316_v31 = vpop.f32.mrf.mxu0 }
0x14a4   :  { %v3566_v45 = vmul.f32 %v3564_v43, %v3554_v38  ;;  %v3563_v47 = vmul.f32 0.044715, %v3557_v44  ;;  %v3561_v56 = vmul.f32 0.5, %v3557_v44  ;;  %v4424_v43 = vld [vmem:[%s5394_s18] sm:$0xff]   ;;  %s4694_s18 = smov [#allocation13]  }
0x14a5   :  { %s3860_s11 = sshll.u32 %s4694_s18, 4  ;;  %s3861_s11 = int_to_ptr.vmem [resolvable:$true] %s3860_s11 }
0x14a6   :  { %v3568_v32 = vadd.f32 %v3566_v45, %v3554_v38  ;;  %v3565_v48 = vmul.f32 %v3563_v47, %v3557_v44  ;;  %p4644_p3 = scmp.lt.s32.totalorder %s3861_s11, %s3861_s11 }
0x14a8   :  { %v3570_v49 = vmul.f32 0.7978846, %v3568_v32  ;;  %v3567_v50 = vmul.f32 %v3565_v48, %v3557_v44 }
0x14aa   :  { %4509 = vtanh.f32 %v3570_v49  ;;  %v3569_v51 = vadd.f32 %v3567_v50, %v3557_v44  ;;  %v3991_v44 = vld [vmem:[%s5393_s17] ss:$0 sm:$0xff]  ;;  %s4639_s17 = scalar_lea.vmem %s3861_s11, 32 }
0x14ab   :  { %p4640_p2 = scmp.ne.s32.totalorder %s3861_s11, %s4639_s17  ;;  %p4645_p4 = scmp.lt.s32.totalorder %s4639_s17, %s4639_s17 }
0x14ac   :  { %v3571_v52 = vmul.f32 0.7978846, %v3569_v51 }
0x14ad   :  { %p4646_p5 = por %p4645_p4, %p4644_p3 }
0x14ae   :  { %4511 = vtanh.f32 %v3571_v52 }
0x14af   :  { %p4647_p6 = pnand %p4646_p5, %p4640_p2 }
0x14b7   :  { %v4510_v53 = vpop.eup %4509 }
0x14b8   :  { %v3574_v54 = vadd.f32 1.0, %v4510_v53 }
0x14ba   :  { %v3576_v58 = vmul.f32 %v3574_v54, %v3560_v18 }
0x14bb   :  { %v4512_v55 = vpop.eup %4511 }
0x14bc   :  { %v3575_v57 = vadd.f32 1.0, %v4512_v55 }
0x14be   :  { %v3577_v59 = vmul.f32 %v3575_v57, %v3561_v56 }
0x14c0   :  { %v3589_v46 = vpack.c.bf16 %v3577_v59, %v3576_v58 }
0x14c2   :  { %4326 = vmatmul.mubr.msk.bf16.vlgmr.msra.gmra.mxu1 %vm1863_vm5, %v3589_v46 }
0x1582   :  { %v3657_v61 = vpop.f32.mrf.mxu1 }
0x1583   :  { %v3658_v62 = vadd.f32 %v3981_v60, %v3657_v61 }
0x1584   :  { %v4327_v63 = vpop.f32.mrf.mxu1 }
0x1585   :  { %v3664_v0 = vadd.f32 %v3658_v62, %v3488_v28 }
0x1586   :  { %v3660_v1 = vpop.f32.mrf.mxu1 }
0x1587   :  { %v3661_v2 = vadd.f32 %v3981_v60, %v3660_v1  ;;  %v3670_v3 = vsel %vm151_vm0, %v3664_v0, 0.0 }
0x1588   :  { %3671 = vadd.xlane.f32.xlu1 %v3670_v3  ;;  %v4328_v4 = vpop.f32.mrf.mxu1 }
0x1589   :  { %v3665_v5 = vadd.f32 %v3661_v2, %v3489_v29 }
0x158b   :  { %v3673_v6 = vsel %vm151_vm0, %v3665_v5, 0.0 }
0x158c   :  { %3674 = vadd.xlane.f32.xlu0 %v3673_v6 }
0x1611   :  { %v3672_v8 = vpop.xlane.xlu1 %3671 }
0x1612   :  { %v3676_v7 = vmul.f32 0.03125, %v3672_v8 }
0x1614   :  { %v3678_v23 = vsub.f32 %v3664_v0, %v3676_v7 }
0x1615   :  { %v3675_v10 = vpop.xlane.xlu0 %3674 }
0x1616   :  { %v3677_v11 = vmul.f32 0.03125, %v3675_v10  ;;  %v3680_v36 = vmul.f32 %v3678_v23, %v3678_v23 }
0x1618   :  { %v3679_v12 = vsub.f32 %v3665_v5, %v3677_v11  ;;  %v3682_v14 = vsel %vm151_vm0, %v3680_v36, 0.0 }
0x1619   :  { %3683 = vadd.xlane.f32.xlu1 %v3682_v14 }
0x161a   :  { %v3681_v16 = vmul.f32 %v3679_v12, %v3679_v12 }
0x161c   :  { %v3685_v17 = vsel %vm151_vm0, %v3681_v16, 0.0 }
0x161d   :  { %3686 = vadd.xlane.f32.xlu0 %v3685_v17 }
0x16a2   :  { %v3684_v21 = vpop.xlane.xlu1 %3683 }
0x16a3   :  { %v3688_v22 = vmul.f32 0.03125, %v3684_v21 }
0x16a5   :  { %v3690_v24 = vadd.f32 1e-12, %v3688_v22 }
0x16a6   :  { %v3687_v9 = vpop.xlane.xlu0 %3686 }
0x16a7   :  { %4513 = vrsqrt.f32 %v3690_v24  ;;  %v3689_v25 = vmul.f32 0.03125, %v3687_v9 }
0x16a9   :  { %v3691_v26 = vadd.f32 1e-12, %v3689_v25 }
0x16ab   :  { %4515 = vrsqrt.f32 %v3691_v26 }
0x16b4   :  { %v4514_v27 = vpop.eup %4513 }
0x16b5   :  { %v3694_v28 = vmul.f32 %v4514_v27, %v3678_v23 }
0x16b7   :  { %v3702_v33 = vmul.f32 %v3989_v40, %v3694_v28 }
0x16b8   :  { %v4516_v29 = vpop.eup %4515 }
0x16b9   :  { %v3695_v30 = vmul.f32 %v4516_v29, %v3679_v12  ;;  %v3710_v37 = vadd.f32 %v3990_v35, %v3702_v33 }
0x16bb   :  { %v3703_v34 = vmul.f32 %v3989_v40, %v3695_v30 }
0x16bd   :  { %v3711_v13 = vadd.f32 %v3990_v35, %v3703_v34 }
0x16bf   :  { %v3713_v38 = vrot.slane %v3711_v13, 7 }
0x16c1   :  { %v3716_v39 = vsel %vm3715_vm6, %v3710_v37, %v3713_v38 }
0x16c2   :  { %v3722_v41 = vpack.c.bf16 %v3716_v39, %v3716_v39 }
0x16c4   :  { %4334 = vmatmul.mubr.msk.bf16.vlgmr.msra.gmra.mxu0 %vm151_vm0, %v3722_v41 }
0x16c5   :  { %4341 = vmatprep.mubr.msk.bf16.mxu0 %vm4682_vm1, %v4681_v15  ;;  %4338 = vmatpush3.bf16.msra.mxu0 %v4423_v42 }
0x16c6   :  { %4339 = vmatprep.subr.bf16.mxu0 %v4681_v15  ;;  %v3995_v15 = vld [vmem:[%s5395_s19] ss:$0 sm:$0xff] }
0x16c9   :  { %4340 = vmatpush3.bf16.msra.mxu0 %v4424_v43 }
0x1784   :  { %v3778_v31 = vpop.f32.mrf.mxu0 }
0x1785   :  { %v3779_v45 = vadd.f32 %v3991_v44, %v3778_v31 }
0x1786   :  { %v4335_v47 = vpop.f32.mrf.mxu0 }
0x1787   :  { %4517 = vtanh.f32 %v3779_v45 }
0x1788   :  { %v3781_v32 = vpop.f32.mrf.mxu0 }
0x178a   :  { %v4336_v48 = vpop.f32.mrf.mxu0 }
0x1794   :  { %v4518_v49 = vpop.eup %4517 }
0x1795   :  { %v3790_v50 = vpack.c.bf16 %v4518_v49, %v4518_v49 }
0x1797   :  { %4342 = vmatmul.mubr.msk.bf16.vlgmr.msra.gmra.mxu0 %vm151_vm0, %v3790_v50 }
0x1857   :  { %v3846_v51 = vpop.f32.mrf.mxu0 }
0x1858   :  { %v3847_v52 = vadd.f32 %v3995_v15, %v3846_v51 }
0x1859   :  { %v4343_v53 = vpop.f32.mrf.mxu0 }
0x185a   :  { %3853 = vst.msk [vmem:[#allocation13] sm:$0x3] %vm3852_vm7, %v3847_v52 }
0x185b   :  { %v3849_v54 = vpop.f32.mrf.mxu0 }
0x185c   :  { %4650 = shalt.err (!%p4647_p6)
}
0x185d   :  { %3863 = dma.vmem_to_hbm [thread:$0]  %s3861_s11, 32, %s5396_s20, [#allocation4]   ;;  %v4344_v55 = vpop.f32.mrf.mxu0 }
0x185e   :  { %4667 = dma.done.wait [#allocation4], 32  }
0x185f   :  { %4668 = vsyncadd [#allocation4], 4294967264 }
0x1860   :  { %3867 = vsyncpa [#allocation3], 1 }
0x1861   :  { %3868 = vsyncpa [#allocation6], 1 }
0x1862   :  { %3869 = vsyncpa [#allocation9], 1 }
0x1863   :  { %3870 = vsyncpa [#allocation12], 1 }
0x1864   :  { %3871 = vsyncpa [#allocation4], 1 }

</bundles_post_ra>
